<compile_context>
chip_gen: v7x
topology: tpu7x:2x2x1
jax: 0.10.0
libtpu: 0.0.40
codegen_flags: <defaults>
</compile_context>

<pallas_src>
from functools import partial

import jax
import jax.numpy as jnp
from jax.experimental import pallas as pl
from jax.experimental.pallas import tpu as pltpu

# ---- small, module-consistent shapes -------------------------------------
H = 32          # hidden size == embedding size
V = 32          # vocabulary size
T = 8           # input sequence length
N_LAYERS = 1    # decoder.n_layers
MAX_LEN = 6     # max_length passed to forward()
SOS_token = 1


# ---------------------------------------------------------------------------
# Pallas kernel 1: one full GRU direction (PyTorch nn.GRU gate semantics)
#   gi = x @ W_ih^T + b_ih   (batched over all T steps, no recurrent dep)
#   r = sigmoid(gi_r + gh_r); z = sigmoid(gi_z + gh_z)
#   n = tanh(gi_n + r * gh_n);  h' = (1-z)*n + z*h
# grid=(2,): program 0 = forward direction, program 1 = backward direction
# (its input sequence is pre-reversed by the wrapper).
# ---------------------------------------------------------------------------
def _encoder_dir_kernel(emb_ref, wih_ref, whh_ref, bih_ref, bhh_ref,
                        out_ref, hlast_ref):
    t_len = emb_ref.shape[0]
    n_h = whh_ref.shape[0]
    # batched input projection for all timesteps: (T, 3H)
    gi = jnp.dot(emb_ref[...], wih_ref[...],
                 preferred_element_type=jnp.float32) + bih_ref[...]
    whh = whh_ref[...]
    bhh = bhh_ref[...]

    h = jnp.zeros((1, n_h), jnp.float32)
    rows = []
    for t in range(t_len):                       # static unroll (T small)
        gh = jnp.dot(h, whh, preferred_element_type=jnp.float32) + bhh
        gi_t = gi[t:t + 1, :]
        r = jax.nn.sigmoid(gi_t[:, :n_h] + gh[:, :n_h])
        z = jax.nn.sigmoid(gi_t[:, n_h:2 * n_h] + gh[:, n_h:2 * n_h])
        n = jnp.tanh(gi_t[:, 2 * n_h:] + r * gh[:, 2 * n_h:])
        h = (1.0 - z) * n + z * h
        rows.append(h)
    out_ref[...] = jnp.concatenate(rows, axis=0)   # (T, H), one dense write
    hlast_ref[...] = h                             # (1, H) final hidden


def encoder_forward(emb_seq, enc_params):
    """emb_seq: (T, H) embedded input sequence. Returns enc_out (T,H), h_f, h_b."""
    t_len, n_h = emb_seq.shape
    wih = jnp.stack([enc_params["fwd"][0], enc_params["bwd"][0]])   # (2, H, 3H)
    whh = jnp.stack([enc_params["fwd"][1], enc_params["bwd"][1]])   # (2, H, 3H)
    bih = jnp.stack([enc_params["fwd"][2], enc_params["bwd"][2]])   # (2, 1, 3H)
    bhh = jnp.stack([enc_params["fwd"][3], enc_params["bwd"][3]])   # (2, 1, 3H)
    emb_dirs = jnp.stack([emb_seq, emb_seq[::-1]])                  # (2, T, H)

    dir_out, h_last = pl.pallas_call(
        _encoder_dir_kernel,
        grid=(2,),
        in_specs=[
            pl.BlockSpec((None, t_len, n_h), lambda d: (d, 0, 0)),
            pl.BlockSpec((None, n_h, 3 * n_h), lambda d: (d, 0, 0)),
            pl.BlockSpec((None, n_h, 3 * n_h), lambda d: (d, 0, 0)),
            pl.BlockSpec((None, 1, 3 * n_h), lambda d: (d, 0, 0)),
            pl.BlockSpec((None, 1, 3 * n_h), lambda d: (d, 0, 0)),
        ],
        out_specs=(
            pl.BlockSpec((None, t_len, n_h), lambda d: (d, 0, 0)),
            pl.BlockSpec((None, 1, n_h), lambda d: (d, 0, 0)),
        ),
        out_shape=(
            jax.ShapeDtypeStruct((2, t_len, n_h), jnp.float32),
            jax.ShapeDtypeStruct((2, 1, n_h), jnp.float32),
        ),
        compiler_params=pltpu.CompilerParams(
            dimension_semantics=("parallel",)),   # 2 TCs on v7x; harmless on v5e/v6e
    )(emb_dirs, wih, whh, bih, bhh)

    # sum forward and (re-reversed) backward direction outputs, as in nn.GRU +
    # the tutorial's outputs[..., :H] + outputs[..., H:]
    encoder_outputs = dir_out[0] + dir_out[1][::-1]   # (T, H)
    h_f = h_last[0]                                   # forward-dir final hidden (1, H)
    h_b = h_last[1]                                   # backward-dir final hidden (1, H)
    return encoder_outputs, h_f, h_b


# ---------------------------------------------------------------------------
# Pallas kernel 2: the full greedy decode loop (LuongAttnDecoderRNN, n_layers=1)
# All MAX_LEN steps fused: GRU cell, dot attention over encoder time axis,
# split concat projection, vocab softmax, greedy max/first-argmax, and the
# next-token embedding gather via a one-hot matmul. Everything stays in VMEM /
# vregs; only (1, MAX_LEN) tokens & scores rows are written at the end.
# ---------------------------------------------------------------------------
def _make_decoder_kernel(max_length, sos_token):
    def kernel(emb_tab_ref, enc_ref, h0_ref,
               wih_ref, whh_ref, bih_ref, bhh_ref,
               wcr_ref, wcc_ref, bc_ref, wo_ref, bo_ref,
               tok_ref, score_ref):
        emb_tab = emb_tab_ref[...]                 # (V, H)
        enc = enc_ref[...]                         # (T, H)
        wih = wih_ref[...]
        whh = whh_ref[...]
        bih = bih_ref[...]
        bhh = bhh_ref[...]
        wcr = wcr_ref[...]
        wcc = wcc_ref[...]
        bc = bc_ref[...]
        wo = wo_ref[...]
        bo = bo_ref[...]
        n_h = whh.shape[0]
        vocab = emb_tab.shape[0]

        h = h0_ref[...]                                         # (1, H)
        x = emb_tab[sos_token:sos_token + 1, :]                 # SOS embedding (1, H)
        # TODO(synk): embedding_dropout / GRU dropout omitted (inference greedy search).

        lane_f = jax.lax.broadcasted_iota(
            jnp.int32, (1, vocab), 1).astype(jnp.float32)       # (1, V) lane ids
        step_lane = jax.lax.broadcasted_iota(
            jnp.int32, (1, max_length), 1)                      # (1, MAX_LEN)
        toks = jnp.zeros((1, max_length), jnp.int32)
        scores = jnp.zeros((1, max_length), jnp.float32)

        for step in range(max_length):                          # static unroll
            # --- GRU cell (PyTorch gate order r, z, n; r on hidden branch) ---
            gi = jnp.dot(x, wih, preferred_element_type=jnp.float32) + bih
            gh = jnp.dot(h, whh, preferred_element_type=jnp.float32) + bhh
            r = jax.nn.sigmoid(gi[:, :n_h] + gh[:, :n_h])
            z = jax.nn.sigmoid(gi[:, n_h:2 * n_h] + gh[:, n_h:2 * n_h])
            n = jnp.tanh(gi[:, 2 * n_h:] + r * gh[:, 2 * n_h:])
            h = (1.0 - z) * n + z * h                           # (1, H)

            # --- Luong "dot" attention over encoder timesteps ---
            energies = jax.lax.dot_general(
                h, enc, (((1,), (1,)), ((), ())),
                preferred_element_type=jnp.float32)             # (1, T)
            energies = energies - jnp.max(energies, axis=-1, keepdims=True)
            e = jnp.exp(energies)
            attn = e * pl.reciprocal(jnp.sum(e, axis=-1, keepdims=True),
                                     approx=True)
            context = jnp.dot(attn, enc,
                              preferred_element_type=jnp.float32)  # (1, H)

            # --- concat projection split into two (H,H) matmuls ---
            concat_out = jnp.tanh(
                jnp.dot(h, wcr, preferred_element_type=jnp.float32)
                + jnp.dot(context, wcc, preferred_element_type=jnp.float32)
                + bc)

            # --- vocab projection + softmax ---
            logits = jnp.dot(concat_out, wo,
                             preferred_element_type=jnp.float32) + bo
            logits = logits - jnp.max(logits, axis=-1, keepdims=True)
            el = jnp.exp(logits)
            probs = el * pl.reciprocal(jnp.sum(el, axis=-1, keepdims=True),
                                       approx=True)             # (1, V)

            # --- greedy: max prob + first max index (torch.max semantics) ---
            m = jnp.max(probs, axis=-1, keepdims=True)          # (1, 1)
            tok_f = jnp.min(jnp.where(probs == m, lane_f, float(vocab)),
                            axis=-1, keepdims=True)             # (1, 1) float index
            sel = step_lane == step
            toks = jnp.where(sel, tok_f.astype(jnp.int32), toks)
            scores = jnp.where(sel, m, scores)

            # --- feed back: embedding gather via one-hot matmul (no dyn index) ---
            onehot = (lane_f == tok_f).astype(jnp.float32)      # (1, V)
            x = jnp.dot(onehot, emb_tab,
                        preferred_element_type=jnp.float32)     # (1, H)

        tok_ref[...] = toks
        score_ref[...] = scores

    return kernel


def decode_greedy(embedding, enc_out, h0, wih, whh, bih, bhh,
                  wc_rnn, wc_ctx, bc, wo, bo, *, max_length):
    kernel = _make_decoder_kernel(max_length, SOS_token)
    toks, scores = pl.pallas_call(
        kernel,
        out_shape=(jax.ShapeDtypeStruct((1, max_length), jnp.int32),
                   jax.ShapeDtypeStruct((1, max_length), jnp.float32)),
    )(embedding, enc_out, h0, wih, whh, bih, bhh, wc_rnn, wc_ctx, bc, wo, bo)
    return toks[0], scores[0]


# ---------------------------------------------------------------------------
# Deterministic parameter init (synthetic weights; shapes mirror the module;
# all weight matrices pre-transposed to (in_features, out_features)).
# ---------------------------------------------------------------------------
def _init_params(key):
    def nrm(k, shape, scale=0.1):
        return (scale * jax.random.normal(k, shape)).astype(jnp.float32)

    keys = jax.random.split(key, 16)
    params = {
        # shared embedding (tutorial shares one nn.Embedding between enc/dec)
        "embedding": nrm(keys[0], (V, H)),
        "enc": {
            # bidirectional single-layer GRU: separate fwd / bwd weight sets
            "fwd": (nrm(keys[1], (H, 3 * H)), nrm(keys[2], (H, 3 * H)),
                    nrm(keys[3], (1, 3 * H)), nrm(keys[4], (1, 3 * H))),
            "bwd": (nrm(keys[5], (H, 3 * H)), nrm(keys[6], (H, 3 * H)),
                    nrm(keys[7], (1, 3 * H)), nrm(keys[8], (1, 3 * H))),
        },
        "dec": {
            "gru": (nrm(keys[9], (H, 3 * H)), nrm(keys[10], (H, 3 * H)),
                    nrm(keys[11], (1, 3 * H)), nrm(keys[12], (1, 3 * H))),
            "proj": (nrm(keys[13], (2 * H, H)), jnp.zeros((1, H), jnp.float32),
                     nrm(keys[14], (H, V)), jnp.zeros((1, V), jnp.float32)),
        },
    }
    return params


# ---------------------------------------------------------------------------
# GreedySearchDecoder.forward — fully jitted: 2 kernel launches per call.
# ---------------------------------------------------------------------------
@partial(jax.jit, static_argnums=(2,))
def greedy_search_decoder(input_seq, input_length, max_length, params):
    # input_length only drives pack_padded_sequence in the reference; identity
    # for a single full-length batch-1 sequence, so it is intentionally unused.
    del input_length
    emb_seq = jnp.take(params["embedding"], input_seq[:, 0], axis=0)   # (T, H)

    encoder_outputs, h_f, h_b = encoder_forward(emb_seq, params["enc"])
    decoder_hidden = h_f          # encoder_hidden[:decoder.n_layers] (fwd dir, n_layers=1)

    wih, whh, bih, bhh = params["dec"]["gru"]
    w_concat_t, b_concat, w_out_t, b_out = params["dec"]["proj"]
    wc_rnn = w_concat_t[:H, :]    # split concat weight: rnn-output half
    wc_ctx = w_concat_t[H:, :]    # split concat weight: context half

    tokens, scores = decode_greedy(
        params["embedding"], encoder_outputs, decoder_hidden,
        wih, whh, bih, bhh, wc_rnn, wc_ctx, b_concat, w_out_t, b_out,
        max_length=max_length)
    return tokens, scores


if __name__ == "__main__":
    key = jax.random.PRNGKey(0)
    pkey, dkey = jax.random.split(key)
    params = _init_params(pkey)

    # deterministic example input: (T, 1) int token ids, length scalar
    input_seq = jax.random.randint(dkey, (T, 1), 2, V, dtype=jnp.int32)
    input_length = jnp.array([T], jnp.int32)

    tokens, scores = greedy_search_decoder(input_seq, input_length, MAX_LEN, params)
    jax.block_until_ready((tokens, scores))

    assert tokens.shape == (MAX_LEN,) and scores.shape == (MAX_LEN,)
    assert tokens.dtype == jnp.int32 and scores.dtype == jnp.float32
    print("KERNEL_OK")
</pallas_src>

<mosaic_0001>
module attributes {stable_mosaic.version = 11 : i64} {
  func.func @_encoder_dir_kernel(%arg0: i32, %arg1: memref<1x8x32xf32, #tpu.memory_space<vmem>>, %arg2: memref<1x32x96xf32, #tpu.memory_space<vmem>>, %arg3: memref<1x32x96xf32, #tpu.memory_space<vmem>>, %arg4: memref<1x1x96xf32, #tpu.memory_space<vmem>>, %arg5: memref<1x1x96xf32, #tpu.memory_space<vmem>>, %arg6: memref<1x8x32xf32, #tpu.memory_space<vmem>>, %arg7: memref<1x1x32xf32, #tpu.memory_space<vmem>>) attributes {dimension_semantics = [#tpu.dimension_semantics<parallel>], iteration_bounds = array<i64: 2>, scalar_prefetch = 0 : i64, scratch_operands = 0 : i64, tpu.core_type = #tpu.core_type<tc>, window_params = [{transform_indices = @transform_0, window_bounds = array<i64: 1, 8, 32>}, {transform_indices = @transform_1, window_bounds = array<i64: 1, 32, 96>}, {transform_indices = @transform_2, window_bounds = array<i64: 1, 32, 96>}, {transform_indices = @transform_3, window_bounds = array<i64: 1, 1, 96>}, {transform_indices = @transform_4, window_bounds = array<i64: 1, 1, 96>}, {transform_indices = @transform_5, window_bounds = array<i64: 1, 8, 32>}, {transform_indices = @transform_6, window_bounds = array<i64: 1, 1, 32>}]} {
    %c0 = arith.constant 0 : index
    %c0_0 = arith.constant 0 : index
    %c0_1 = arith.constant 0 : index
    %0 = vector.load %arg1[%c0, %c0_0, %c0_1] : memref<1x8x32xf32, #tpu.memory_space<vmem>>, vector<1x8x32xf32>
    %1 = vector.shape_cast %0 : vector<1x8x32xf32> to vector<8x32xf32>
    %c0_2 = arith.constant 0 : index
    %c0_3 = arith.constant 0 : index
    %c0_4 = arith.constant 0 : index
    %2 = vector.load %arg2[%c0_2, %c0_3, %c0_4] : memref<1x32x96xf32, #tpu.memory_space<vmem>>, vector<1x32x96xf32>
    %3 = vector.shape_cast %2 : vector<1x32x96xf32> to vector<32x96xf32>
    %cst = arith.constant dense<0.000000e+00> : vector<8x96xf32>
    %4 = tpu.matmul %1, %3, %cst {dimension_numbers = #tpu.dot_dimension_numbers<[1], [0], [0], [1], [0, 0, 1, 1], [], []>} : vector<8x32xf32>, vector<32x96xf32>, vector<8x96xf32> -> vector<8x96xf32>
    %c0_5 = arith.constant 0 : index
    %c0_6 = arith.constant 0 : index
    %c0_7 = arith.constant 0 : index
    %5 = vector.load %arg4[%c0_5, %c0_6, %c0_7] : memref<1x1x96xf32, #tpu.memory_space<vmem>>, vector<1x1x96xf32>
    %6 = vector.shape_cast %5 : vector<1x1x96xf32> to vector<1x96xf32>
    %7 = vector.broadcast %6 : vector<1x96xf32> to vector<8x96xf32>
    %8 = arith.addf %4, %7 : vector<8x96xf32>
    %c0_8 = arith.constant 0 : index
    %c0_9 = arith.constant 0 : index
    %c0_10 = arith.constant 0 : index
    %9 = vector.load %arg3[%c0_8, %c0_9, %c0_10] : memref<1x32x96xf32, #tpu.memory_space<vmem>>, vector<1x32x96xf32>
    %10 = vector.shape_cast %9 : vector<1x32x96xf32> to vector<32x96xf32>
    %c0_11 = arith.constant 0 : index
    %c0_12 = arith.constant 0 : index
    %c0_13 = arith.constant 0 : index
    %11 = vector.load %arg5[%c0_11, %c0_12, %c0_13] : memref<1x1x96xf32, #tpu.memory_space<vmem>>, vector<1x1x96xf32>
    %12 = vector.shape_cast %11 : vector<1x1x96xf32> to vector<1x96xf32>
    %cst_14 = arith.constant 0.000000e+00 : f32
    %13 = vector.broadcast %cst_14 : f32 to vector<1x32xf32>
    %cst_15 = arith.constant dense<0.000000e+00> : vector<1x96xf32>
    %14 = tpu.matmul %13, %10, %cst_15 {dimension_numbers = #tpu.dot_dimension_numbers<[1], [0], [0], [1], [0, 0, 1, 1], [], []>} : vector<1x32xf32>, vector<32x96xf32>, vector<1x96xf32> -> vector<1x96xf32>
    %15 = arith.addf %14, %12 : vector<1x96xf32>
    %16 = vector.extract_strided_slice %8 {offsets = [0, 0], sizes = [1, 96], strides = [1, 1]} : vector<8x96xf32> to vector<1x96xf32>
    %17 = vector.extract_strided_slice %16 {offsets = [0, 0], sizes = [1, 32], strides = [1, 1]} : vector<1x96xf32> to vector<1x32xf32>
    %18 = vector.extract_strided_slice %15 {offsets = [0, 0], sizes = [1, 32], strides = [1, 1]} : vector<1x96xf32> to vector<1x32xf32>
    %19 = arith.addf %17, %18 : vector<1x32xf32>
    %20 = arith.negf %19 : vector<1x32xf32>
    %21 = math.exp %20 : vector<1x32xf32>
    %cst_16 = arith.constant 1.000000e+00 : f32
    %22 = vector.broadcast %cst_16 : f32 to vector<1x32xf32>
    %23 = arith.addf %22, %21 : vector<1x32xf32>
    %24 = arith.divf %22, %23 : vector<1x32xf32>
    %25 = vector.extract_strided_slice %16 {offsets = [0, 32], sizes = [1, 32], strides = [1, 1]} : vector<1x96xf32> to vector<1x32xf32>
    %26 = vector.extract_strided_slice %15 {offsets = [0, 32], sizes = [1, 32], strides = [1, 1]} : vector<1x96xf32> to vector<1x32xf32>
    %27 = arith.addf %25, %26 : vector<1x32xf32>
    %28 = arith.negf %27 : vector<1x32xf32>
    %29 = math.exp %28 : vector<1x32xf32>
    %cst_17 = arith.constant 1.000000e+00 : f32
    %30 = vector.broadcast %cst_17 : f32 to vector<1x32xf32>
    %31 = arith.addf %30, %29 : vector<1x32xf32>
    %32 = arith.divf %30, %31 : vector<1x32xf32>
    %33 = vector.extract_strided_slice %16 {offsets = [0, 64], sizes = [1, 32], strides = [1, 1]} : vector<1x96xf32> to vector<1x32xf32>
    %34 = vector.extract_strided_slice %15 {offsets = [0, 64], sizes = [1, 32], strides = [1, 1]} : vector<1x96xf32> to vector<1x32xf32>
    %35 = arith.mulf %24, %34 : vector<1x32xf32>
    %36 = arith.addf %33, %35 : vector<1x32xf32>
    %37 = math.tanh %36 : vector<1x32xf32>
    %cst_18 = arith.constant 1.000000e+00 : f32
    %38 = vector.broadcast %cst_18 : f32 to vector<1x32xf32>
    %39 = arith.subf %38, %32 : vector<1x32xf32>
    %40 = arith.mulf %39, %37 : vector<1x32xf32>
    %41 = arith.mulf %32, %13 : vector<1x32xf32>
    %42 = arith.addf %40, %41 : vector<1x32xf32>
    %cst_19 = arith.constant dense<0.000000e+00> : vector<1x96xf32>
    %43 = tpu.matmul %42, %10, %cst_19 {dimension_numbers = #tpu.dot_dimension_numbers<[1], [0], [0], [1], [0, 0, 1, 1], [], []>} : vector<1x32xf32>, vector<32x96xf32>, vector<1x96xf32> -> vector<1x96xf32>
    %44 = arith.addf %43, %12 : vector<1x96xf32>
    %45 = vector.extract_strided_slice %8 {offsets = [1, 0], sizes = [1, 96], strides = [1, 1]} : vector<8x96xf32> to vector<1x96xf32>
    %46 = vector.extract_strided_slice %45 {offsets = [0, 0], sizes = [1, 32], strides = [1, 1]} : vector<1x96xf32> to vector<1x32xf32>
    %47 = vector.extract_strided_slice %44 {offsets = [0, 0], sizes = [1, 32], strides = [1, 1]} : vector<1x96xf32> to vector<1x32xf32>
    %48 = arith.addf %46, %47 : vector<1x32xf32>
    %49 = arith.negf %48 : vector<1x32xf32>
    %50 = math.exp %49 : vector<1x32xf32>
    %cst_20 = arith.constant 1.000000e+00 : f32
    %51 = vector.broadcast %cst_20 : f32 to vector<1x32xf32>
    %52 = arith.addf %51, %50 : vector<1x32xf32>
    %53 = arith.divf %51, %52 : vector<1x32xf32>
    %54 = vector.extract_strided_slice %45 {offsets = [0, 32], sizes = [1, 32], strides = [1, 1]} : vector<1x96xf32> to vector<1x32xf32>
    %55 = vector.extract_strided_slice %44 {offsets = [0, 32], sizes = [1, 32], strides = [1, 1]} : vector<1x96xf32> to vector<1x32xf32>
    %56 = arith.addf %54, %55 : vector<1x32xf32>
    %57 = arith.negf %56 : vector<1x32xf32>
    %58 = math.exp %57 : vector<1x32xf32>
    %cst_21 = arith.constant 1.000000e+00 : f32
    %59 = vector.broadcast %cst_21 : f32 to vector<1x32xf32>
    %60 = arith.addf %59, %58 : vector<1x32xf32>
    %61 = arith.divf %59, %60 : vector<1x32xf32>
    %62 = vector.extract_strided_slice %45 {offsets = [0, 64], sizes = [1, 32], strides = [1, 1]} : vector<1x96xf32> to vector<1x32xf32>
    %63 = vector.extract_strided_slice %44 {offsets = [0, 64], sizes = [1, 32], strides = [1, 1]} : vector<1x96xf32> to vector<1x32xf32>
    %64 = arith.mulf %53, %63 : vector<1x32xf32>
    %65 = arith.addf %62, %64 : vector<1x32xf32>
    %66 = math.tanh %65 : vector<1x32xf32>
    %cst_22 = arith.constant 1.000000e+00 : f32
    %67 = vector.broadcast %cst_22 : f32 to vector<1x32xf32>
    %68 = arith.subf %67, %61 : vector<1x32xf32>
    %69 = arith.mulf %68, %66 : vector<1x32xf32>
    %70 = arith.mulf %61, %42 : vector<1x32xf32>
    %71 = arith.addf %69, %70 : vector<1x32xf32>
    %cst_23 = arith.constant dense<0.000000e+00> : vector<1x96xf32>
    %72 = tpu.matmul %71, %10, %cst_23 {dimension_numbers = #tpu.dot_dimension_numbers<[1], [0], [0], [1], [0, 0, 1, 1], [], []>} : vector<1x32xf32>, vector<32x96xf32>, vector<1x96xf32> -> vector<1x96xf32>
    %73 = arith.addf %72, %12 : vector<1x96xf32>
    %74 = vector.extract_strided_slice %8 {offsets = [2, 0], sizes = [1, 96], strides = [1, 1]} : vector<8x96xf32> to vector<1x96xf32>
    %75 = vector.extract_strided_slice %74 {offsets = [0, 0], sizes = [1, 32], strides = [1, 1]} : vector<1x96xf32> to vector<1x32xf32>
    %76 = vector.extract_strided_slice %73 {offsets = [0, 0], sizes = [1, 32], strides = [1, 1]} : vector<1x96xf32> to vector<1x32xf32>
    %77 = arith.addf %75, %76 : vector<1x32xf32>
    %78 = arith.negf %77 : vector<1x32xf32>
    %79 = math.exp %78 : vector<1x32xf32>
    %cst_24 = arith.constant 1.000000e+00 : f32
    %80 = vector.broadcast %cst_24 : f32 to vector<1x32xf32>
    %81 = arith.addf %80, %79 : vector<1x32xf32>
    %82 = arith.divf %80, %81 : vector<1x32xf32>
    %83 = vector.extract_strided_slice %74 {offsets = [0, 32], sizes = [1, 32], strides = [1, 1]} : vector<1x96xf32> to vector<1x32xf32>
    %84 = vector.extract_strided_slice %73 {offsets = [0, 32], sizes = [1, 32], strides = [1, 1]} : vector<1x96xf32> to vector<1x32xf32>
    %85 = arith.addf %83, %84 : vector<1x32xf32>
    %86 = arith.negf %85 : vector<1x32xf32>
    %87 = math.exp %86 : vector<1x32xf32>
    %cst_25 = arith.constant 1.000000e+00 : f32
    %88 = vector.broadcast %cst_25 : f32 to vector<1x32xf32>
    %89 = arith.addf %88, %87 : vector<1x32xf32>
    %90 = arith.divf %88, %89 : vector<1x32xf32>
    %91 = vector.extract_strided_slice %74 {offsets = [0, 64], sizes = [1, 32], strides = [1, 1]} : vector<1x96xf32> to vector<1x32xf32>
    %92 = vector.extract_strided_slice %73 {offsets = [0, 64], sizes = [1, 32], strides = [1, 1]} : vector<1x96xf32> to vector<1x32xf32>
    %93 = arith.mulf %82, %92 : vector<1x32xf32>
    %94 = arith.addf %91, %93 : vector<1x32xf32>
    %95 = math.tanh %94 : vector<1x32xf32>
    %cst_26 = arith.constant 1.000000e+00 : f32
    %96 = vector.broadcast %cst_26 : f32 to vector<1x32xf32>
    %97 = arith.subf %96, %90 : vector<1x32xf32>
    %98 = arith.mulf %97, %95 : vector<1x32xf32>
    %99 = arith.mulf %90, %71 : vector<1x32xf32>
    %100 = arith.addf %98, %99 : vector<1x32xf32>
    %cst_27 = arith.constant dense<0.000000e+00> : vector<1x96xf32>
    %101 = tpu.matmul %100, %10, %cst_27 {dimension_numbers = #tpu.dot_dimension_numbers<[1], [0], [0], [1], [0, 0, 1, 1], [], []>} : vector<1x32xf32>, vector<32x96xf32>, vector<1x96xf32> -> vector<1x96xf32>
    %102 = arith.addf %101, %12 : vector<1x96xf32>
    %103 = vector.extract_strided_slice %8 {offsets = [3, 0], sizes = [1, 96], strides = [1, 1]} : vector<8x96xf32> to vector<1x96xf32>
    %104 = vector.extract_strided_slice %103 {offsets = [0, 0], sizes = [1, 32], strides = [1, 1]} : vector<1x96xf32> to vector<1x32xf32>
    %105 = vector.extract_strided_slice %102 {offsets = [0, 0], sizes = [1, 32], strides = [1, 1]} : vector<1x96xf32> to vector<1x32xf32>
    %106 = arith.addf %104, %105 : vector<1x32xf32>
    %107 = arith.negf %106 : vector<1x32xf32>
    %108 = math.exp %107 : vector<1x32xf32>
    %cst_28 = arith.constant 1.000000e+00 : f32
    %109 = vector.broadcast %cst_28 : f32 to vector<1x32xf32>
    %110 = arith.addf %109, %108 : vector<1x32xf32>
    %111 = arith.divf %109, %110 : vector<1x32xf32>
    %112 = vector.extract_strided_slice %103 {offsets = [0, 32], sizes = [1, 32], strides = [1, 1]} : vector<1x96xf32> to vector<1x32xf32>
    %113 = vector.extract_strided_slice %102 {offsets = [0, 32], sizes = [1, 32], strides = [1, 1]} : vector<1x96xf32> to vector<1x32xf32>
    %114 = arith.addf %112, %113 : vector<1x32xf32>
    %115 = arith.negf %114 : vector<1x32xf32>
    %116 = math.exp %115 : vector<1x32xf32>
    %cst_29 = arith.constant 1.000000e+00 : f32
    %117 = vector.broadcast %cst_29 : f32 to vector<1x32xf32>
    %118 = arith.addf %117, %116 : vector<1x32xf32>
    %119 = arith.divf %117, %118 : vector<1x32xf32>
    %120 = vector.extract_strided_slice %103 {offsets = [0, 64], sizes = [1, 32], strides = [1, 1]} : vector<1x96xf32> to vector<1x32xf32>
    %121 = vector.extract_strided_slice %102 {offsets = [0, 64], sizes = [1, 32], strides = [1, 1]} : vector<1x96xf32> to vector<1x32xf32>
    %122 = arith.mulf %111, %121 : vector<1x32xf32>
    %123 = arith.addf %120, %122 : vector<1x32xf32>
    %124 = math.tanh %123 : vector<1x32xf32>
    %cst_30 = arith.constant 1.000000e+00 : f32
    %125 = vector.broadcast %cst_30 : f32 to vector<1x32xf32>
    %126 = arith.subf %125, %119 : vector<1x32xf32>
    %127 = arith.mulf %126, %124 : vector<1x32xf32>
    %128 = arith.mulf %119, %100 : vector<1x32xf32>
    %129 = arith.addf %127, %128 : vector<1x32xf32>
    %cst_31 = arith.constant dense<0.000000e+00> : vector<1x96xf32>
    %130 = tpu.matmul %129, %10, %cst_31 {dimension_numbers = #tpu.dot_dimension_numbers<[1], [0], [0], [1], [0, 0, 1, 1], [], []>} : vector<1x32xf32>, vector<32x96xf32>, vector<1x96xf32> -> vector<1x96xf32>
    %131 = arith.addf %130, %12 : vector<1x96xf32>
    %132 = vector.extract_strided_slice %8 {offsets = [4, 0], sizes = [1, 96], strides = [1, 1]} : vector<8x96xf32> to vector<1x96xf32>
    %133 = vector.extract_strided_slice %132 {offsets = [0, 0], sizes = [1, 32], strides = [1, 1]} : vector<1x96xf32> to vector<1x32xf32>
    %134 = vector.extract_strided_slice %131 {offsets = [0, 0], sizes = [1, 32], strides = [1, 1]} : vector<1x96xf32> to vector<1x32xf32>
    %135 = arith.addf %133, %134 : vector<1x32xf32>
    %136 = arith.negf %135 : vector<1x32xf32>
    %137 = math.exp %136 : vector<1x32xf32>
    %cst_32 = arith.constant 1.000000e+00 : f32
    %138 = vector.broadcast %cst_32 : f32 to vector<1x32xf32>
    %139 = arith.addf %138, %137 : vector<1x32xf32>
    %140 = arith.divf %138, %139 : vector<1x32xf32>
    %141 = vector.extract_strided_slice %132 {offsets = [0, 32], sizes = [1, 32], strides = [1, 1]} : vector<1x96xf32> to vector<1x32xf32>
    %142 = vector.extract_strided_slice %131 {offsets = [0, 32], sizes = [1, 32], strides = [1, 1]} : vector<1x96xf32> to vector<1x32xf32>
    %143 = arith.addf %141, %142 : vector<1x32xf32>
    %144 = arith.negf %143 : vector<1x32xf32>
    %145 = math.exp %144 : vector<1x32xf32>
    %cst_33 = arith.constant 1.000000e+00 : f32
    %146 = vector.broadcast %cst_33 : f32 to vector<1x32xf32>
    %147 = arith.addf %146, %145 : vector<1x32xf32>
    %148 = arith.divf %146, %147 : vector<1x32xf32>
    %149 = vector.extract_strided_slice %132 {offsets = [0, 64], sizes = [1, 32], strides = [1, 1]} : vector<1x96xf32> to vector<1x32xf32>
    %150 = vector.extract_strided_slice %131 {offsets = [0, 64], sizes = [1, 32], strides = [1, 1]} : vector<1x96xf32> to vector<1x32xf32>
    %151 = arith.mulf %140, %150 : vector<1x32xf32>
    %152 = arith.addf %149, %151 : vector<1x32xf32>
    %153 = math.tanh %152 : vector<1x32xf32>
    %cst_34 = arith.constant 1.000000e+00 : f32
    %154 = vector.broadcast %cst_34 : f32 to vector<1x32xf32>
    %155 = arith.subf %154, %148 : vector<1x32xf32>
    %156 = arith.mulf %155, %153 : vector<1x32xf32>
    %157 = arith.mulf %148, %129 : vector<1x32xf32>
    %158 = arith.addf %156, %157 : vector<1x32xf32>
    %cst_35 = arith.constant dense<0.000000e+00> : vector<1x96xf32>
    %159 = tpu.matmul %158, %10, %cst_35 {dimension_numbers = #tpu.dot_dimension_numbers<[1], [0], [0], [1], [0, 0, 1, 1], [], []>} : vector<1x32xf32>, vector<32x96xf32>, vector<1x96xf32> -> vector<1x96xf32>
    %160 = arith.addf %159, %12 : vector<1x96xf32>
    %161 = vector.extract_strided_slice %8 {offsets = [5, 0], sizes = [1, 96], strides = [1, 1]} : vector<8x96xf32> to vector<1x96xf32>
    %162 = vector.extract_strided_slice %161 {offsets = [0, 0], sizes = [1, 32], strides = [1, 1]} : vector<1x96xf32> to vector<1x32xf32>
    %163 = vector.extract_strided_slice %160 {offsets = [0, 0], sizes = [1, 32], strides = [1, 1]} : vector<1x96xf32> to vector<1x32xf32>
    %164 = arith.addf %162, %163 : vector<1x32xf32>
    %165 = arith.negf %164 : vector<1x32xf32>
    %166 = math.exp %165 : vector<1x32xf32>
    %cst_36 = arith.constant 1.000000e+00 : f32
    %167 = vector.broadcast %cst_36 : f32 to vector<1x32xf32>
    %168 = arith.addf %167, %166 : vector<1x32xf32>
    %169 = arith.divf %167, %168 : vector<1x32xf32>
    %170 = vector.extract_strided_slice %161 {offsets = [0, 32], sizes = [1, 32], strides = [1, 1]} : vector<1x96xf32> to vector<1x32xf32>
    %171 = vector.extract_strided_slice %160 {offsets = [0, 32], sizes = [1, 32], strides = [1, 1]} : vector<1x96xf32> to vector<1x32xf32>
    %172 = arith.addf %170, %171 : vector<1x32xf32>
    %173 = arith.negf %172 : vector<1x32xf32>
    %174 = math.exp %173 : vector<1x32xf32>
    %cst_37 = arith.constant 1.000000e+00 : f32
    %175 = vector.broadcast %cst_37 : f32 to vector<1x32xf32>
    %176 = arith.addf %175, %174 : vector<1x32xf32>
    %177 = arith.divf %175, %176 : vector<1x32xf32>
    %178 = vector.extract_strided_slice %161 {offsets = [0, 64], sizes = [1, 32], strides = [1, 1]} : vector<1x96xf32> to vector<1x32xf32>
    %179 = vector.extract_strided_slice %160 {offsets = [0, 64], sizes = [1, 32], strides = [1, 1]} : vector<1x96xf32> to vector<1x32xf32>
    %180 = arith.mulf %169, %179 : vector<1x32xf32>
    %181 = arith.addf %178, %180 : vector<1x32xf32>
    %182 = math.tanh %181 : vector<1x32xf32>
    %cst_38 = arith.constant 1.000000e+00 : f32
    %183 = vector.broadcast %cst_38 : f32 to vector<1x32xf32>
    %184 = arith.subf %183, %177 : vector<1x32xf32>
    %185 = arith.mulf %184, %182 : vector<1x32xf32>
    %186 = arith.mulf %177, %158 : vector<1x32xf32>
    %187 = arith.addf %185, %186 : vector<1x32xf32>
    %cst_39 = arith.constant dense<0.000000e+00> : vector<1x96xf32>
    %188 = tpu.matmul %187, %10, %cst_39 {dimension_numbers = #tpu.dot_dimension_numbers<[1], [0], [0], [1], [0, 0, 1, 1], [], []>} : vector<1x32xf32>, vector<32x96xf32>, vector<1x96xf32> -> vector<1x96xf32>
    %189 = arith.addf %188, %12 : vector<1x96xf32>
    %190 = vector.extract_strided_slice %8 {offsets = [6, 0], sizes = [1, 96], strides = [1, 1]} : vector<8x96xf32> to vector<1x96xf32>
    %191 = vector.extract_strided_slice %190 {offsets = [0, 0], sizes = [1, 32], strides = [1, 1]} : vector<1x96xf32> to vector<1x32xf32>
    %192 = vector.extract_strided_slice %189 {offsets = [0, 0], sizes = [1, 32], strides = [1, 1]} : vector<1x96xf32> to vector<1x32xf32>
    %193 = arith.addf %191, %192 : vector<1x32xf32>
    %194 = arith.negf %193 : vector<1x32xf32>
    %195 = math.exp %194 : vector<1x32xf32>
    %cst_40 = arith.constant 1.000000e+00 : f32
    %196 = vector.broadcast %cst_40 : f32 to vector<1x32xf32>
    %197 = arith.addf %196, %195 : vector<1x32xf32>
    %198 = arith.divf %196, %197 : vector<1x32xf32>
    %199 = vector.extract_strided_slice %190 {offsets = [0, 32], sizes = [1, 32], strides = [1, 1]} : vector<1x96xf32> to vector<1x32xf32>
    %200 = vector.extract_strided_slice %189 {offsets = [0, 32], sizes = [1, 32], strides = [1, 1]} : vector<1x96xf32> to vector<1x32xf32>
    %201 = arith.addf %199, %200 : vector<1x32xf32>
    %202 = arith.negf %201 : vector<1x32xf32>
    %203 = math.exp %202 : vector<1x32xf32>
    %cst_41 = arith.constant 1.000000e+00 : f32
    %204 = vector.broadcast %cst_41 : f32 to vector<1x32xf32>
    %205 = arith.addf %204, %203 : vector<1x32xf32>
    %206 = arith.divf %204, %205 : vector<1x32xf32>
    %207 = vector.extract_strided_slice %190 {offsets = [0, 64], sizes = [1, 32], strides = [1, 1]} : vector<1x96xf32> to vector<1x32xf32>
    %208 = vector.extract_strided_slice %189 {offsets = [0, 64], sizes = [1, 32], strides = [1, 1]} : vector<1x96xf32> to vector<1x32xf32>
    %209 = arith.mulf %198, %208 : vector<1x32xf32>
    %210 = arith.addf %207, %209 : vector<1x32xf32>
    %211 = math.tanh %210 : vector<1x32xf32>
    %cst_42 = arith.constant 1.000000e+00 : f32
    %212 = vector.broadcast %cst_42 : f32 to vector<1x32xf32>
    %213 = arith.subf %212, %206 : vector<1x32xf32>
    %214 = arith.mulf %213, %211 : vector<1x32xf32>
    %215 = arith.mulf %206, %187 : vector<1x32xf32>
    %216 = arith.addf %214, %215 : vector<1x32xf32>
    %cst_43 = arith.constant dense<0.000000e+00> : vector<1x96xf32>
    %217 = tpu.matmul %216, %10, %cst_43 {dimension_numbers = #tpu.dot_dimension_numbers<[1], [0], [0], [1], [0, 0, 1, 1], [], []>} : vector<1x32xf32>, vector<32x96xf32>, vector<1x96xf32> -> vector<1x96xf32>
    %218 = arith.addf %217, %12 : vector<1x96xf32>
    %219 = vector.extract_strided_slice %8 {offsets = [7, 0], sizes = [1, 96], strides = [1, 1]} : vector<8x96xf32> to vector<1x96xf32>
    %220 = vector.extract_strided_slice %219 {offsets = [0, 0], sizes = [1, 32], strides = [1, 1]} : vector<1x96xf32> to vector<1x32xf32>
    %221 = vector.extract_strided_slice %218 {offsets = [0, 0], sizes = [1, 32], strides = [1, 1]} : vector<1x96xf32> to vector<1x32xf32>
    %222 = arith.addf %220, %221 : vector<1x32xf32>
    %223 = arith.negf %222 : vector<1x32xf32>
    %224 = math.exp %223 : vector<1x32xf32>
    %cst_44 = arith.constant 1.000000e+00 : f32
    %225 = vector.broadcast %cst_44 : f32 to vector<1x32xf32>
    %226 = arith.addf %225, %224 : vector<1x32xf32>
    %227 = arith.divf %225, %226 : vector<1x32xf32>
    %228 = vector.extract_strided_slice %219 {offsets = [0, 32], sizes = [1, 32], strides = [1, 1]} : vector<1x96xf32> to vector<1x32xf32>
    %229 = vector.extract_strided_slice %218 {offsets = [0, 32], sizes = [1, 32], strides = [1, 1]} : vector<1x96xf32> to vector<1x32xf32>
    %230 = arith.addf %228, %229 : vector<1x32xf32>
    %231 = arith.negf %230 : vector<1x32xf32>
    %232 = math.exp %231 : vector<1x32xf32>
    %cst_45 = arith.constant 1.000000e+00 : f32
    %233 = vector.broadcast %cst_45 : f32 to vector<1x32xf32>
    %234 = arith.addf %233, %232 : vector<1x32xf32>
    %235 = arith.divf %233, %234 : vector<1x32xf32>
    %236 = vector.extract_strided_slice %219 {offsets = [0, 64], sizes = [1, 32], strides = [1, 1]} : vector<1x96xf32> to vector<1x32xf32>
    %237 = vector.extract_strided_slice %218 {offsets = [0, 64], sizes = [1, 32], strides = [1, 1]} : vector<1x96xf32> to vector<1x32xf32>
    %238 = arith.mulf %227, %237 : vector<1x32xf32>
    %239 = arith.addf %236, %238 : vector<1x32xf32>
    %240 = math.tanh %239 : vector<1x32xf32>
    %cst_46 = arith.constant 1.000000e+00 : f32
    %241 = vector.broadcast %cst_46 : f32 to vector<1x32xf32>
    %242 = arith.subf %241, %235 : vector<1x32xf32>
    %243 = arith.mulf %242, %240 : vector<1x32xf32>
    %244 = arith.mulf %235, %216 : vector<1x32xf32>
    %245 = arith.addf %243, %244 : vector<1x32xf32>
    %246 = tpu.concatenate %42, %71, %100, %129, %158, %187, %216, %245 in 0 : vector<1x32xf32>, vector<1x32xf32>, vector<1x32xf32>, vector<1x32xf32>, vector<1x32xf32>, vector<1x32xf32>, vector<1x32xf32>, vector<1x32xf32> -> vector<8x32xf32>
    %c0_47 = arith.constant 0 : index
    %c0_48 = arith.constant 0 : index
    %c0_49 = arith.constant 0 : index
    %247 = vector.load %arg6[%c0_47, %c0_48, %c0_49] : memref<1x8x32xf32, #tpu.memory_space<vmem>>, vector<1x8x32xf32>
    %248 = vector.shape_cast %247 : vector<1x8x32xf32> to vector<8x32xf32>
    %249 = vector.shape_cast %246 : vector<8x32xf32> to vector<1x8x32xf32>
    tpu.vector_store %arg6[%c0_47, %c0_48, %c0_49], %249 {strides = array<i32>} : memref<1x8x32xf32, #tpu.memory_space<vmem>>, vector<1x8x32xf32>,
    %c0_50 = arith.constant 0 : index
    %c0_51 = arith.constant 0 : index
    %c0_52 = arith.constant 0 : index
    %250 = vector.load %arg7[%c0_50, %c0_51, %c0_52] : memref<1x1x32xf32, #tpu.memory_space<vmem>>, vector<1x1x32xf32>
    %251 = vector.shape_cast %250 : vector<1x1x32xf32> to vector<1x32xf32>
    %252 = vector.shape_cast %245 : vector<1x32xf32> to vector<1x1x32xf32>
    tpu.vector_store %arg7[%c0_50, %c0_51, %c0_52], %252 {strides = array<i32>} : memref<1x1x32xf32, #tpu.memory_space<vmem>>, vector<1x1x32xf32>,
    return
  }
  func.func @transform_0(%arg0: i32) -> (i32, i32, i32) {
    %c0_i32 = arith.constant 0 : i32
    %c0_i32_0 = arith.constant 0 : i32
    %c0_i32_1 = arith.constant 0 : i32
    return %arg0, %c0_i32, %c0_i32_0 : i32, i32, i32
  }
  func.func @transform_1(%arg0: i32) -> (i32, i32, i32) {
    %c0_i32 = arith.constant 0 : i32
    %c0_i32_0 = arith.constant 0 : i32
    %c0_i32_1 = arith.constant 0 : i32
    return %arg0, %c0_i32, %c0_i32_0 : i32, i32, i32
  }
  func.func @transform_2(%arg0: i32) -> (i32, i32, i32) {
    %c0_i32 = arith.constant 0 : i32
    %c0_i32_0 = arith.constant 0 : i32
    %c0_i32_1 = arith.constant 0 : i32
    return %arg0, %c0_i32, %c0_i32_0 : i32, i32, i32
  }
  func.func @transform_3(%arg0: i32) -> (i32, i32, i32) {
    %c0_i32 = arith.constant 0 : i32
    %c0_i32_0 = arith.constant 0 : i32
    %c0_i32_1 = arith.constant 0 : i32
    return %arg0, %c0_i32, %c0_i32_0 : i32, i32, i32
  }
  func.func @transform_4(%arg0: i32) -> (i32, i32, i32) {
    %c0_i32 = arith.constant 0 : i32
    %c0_i32_0 = arith.constant 0 : i32
    %c0_i32_1 = arith.constant 0 : i32
    return %arg0, %c0_i32, %c0_i32_0 : i32, i32, i32
  }
  func.func @transform_5(%arg0: i32) -> (i32, i32, i32) {
    %c0_i32 = arith.constant 0 : i32
    %c0_i32_0 = arith.constant 0 : i32
    %c0_i32_1 = arith.constant 0 : i32
    return %arg0, %c0_i32, %c0_i32_0 : i32, i32, i32
  }
  func.func @transform_6(%arg0: i32) -> (i32, i32, i32) {
    %c0_i32 = arith.constant 0 : i32
    %c0_i32_0 = arith.constant 0 : i32
    %c0_i32_1 = arith.constant 0 : i32
    return %arg0, %c0_i32, %c0_i32_0 : i32, i32, i32
  }
}

module attributes {stable_mosaic.version = 11 : i64} {
  func.func @kernel(%arg0: memref<32x32xf32, #tpu.memory_space<vmem>>, %arg1: memref<8x32xf32, #tpu.memory_space<vmem>>, %arg2: memref<1x32xf32, #tpu.memory_space<vmem>>, %arg3: memref<32x96xf32, #tpu.memory_space<vmem>>, %arg4: memref<32x96xf32, #tpu.memory_space<vmem>>, %arg5: memref<1x96xf32, #tpu.memory_space<vmem>>, %arg6: memref<1x96xf32, #tpu.memory_space<vmem>>, %arg7: memref<32x32xf32, #tpu.memory_space<vmem>>, %arg8: memref<32x32xf32, #tpu.memory_space<vmem>>, %arg9: memref<1x32xf32, #tpu.memory_space<vmem>>, %arg10: memref<32x32xf32, #tpu.memory_space<vmem>>, %arg11: memref<1x32xf32, #tpu.memory_space<vmem>>, %arg12: memref<1x6xi32, #tpu.memory_space<vmem>>, %arg13: memref<1x6xf32, #tpu.memory_space<vmem>>) attributes {dimension_semantics = [], scalar_prefetch = 0 : i64, scratch_operands = 0 : i64, tpu.core_type = #tpu.core_type<tc>} {
    %c0 = arith.constant 0 : index
    %c0_0 = arith.constant 0 : index
    %0 = vector.load %arg0[%c0, %c0_0] : memref<32x32xf32, #tpu.memory_space<vmem>>, vector<32x32xf32>
    %c0_1 = arith.constant 0 : index
    %c0_2 = arith.constant 0 : index
    %1 = vector.load %arg1[%c0_1, %c0_2] : memref<8x32xf32, #tpu.memory_space<vmem>>, vector<8x32xf32>
    %c0_3 = arith.constant 0 : index
    %c0_4 = arith.constant 0 : index
    %2 = vector.load %arg3[%c0_3, %c0_4] : memref<32x96xf32, #tpu.memory_space<vmem>>, vector<32x96xf32>
    %c0_5 = arith.constant 0 : index
    %c0_6 = arith.constant 0 : index
    %3 = vector.load %arg4[%c0_5, %c0_6] : memref<32x96xf32, #tpu.memory_space<vmem>>, vector<32x96xf32>
    %c0_7 = arith.constant 0 : index
    %c0_8 = arith.constant 0 : index
    %4 = vector.load %arg5[%c0_7, %c0_8] : memref<1x96xf32, #tpu.memory_space<vmem>>, vector<1x96xf32>
    %c0_9 = arith.constant 0 : index
    %c0_10 = arith.constant 0 : index
    %5 = vector.load %arg6[%c0_9, %c0_10] : memref<1x96xf32, #tpu.memory_space<vmem>>, vector<1x96xf32>
    %c0_11 = arith.constant 0 : index
    %c0_12 = arith.constant 0 : index
    %6 = vector.load %arg7[%c0_11, %c0_12] : memref<32x32xf32, #tpu.memory_space<vmem>>, vector<32x32xf32>
    %c0_13 = arith.constant 0 : index
    %c0_14 = arith.constant 0 : index
    %7 = vector.load %arg8[%c0_13, %c0_14] : memref<32x32xf32, #tpu.memory_space<vmem>>, vector<32x32xf32>
    %c0_15 = arith.constant 0 : index
    %c0_16 = arith.constant 0 : index
    %8 = vector.load %arg9[%c0_15, %c0_16] : memref<1x32xf32, #tpu.memory_space<vmem>>, vector<1x32xf32>
    %c0_17 = arith.constant 0 : index
    %c0_18 = arith.constant 0 : index
    %9 = vector.load %arg10[%c0_17, %c0_18] : memref<32x32xf32, #tpu.memory_space<vmem>>, vector<32x32xf32>
    %c0_19 = arith.constant 0 : index
    %c0_20 = arith.constant 0 : index
    %10 = vector.load %arg11[%c0_19, %c0_20] : memref<1x32xf32, #tpu.memory_space<vmem>>, vector<1x32xf32>
    %c0_21 = arith.constant 0 : index
    %c0_22 = arith.constant 0 : index
    %11 = vector.load %arg2[%c0_21, %c0_22] : memref<1x32xf32, #tpu.memory_space<vmem>>, vector<1x32xf32>
    %12 = vector.extract_strided_slice %0 {offsets = [1, 0], sizes = [1, 32], strides = [1, 1]} : vector<32x32xf32> to vector<1x32xf32>
    %13 = tpu.iota {dimensions = array<i32: 1>} : vector<1x32xi32>
    %14 = arith.sitofp %13 : vector<1x32xi32> to vector<1x32xf32>
    %15 = tpu.iota {dimensions = array<i32: 1>} : vector<1x6xi32>
    %c0_i32 = arith.constant 0 : i32
    %16 = vector.broadcast %c0_i32 : i32 to vector<1x6xi32>
    %cst = arith.constant 0.000000e+00 : f32
    %17 = vector.broadcast %cst : f32 to vector<1x6xf32>
    %cst_23 = arith.constant dense<0.000000e+00> : vector<1x96xf32>
    %18 = tpu.matmul %12, %2, %cst_23 {dimension_numbers = #tpu.dot_dimension_numbers<[1], [0], [0], [1], [0, 0, 1, 1], [], []>} : vector<1x32xf32>, vector<32x96xf32>, vector<1x96xf32> -> vector<1x96xf32>
    %19 = arith.addf %18, %4 : vector<1x96xf32>
    %cst_24 = arith.constant dense<0.000000e+00> : vector<1x96xf32>
    %20 = tpu.matmul %11, %3, %cst_24 {dimension_numbers = #tpu.dot_dimension_numbers<[1], [0], [0], [1], [0, 0, 1, 1], [], []>} : vector<1x32xf32>, vector<32x96xf32>, vector<1x96xf32> -> vector<1x96xf32>
    %21 = arith.addf %20, %5 : vector<1x96xf32>
    %22 = vector.extract_strided_slice %19 {offsets = [0, 0], sizes = [1, 32], strides = [1, 1]} : vector<1x96xf32> to vector<1x32xf32>
    %23 = vector.extract_strided_slice %21 {offsets = [0, 0], sizes = [1, 32], strides = [1, 1]} : vector<1x96xf32> to vector<1x32xf32>
    %24 = arith.addf %22, %23 : vector<1x32xf32>
    %25 = arith.negf %24 : vector<1x32xf32>
    %26 = math.exp %25 : vector<1x32xf32>
    %cst_25 = arith.constant 1.000000e+00 : f32
    %27 = vector.broadcast %cst_25 : f32 to vector<1x32xf32>
    %28 = arith.addf %27, %26 : vector<1x32xf32>
    %29 = arith.divf %27, %28 : vector<1x32xf32>
    %30 = vector.extract_strided_slice %19 {offsets = [0, 32], sizes = [1, 32], strides = [1, 1]} : vector<1x96xf32> to vector<1x32xf32>
    %31 = vector.extract_strided_slice %21 {offsets = [0, 32], sizes = [1, 32], strides = [1, 1]} : vector<1x96xf32> to vector<1x32xf32>
    %32 = arith.addf %30, %31 : vector<1x32xf32>
    %33 = arith.negf %32 : vector<1x32xf32>
    %34 = math.exp %33 : vector<1x32xf32>
    %cst_26 = arith.constant 1.000000e+00 : f32
    %35 = vector.broadcast %cst_26 : f32 to vector<1x32xf32>
    %36 = arith.addf %35, %34 : vector<1x32xf32>
    %37 = arith.divf %35, %36 : vector<1x32xf32>
    %38 = vector.extract_strided_slice %19 {offsets = [0, 64], sizes = [1, 32], strides = [1, 1]} : vector<1x96xf32> to vector<1x32xf32>
    %39 = vector.extract_strided_slice %21 {offsets = [0, 64], sizes = [1, 32], strides = [1, 1]} : vector<1x96xf32> to vector<1x32xf32>
    %40 = arith.mulf %29, %39 : vector<1x32xf32>
    %41 = arith.addf %38, %40 : vector<1x32xf32>
    %42 = math.tanh %41 : vector<1x32xf32>
    %cst_27 = arith.constant 1.000000e+00 : f32
    %43 = vector.broadcast %cst_27 : f32 to vector<1x32xf32>
    %44 = arith.subf %43, %37 : vector<1x32xf32>
    %45 = arith.mulf %44, %42 : vector<1x32xf32>
    %46 = arith.mulf %37, %11 : vector<1x32xf32>
    %47 = arith.addf %45, %46 : vector<1x32xf32>
    %cst_28 = arith.constant dense<0.000000e+00> : vector<1x8xf32>
    %48 = tpu.matmul %47, %1, %cst_28 {dimension_numbers = #tpu.dot_dimension_numbers<[1], [1], [0], [0], [0, 0, 1, 0], [], []>} : vector<1x32xf32>, vector<8x32xf32>, vector<1x8xf32> -> vector<1x8xf32>
    %cst_29 = arith.constant dense<0xFF800000> : vector<1xf32>
    %49 = vector.multi_reduction <maximumf>, %48, %cst_29 [1] : vector<1x8xf32> to vector<1xf32>
    %50 = vector.shape_cast %49 : vector<1xf32> to vector<1x1xf32>
    %51 = vector.broadcast %50 : vector<1x1xf32> to vector<1x8xf32>
    %52 = arith.subf %48, %51 : vector<1x8xf32>
    %53 = math.exp %52 : vector<1x8xf32>
    %cst_30 = arith.constant dense<0.000000e+00> : vector<1xf32>
    %54 = vector.multi_reduction <add>, %53, %cst_30 [1] : vector<1x8xf32> to vector<1xf32>
    %55 = vector.shape_cast %54 : vector<1xf32> to vector<1x1xf32>
    %56 = tpu.reciprocal %55 {approx = true} : vector<1x1xf32> -> vector<1x1xf32>
    %57 = vector.broadcast %56 : vector<1x1xf32> to vector<1x8xf32>
    %58 = arith.mulf %53, %57 : vector<1x8xf32>
    %cst_31 = arith.constant dense<0.000000e+00> : vector<1x32xf32>
    %59 = tpu.matmul %58, %1, %cst_31 {dimension_numbers = #tpu.dot_dimension_numbers<[1], [0], [0], [1], [0, 0, 1, 1], [], []>} : vector<1x8xf32>, vector<8x32xf32>, vector<1x32xf32> -> vector<1x32xf32>
    %cst_32 = arith.constant dense<0.000000e+00> : vector<1x32xf32>
    %60 = tpu.matmul %47, %6, %cst_32 {dimension_numbers = #tpu.dot_dimension_numbers<[1], [0], [0], [1], [0, 0, 1, 1], [], []>} : vector<1x32xf32>, vector<32x32xf32>, vector<1x32xf32> -> vector<1x32xf32>
    %cst_33 = arith.constant dense<0.000000e+00> : vector<1x32xf32>
    %61 = tpu.matmul %59, %7, %cst_33 {dimension_numbers = #tpu.dot_dimension_numbers<[1], [0], [0], [1], [0, 0, 1, 1], [], []>} : vector<1x32xf32>, vector<32x32xf32>, vector<1x32xf32> -> vector<1x32xf32>
    %62 = arith.addf %60, %61 : vector<1x32xf32>
    %63 = arith.addf %62, %8 : vector<1x32xf32>
    %64 = math.tanh %63 : vector<1x32xf32>
    %cst_34 = arith.constant dense<0.000000e+00> : vector<1x32xf32>
    %65 = tpu.matmul %64, %9, %cst_34 {dimension_numbers = #tpu.dot_dimension_numbers<[1], [0], [0], [1], [0, 0, 1, 1], [], []>} : vector<1x32xf32>, vector<32x32xf32>, vector<1x32xf32> -> vector<1x32xf32>
    %66 = arith.addf %65, %10 : vector<1x32xf32>
    %cst_35 = arith.constant dense<0xFF800000> : vector<1xf32>
    %67 = vector.multi_reduction <maximumf>, %66, %cst_35 [1] : vector<1x32xf32> to vector<1xf32>
    %68 = vector.shape_cast %67 : vector<1xf32> to vector<1x1xf32>
    %69 = vector.broadcast %68 : vector<1x1xf32> to vector<1x32xf32>
    %70 = arith.subf %66, %69 : vector<1x32xf32>
    %71 = math.exp %70 : vector<1x32xf32>
    %cst_36 = arith.constant dense<0.000000e+00> : vector<1xf32>
    %72 = vector.multi_reduction <add>, %71, %cst_36 [1] : vector<1x32xf32> to vector<1xf32>
    %73 = vector.shape_cast %72 : vector<1xf32> to vector<1x1xf32>
    %74 = tpu.reciprocal %73 {approx = true} : vector<1x1xf32> -> vector<1x1xf32>
    %75 = vector.broadcast %74 : vector<1x1xf32> to vector<1x32xf32>
    %76 = arith.mulf %71, %75 : vector<1x32xf32>
    %cst_37 = arith.constant dense<0xFF800000> : vector<1xf32>
    %77 = vector.multi_reduction <maximumf>, %76, %cst_37 [1] : vector<1x32xf32> to vector<1xf32>
    %78 = vector.shape_cast %77 : vector<1xf32> to vector<1x1xf32>
    %79 = vector.broadcast %78 : vector<1x1xf32> to vector<1x32xf32>
    %80 = arith.cmpf oeq, %76, %79 : vector<1x32xf32>
    %cst_38 = arith.constant 3.200000e+01 : f32
    %81 = vector.broadcast %cst_38 : f32 to vector<1x32xf32>
    %82 = arith.select %80, %14, %81 : vector<1x32xi1>, vector<1x32xf32>
    %cst_39 = arith.constant dense<0x7F800000> : vector<1xf32>
    %83 = vector.multi_reduction <minimumf>, %82, %cst_39 [1] : vector<1x32xf32> to vector<1xf32>
    %84 = vector.shape_cast %83 : vector<1xf32> to vector<1x1xf32>
    %c0_i32_40 = arith.constant 0 : i32
    %85 = vector.broadcast %c0_i32_40 : i32 to vector<1x6xi32>
    %86 = arith.cmpi eq, %15, %85 : vector<1x6xi32>
    %87 = arith.fptosi %84 : vector<1x1xf32> to vector<1x1xi32>
    %88 = vector.shape_cast %87 : vector<1x1xi32> to vector<1x1xi32>
    %89 = vector.broadcast %88 : vector<1x1xi32> to vector<1x6xi32>
    %90 = arith.select %86, %89, %16 : vector<1x6xi1>, vector<1x6xi32>
    %91 = vector.shape_cast %78 : vector<1x1xf32> to vector<1x1xf32>
    %92 = vector.broadcast %91 : vector<1x1xf32> to vector<1x6xf32>
    %93 = arith.select %86, %92, %17 : vector<1x6xi1>, vector<1x6xf32>
    %94 = vector.broadcast %84 : vector<1x1xf32> to vector<1x32xf32>
    %95 = arith.cmpf oeq, %14, %94 : vector<1x32xf32>
    %96 = arith.extui %95 : vector<1x32xi1> to vector<1x32xi32>
    %97 = arith.sitofp %96 : vector<1x32xi32> to vector<1x32xf32>
    %cst_41 = arith.constant dense<0.000000e+00> : vector<1x32xf32>
    %98 = tpu.matmul %97, %0, %cst_41 {dimension_numbers = #tpu.dot_dimension_numbers<[1], [0], [0], [1], [0, 0, 1, 1], [], []>} : vector<1x32xf32>, vector<32x32xf32>, vector<1x32xf32> -> vector<1x32xf32>
    %cst_42 = arith.constant dense<0.000000e+00> : vector<1x96xf32>
    %99 = tpu.matmul %98, %2, %cst_42 {dimension_numbers = #tpu.dot_dimension_numbers<[1], [0], [0], [1], [0, 0, 1, 1], [], []>} : vector<1x32xf32>, vector<32x96xf32>, vector<1x96xf32> -> vector<1x96xf32>
    %100 = arith.addf %99, %4 : vector<1x96xf32>
    %cst_43 = arith.constant dense<0.000000e+00> : vector<1x96xf32>
    %101 = tpu.matmul %47, %3, %cst_43 {dimension_numbers = #tpu.dot_dimension_numbers<[1], [0], [0], [1], [0, 0, 1, 1], [], []>} : vector<1x32xf32>, vector<32x96xf32>, vector<1x96xf32> -> vector<1x96xf32>
    %102 = arith.addf %101, %5 : vector<1x96xf32>
    %103 = vector.extract_strided_slice %100 {offsets = [0, 0], sizes = [1, 32], strides = [1, 1]} : vector<1x96xf32> to vector<1x32xf32>
    %104 = vector.extract_strided_slice %102 {offsets = [0, 0], sizes = [1, 32], strides = [1, 1]} : vector<1x96xf32> to vector<1x32xf32>
    %105 = arith.addf %103, %104 : vector<1x32xf32>
    %106 = arith.negf %105 : vector<1x32xf32>
    %107 = math.exp %106 : vector<1x32xf32>
    %cst_44 = arith.constant 1.000000e+00 : f32
    %108 = vector.broadcast %cst_44 : f32 to vector<1x32xf32>
    %109 = arith.addf %108, %107 : vector<1x32xf32>
    %110 = arith.divf %108, %109 : vector<1x32xf32>
    %111 = vector.extract_strided_slice %100 {offsets = [0, 32], sizes = [1, 32], strides = [1, 1]} : vector<1x96xf32> to vector<1x32xf32>
    %112 = vector.extract_strided_slice %102 {offsets = [0, 32], sizes = [1, 32], strides = [1, 1]} : vector<1x96xf32> to vector<1x32xf32>
    %113 = arith.addf %111, %112 : vector<1x32xf32>
    %114 = arith.negf %113 : vector<1x32xf32>
    %115 = math.exp %114 : vector<1x32xf32>
    %cst_45 = arith.constant 1.000000e+00 : f32
    %116 = vector.broadcast %cst_45 : f32 to vector<1x32xf32>
    %117 = arith.addf %116, %115 : vector<1x32xf32>
    %118 = arith.divf %116, %117 : vector<1x32xf32>
    %119 = vector.extract_strided_slice %100 {offsets = [0, 64], sizes = [1, 32], strides = [1, 1]} : vector<1x96xf32> to vector<1x32xf32>
    %120 = vector.extract_strided_slice %102 {offsets = [0, 64], sizes = [1, 32], strides = [1, 1]} : vector<1x96xf32> to vector<1x32xf32>
    %121 = arith.mulf %110, %120 : vector<1x32xf32>
    %122 = arith.addf %119, %121 : vector<1x32xf32>
    %123 = math.tanh %122 : vector<1x32xf32>
    %cst_46 = arith.constant 1.000000e+00 : f32
    %124 = vector.broadcast %cst_46 : f32 to vector<1x32xf32>
    %125 = arith.subf %124, %118 : vector<1x32xf32>
    %126 = arith.mulf %125, %123 : vector<1x32xf32>
    %127 = arith.mulf %118, %47 : vector<1x32xf32>
    %128 = arith.addf %126, %127 : vector<1x32xf32>
    %cst_47 = arith.constant dense<0.000000e+00> : vector<1x8xf32>
    %129 = tpu.matmul %128, %1, %cst_47 {dimension_numbers = #tpu.dot_dimension_numbers<[1], [1], [0], [0], [0, 0, 1, 0], [], []>} : vector<1x32xf32>, vector<8x32xf32>, vector<1x8xf32> -> vector<1x8xf32>
    %cst_48 = arith.constant dense<0xFF800000> : vector<1xf32>
    %130 = vector.multi_reduction <maximumf>, %129, %cst_48 [1] : vector<1x8xf32> to vector<1xf32>
    %131 = vector.shape_cast %130 : vector<1xf32> to vector<1x1xf32>
    %132 = vector.broadcast %131 : vector<1x1xf32> to vector<1x8xf32>
    %133 = arith.subf %129, %132 : vector<1x8xf32>
    %134 = math.exp %133 : vector<1x8xf32>
    %cst_49 = arith.constant dense<0.000000e+00> : vector<1xf32>
    %135 = vector.multi_reduction <add>, %134, %cst_49 [1] : vector<1x8xf32> to vector<1xf32>
    %136 = vector.shape_cast %135 : vector<1xf32> to vector<1x1xf32>
    %137 = tpu.reciprocal %136 {approx = true} : vector<1x1xf32> -> vector<1x1xf32>
    %138 = vector.broadcast %137 : vector<1x1xf32> to vector<1x8xf32>
    %139 = arith.mulf %134, %138 : vector<1x8xf32>
    %cst_50 = arith.constant dense<0.000000e+00> : vector<1x32xf32>
    %140 = tpu.matmul %139, %1, %cst_50 {dimension_numbers = #tpu.dot_dimension_numbers<[1], [0], [0], [1], [0, 0, 1, 1], [], []>} : vector<1x8xf32>, vector<8x32xf32>, vector<1x32xf32> -> vector<1x32xf32>
    %cst_51 = arith.constant dense<0.000000e+00> : vector<1x32xf32>
    %141 = tpu.matmul %128, %6, %cst_51 {dimension_numbers = #tpu.dot_dimension_numbers<[1], [0], [0], [1], [0, 0, 1, 1], [], []>} : vector<1x32xf32>, vector<32x32xf32>, vector<1x32xf32> -> vector<1x32xf32>
    %cst_52 = arith.constant dense<0.000000e+00> : vector<1x32xf32>
    %142 = tpu.matmul %140, %7, %cst_52 {dimension_numbers = #tpu.dot_dimension_numbers<[1], [0], [0], [1], [0, 0, 1, 1], [], []>} : vector<1x32xf32>, vector<32x32xf32>, vector<1x32xf32> -> vector<1x32xf32>
    %143 = arith.addf %141, %142 : vector<1x32xf32>
    %144 = arith.addf %143, %8 : vector<1x32xf32>
    %145 = math.tanh %144 : vector<1x32xf32>
    %cst_53 = arith.constant dense<0.000000e+00> : vector<1x32xf32>
    %146 = tpu.matmul %145, %9, %cst_53 {dimension_numbers = #tpu.dot_dimension_numbers<[1], [0], [0], [1], [0, 0, 1, 1], [], []>} : vector<1x32xf32>, vector<32x32xf32>, vector<1x32xf32> -> vector<1x32xf32>
    %147 = arith.addf %146, %10 : vector<1x32xf32>
    %cst_54 = arith.constant dense<0xFF800000> : vector<1xf32>
    %148 = vector.multi_reduction <maximumf>, %147, %cst_54 [1] : vector<1x32xf32> to vector<1xf32>
    %149 = vector.shape_cast %148 : vector<1xf32> to vector<1x1xf32>
    %150 = vector.broadcast %149 : vector<1x1xf32> to vector<1x32xf32>
    %151 = arith.subf %147, %150 : vector<1x32xf32>
    %152 = math.exp %151 : vector<1x32xf32>
    %cst_55 = arith.constant dense<0.000000e+00> : vector<1xf32>
    %153 = vector.multi_reduction <add>, %152, %cst_55 [1] : vector<1x32xf32> to vector<1xf32>
    %154 = vector.shape_cast %153 : vector<1xf32> to vector<1x1xf32>
    %155 = tpu.reciprocal %154 {approx = true} : vector<1x1xf32> -> vector<1x1xf32>
    %156 = vector.broadcast %155 : vector<1x1xf32> to vector<1x32xf32>
    %157 = arith.mulf %152, %156 : vector<1x32xf32>
    %cst_56 = arith.constant dense<0xFF800000> : vector<1xf32>
    %158 = vector.multi_reduction <maximumf>, %157, %cst_56 [1] : vector<1x32xf32> to vector<1xf32>
    %159 = vector.shape_cast %158 : vector<1xf32> to vector<1x1xf32>
    %160 = vector.broadcast %159 : vector<1x1xf32> to vector<1x32xf32>
    %161 = arith.cmpf oeq, %157, %160 : vector<1x32xf32>
    %cst_57 = arith.constant 3.200000e+01 : f32
    %162 = vector.broadcast %cst_57 : f32 to vector<1x32xf32>
    %163 = arith.select %161, %14, %162 : vector<1x32xi1>, vector<1x32xf32>
    %cst_58 = arith.constant dense<0x7F800000> : vector<1xf32>
    %164 = vector.multi_reduction <minimumf>, %163, %cst_58 [1] : vector<1x32xf32> to vector<1xf32>
    %165 = vector.shape_cast %164 : vector<1xf32> to vector<1x1xf32>
    %c1_i32 = arith.constant 1 : i32
    %166 = vector.broadcast %c1_i32 : i32 to vector<1x6xi32>
    %167 = arith.cmpi eq, %15, %166 : vector<1x6xi32>
    %168 = arith.fptosi %165 : vector<1x1xf32> to vector<1x1xi32>
    %169 = vector.shape_cast %168 : vector<1x1xi32> to vector<1x1xi32>
    %170 = vector.broadcast %169 : vector<1x1xi32> to vector<1x6xi32>
    %171 = arith.select %167, %170, %90 : vector<1x6xi1>, vector<1x6xi32>
    %172 = vector.shape_cast %159 : vector<1x1xf32> to vector<1x1xf32>
    %173 = vector.broadcast %172 : vector<1x1xf32> to vector<1x6xf32>
    %174 = arith.select %167, %173, %93 : vector<1x6xi1>, vector<1x6xf32>
    %175 = vector.broadcast %165 : vector<1x1xf32> to vector<1x32xf32>
    %176 = arith.cmpf oeq, %14, %175 : vector<1x32xf32>
    %177 = arith.extui %176 : vector<1x32xi1> to vector<1x32xi32>
    %178 = arith.sitofp %177 : vector<1x32xi32> to vector<1x32xf32>
    %cst_59 = arith.constant dense<0.000000e+00> : vector<1x32xf32>
    %179 = tpu.matmul %178, %0, %cst_59 {dimension_numbers = #tpu.dot_dimension_numbers<[1], [0], [0], [1], [0, 0, 1, 1], [], []>} : vector<1x32xf32>, vector<32x32xf32>, vector<1x32xf32> -> vector<1x32xf32>
    %cst_60 = arith.constant dense<0.000000e+00> : vector<1x96xf32>
    %180 = tpu.matmul %179, %2, %cst_60 {dimension_numbers = #tpu.dot_dimension_numbers<[1], [0], [0], [1], [0, 0, 1, 1], [], []>} : vector<1x32xf32>, vector<32x96xf32>, vector<1x96xf32> -> vector<1x96xf32>
    %181 = arith.addf %180, %4 : vector<1x96xf32>
    %cst_61 = arith.constant dense<0.000000e+00> : vector<1x96xf32>
    %182 = tpu.matmul %128, %3, %cst_61 {dimension_numbers = #tpu.dot_dimension_numbers<[1], [0], [0], [1], [0, 0, 1, 1], [], []>} : vector<1x32xf32>, vector<32x96xf32>, vector<1x96xf32> -> vector<1x96xf32>
    %183 = arith.addf %182, %5 : vector<1x96xf32>
    %184 = vector.extract_strided_slice %181 {offsets = [0, 0], sizes = [1, 32], strides = [1, 1]} : vector<1x96xf32> to vector<1x32xf32>
    %185 = vector.extract_strided_slice %183 {offsets = [0, 0], sizes = [1, 32], strides = [1, 1]} : vector<1x96xf32> to vector<1x32xf32>
    %186 = arith.addf %184, %185 : vector<1x32xf32>
    %187 = arith.negf %186 : vector<1x32xf32>
    %188 = math.exp %187 : vector<1x32xf32>
    %cst_62 = arith.constant 1.000000e+00 : f32
    %189 = vector.broadcast %cst_62 : f32 to vector<1x32xf32>
    %190 = arith.addf %189, %188 : vector<1x32xf32>
    %191 = arith.divf %189, %190 : vector<1x32xf32>
    %192 = vector.extract_strided_slice %181 {offsets = [0, 32], sizes = [1, 32], strides = [1, 1]} : vector<1x96xf32> to vector<1x32xf32>
    %193 = vector.extract_strided_slice %183 {offsets = [0, 32], sizes = [1, 32], strides = [1, 1]} : vector<1x96xf32> to vector<1x32xf32>
    %194 = arith.addf %192, %193 : vector<1x32xf32>
    %195 = arith.negf %194 : vector<1x32xf32>
    %196 = math.exp %195 : vector<1x32xf32>
    %cst_63 = arith.constant 1.000000e+00 : f32
    %197 = vector.broadcast %cst_63 : f32 to vector<1x32xf32>
    %198 = arith.addf %197, %196 : vector<1x32xf32>
    %199 = arith.divf %197, %198 : vector<1x32xf32>
    %200 = vector.extract_strided_slice %181 {offsets = [0, 64], sizes = [1, 32], strides = [1, 1]} : vector<1x96xf32> to vector<1x32xf32>
    %201 = vector.extract_strided_slice %183 {offsets = [0, 64], sizes = [1, 32], strides = [1, 1]} : vector<1x96xf32> to vector<1x32xf32>
    %202 = arith.mulf %191, %201 : vector<1x32xf32>
    %203 = arith.addf %200, %202 : vector<1x32xf32>
    %204 = math.tanh %203 : vector<1x32xf32>
    %cst_64 = arith.constant 1.000000e+00 : f32
    %205 = vector.broadcast %cst_64 : f32 to vector<1x32xf32>
    %206 = arith.subf %205, %199 : vector<1x32xf32>
    %207 = arith.mulf %206, %204 : vector<1x32xf32>
    %208 = arith.mulf %199, %128 : vector<1x32xf32>
    %209 = arith.addf %207, %208 : vector<1x32xf32>
    %cst_65 = arith.constant dense<0.000000e+00> : vector<1x8xf32>
    %210 = tpu.matmul %209, %1, %cst_65 {dimension_numbers = #tpu.dot_dimension_numbers<[1], [1], [0], [0], [0, 0, 1, 0], [], []>} : vector<1x32xf32>, vector<8x32xf32>, vector<1x8xf32> -> vector<1x8xf32>
    %cst_66 = arith.constant dense<0xFF800000> : vector<1xf32>
    %211 = vector.multi_reduction <maximumf>, %210, %cst_66 [1] : vector<1x8xf32> to vector<1xf32>
    %212 = vector.shape_cast %211 : vector<1xf32> to vector<1x1xf32>
    %213 = vector.broadcast %212 : vector<1x1xf32> to vector<1x8xf32>
    %214 = arith.subf %210, %213 : vector<1x8xf32>
    %215 = math.exp %214 : vector<1x8xf32>
    %cst_67 = arith.constant dense<0.000000e+00> : vector<1xf32>
    %216 = vector.multi_reduction <add>, %215, %cst_67 [1] : vector<1x8xf32> to vector<1xf32>
    %217 = vector.shape_cast %216 : vector<1xf32> to vector<1x1xf32>
    %218 = tpu.reciprocal %217 {approx = true} : vector<1x1xf32> -> vector<1x1xf32>
    %219 = vector.broadcast %218 : vector<1x1xf32> to vector<1x8xf32>
    %220 = arith.mulf %215, %219 : vector<1x8xf32>
    %cst_68 = arith.constant dense<0.000000e+00> : vector<1x32xf32>
    %221 = tpu.matmul %220, %1, %cst_68 {dimension_numbers = #tpu.dot_dimension_numbers<[1], [0], [0], [1], [0, 0, 1, 1], [], []>} : vector<1x8xf32>, vector<8x32xf32>, vector<1x32xf32> -> vector<1x32xf32>
    %cst_69 = arith.constant dense<0.000000e+00> : vector<1x32xf32>
    %222 = tpu.matmul %209, %6, %cst_69 {dimension_numbers = #tpu.dot_dimension_numbers<[1], [0], [0], [1], [0, 0, 1, 1], [], []>} : vector<1x32xf32>, vector<32x32xf32>, vector<1x32xf32> -> vector<1x32xf32>
    %cst_70 = arith.constant dense<0.000000e+00> : vector<1x32xf32>
    %223 = tpu.matmul %221, %7, %cst_70 {dimension_numbers = #tpu.dot_dimension_numbers<[1], [0], [0], [1], [0, 0, 1, 1], [], []>} : vector<1x32xf32>, vector<32x32xf32>, vector<1x32xf32> -> vector<1x32xf32>
    %224 = arith.addf %222, %223 : vector<1x32xf32>
    %225 = arith.addf %224, %8 : vector<1x32xf32>
    %226 = math.tanh %225 : vector<1x32xf32>
    %cst_71 = arith.constant dense<0.000000e+00> : vector<1x32xf32>
    %227 = tpu.matmul %226, %9, %cst_71 {dimension_numbers = #tpu.dot_dimension_numbers<[1], [0], [0], [1], [0, 0, 1, 1], [], []>} : vector<1x32xf32>, vector<32x32xf32>, vector<1x32xf32> -> vector<1x32xf32>
    %228 = arith.addf %227, %10 : vector<1x32xf32>
    %cst_72 = arith.constant dense<0xFF800000> : vector<1xf32>
    %229 = vector.multi_reduction <maximumf>, %228, %cst_72 [1] : vector<1x32xf32> to vector<1xf32>
    %230 = vector.shape_cast %229 : vector<1xf32> to vector<1x1xf32>
    %231 = vector.broadcast %230 : vector<1x1xf32> to vector<1x32xf32>
    %232 = arith.subf %228, %231 : vector<1x32xf32>
    %233 = math.exp %232 : vector<1x32xf32>
    %cst_73 = arith.constant dense<0.000000e+00> : vector<1xf32>
    %234 = vector.multi_reduction <add>, %233, %cst_73 [1] : vector<1x32xf32> to vector<1xf32>
    %235 = vector.shape_cast %234 : vector<1xf32> to vector<1x1xf32>
    %236 = tpu.reciprocal %235 {approx = true} : vector<1x1xf32> -> vector<1x1xf32>
    %237 = vector.broadcast %236 : vector<1x1xf32> to vector<1x32xf32>
    %238 = arith.mulf %233, %237 : vector<1x32xf32>
    %cst_74 = arith.constant dense<0xFF800000> : vector<1xf32>
    %239 = vector.multi_reduction <maximumf>, %238, %cst_74 [1] : vector<1x32xf32> to vector<1xf32>
    %240 = vector.shape_cast %239 : vector<1xf32> to vector<1x1xf32>
    %241 = vector.broadcast %240 : vector<1x1xf32> to vector<1x32xf32>
    %242 = arith.cmpf oeq, %238, %241 : vector<1x32xf32>
    %cst_75 = arith.constant 3.200000e+01 : f32
    %243 = vector.broadcast %cst_75 : f32 to vector<1x32xf32>
    %244 = arith.select %242, %14, %243 : vector<1x32xi1>, vector<1x32xf32>
    %cst_76 = arith.constant dense<0x7F800000> : vector<1xf32>
    %245 = vector.multi_reduction <minimumf>, %244, %cst_76 [1] : vector<1x32xf32> to vector<1xf32>
    %246 = vector.shape_cast %245 : vector<1xf32> to vector<1x1xf32>
    %c2_i32 = arith.constant 2 : i32
    %247 = vector.broadcast %c2_i32 : i32 to vector<1x6xi32>
    %248 = arith.cmpi eq, %15, %247 : vector<1x6xi32>
    %249 = arith.fptosi %246 : vector<1x1xf32> to vector<1x1xi32>
    %250 = vector.shape_cast %249 : vector<1x1xi32> to vector<1x1xi32>
    %251 = vector.broadcast %250 : vector<1x1xi32> to vector<1x6xi32>
    %252 = arith.select %248, %251, %171 : vector<1x6xi1>, vector<1x6xi32>
    %253 = vector.shape_cast %240 : vector<1x1xf32> to vector<1x1xf32>
    %254 = vector.broadcast %253 : vector<1x1xf32> to vector<1x6xf32>
    %255 = arith.select %248, %254, %174 : vector<1x6xi1>, vector<1x6xf32>
    %256 = vector.broadcast %246 : vector<1x1xf32> to vector<1x32xf32>
    %257 = arith.cmpf oeq, %14, %256 : vector<1x32xf32>
    %258 = arith.extui %257 : vector<1x32xi1> to vector<1x32xi32>
    %259 = arith.sitofp %258 : vector<1x32xi32> to vector<1x32xf32>
    %cst_77 = arith.constant dense<0.000000e+00> : vector<1x32xf32>
    %260 = tpu.matmul %259, %0, %cst_77 {dimension_numbers = #tpu.dot_dimension_numbers<[1], [0], [0], [1], [0, 0, 1, 1], [], []>} : vector<1x32xf32>, vector<32x32xf32>, vector<1x32xf32> -> vector<1x32xf32>
    %cst_78 = arith.constant dense<0.000000e+00> : vector<1x96xf32>
    %261 = tpu.matmul %260, %2, %cst_78 {dimension_numbers = #tpu.dot_dimension_numbers<[1], [0], [0], [1], [0, 0, 1, 1], [], []>} : vector<1x32xf32>, vector<32x96xf32>, vector<1x96xf32> -> vector<1x96xf32>
    %262 = arith.addf %261, %4 : vector<1x96xf32>
    %cst_79 = arith.constant dense<0.000000e+00> : vector<1x96xf32>
    %263 = tpu.matmul %209, %3, %cst_79 {dimension_numbers = #tpu.dot_dimension_numbers<[1], [0], [0], [1], [0, 0, 1, 1], [], []>} : vector<1x32xf32>, vector<32x96xf32>, vector<1x96xf32> -> vector<1x96xf32>
    %264 = arith.addf %263, %5 : vector<1x96xf32>
    %265 = vector.extract_strided_slice %262 {offsets = [0, 0], sizes = [1, 32], strides = [1, 1]} : vector<1x96xf32> to vector<1x32xf32>
    %266 = vector.extract_strided_slice %264 {offsets = [0, 0], sizes = [1, 32], strides = [1, 1]} : vector<1x96xf32> to vector<1x32xf32>
    %267 = arith.addf %265, %266 : vector<1x32xf32>
    %268 = arith.negf %267 : vector<1x32xf32>
    %269 = math.exp %268 : vector<1x32xf32>
    %cst_80 = arith.constant 1.000000e+00 : f32
    %270 = vector.broadcast %cst_80 : f32 to vector<1x32xf32>
    %271 = arith.addf %270, %269 : vector<1x32xf32>
    %272 = arith.divf %270, %271 : vector<1x32xf32>
    %273 = vector.extract_strided_slice %262 {offsets = [0, 32], sizes = [1, 32], strides = [1, 1]} : vector<1x96xf32> to vector<1x32xf32>
    %274 = vector.extract_strided_slice %264 {offsets = [0, 32], sizes = [1, 32], strides = [1, 1]} : vector<1x96xf32> to vector<1x32xf32>
    %275 = arith.addf %273, %274 : vector<1x32xf32>
    %276 = arith.negf %275 : vector<1x32xf32>
    %277 = math.exp %276 : vector<1x32xf32>
    %cst_81 = arith.constant 1.000000e+00 : f32
    %278 = vector.broadcast %cst_81 : f32 to vector<1x32xf32>
    %279 = arith.addf %278, %277 : vector<1x32xf32>
    %280 = arith.divf %278, %279 : vector<1x32xf32>
    %281 = vector.extract_strided_slice %262 {offsets = [0, 64], sizes = [1, 32], strides = [1, 1]} : vector<1x96xf32> to vector<1x32xf32>
    %282 = vector.extract_strided_slice %264 {offsets = [0, 64], sizes = [1, 32], strides = [1, 1]} : vector<1x96xf32> to vector<1x32xf32>
    %283 = arith.mulf %272, %282 : vector<1x32xf32>
    %284 = arith.addf %281, %283 : vector<1x32xf32>
    %285 = math.tanh %284 : vector<1x32xf32>
    %cst_82 = arith.constant 1.000000e+00 : f32
    %286 = vector.broadcast %cst_82 : f32 to vector<1x32xf32>
    %287 = arith.subf %286, %280 : vector<1x32xf32>
    %288 = arith.mulf %287, %285 : vector<1x32xf32>
    %289 = arith.mulf %280, %209 : vector<1x32xf32>
    %290 = arith.addf %288, %289 : vector<1x32xf32>
    %cst_83 = arith.constant dense<0.000000e+00> : vector<1x8xf32>
    %291 = tpu.matmul %290, %1, %cst_83 {dimension_numbers = #tpu.dot_dimension_numbers<[1], [1], [0], [0], [0, 0, 1, 0], [], []>} : vector<1x32xf32>, vector<8x32xf32>, vector<1x8xf32> -> vector<1x8xf32>
    %cst_84 = arith.constant dense<0xFF800000> : vector<1xf32>
    %292 = vector.multi_reduction <maximumf>, %291, %cst_84 [1] : vector<1x8xf32> to vector<1xf32>
    %293 = vector.shape_cast %292 : vector<1xf32> to vector<1x1xf32>
    %294 = vector.broadcast %293 : vector<1x1xf32> to vector<1x8xf32>
    %295 = arith.subf %291, %294 : vector<1x8xf32>
    %296 = math.exp %295 : vector<1x8xf32>
    %cst_85 = arith.constant dense<0.000000e+00> : vector<1xf32>
    %297 = vector.multi_reduction <add>, %296, %cst_85 [1] : vector<1x8xf32> to vector<1xf32>
    %298 = vector.shape_cast %297 : vector<1xf32> to vector<1x1xf32>
    %299 = tpu.reciprocal %298 {approx = true} : vector<1x1xf32> -> vector<1x1xf32>
    %300 = vector.broadcast %299 : vector<1x1xf32> to vector<1x8xf32>
    %301 = arith.mulf %296, %300 : vector<1x8xf32>
    %cst_86 = arith.constant dense<0.000000e+00> : vector<1x32xf32>
    %302 = tpu.matmul %301, %1, %cst_86 {dimension_numbers = #tpu.dot_dimension_numbers<[1], [0], [0], [1], [0, 0, 1, 1], [], []>} : vector<1x8xf32>, vector<8x32xf32>, vector<1x32xf32> -> vector<1x32xf32>
    %cst_87 = arith.constant dense<0.000000e+00> : vector<1x32xf32>
    %303 = tpu.matmul %290, %6, %cst_87 {dimension_numbers = #tpu.dot_dimension_numbers<[1], [0], [0], [1], [0, 0, 1, 1], [], []>} : vector<1x32xf32>, vector<32x32xf32>, vector<1x32xf32> -> vector<1x32xf32>
    %cst_88 = arith.constant dense<0.000000e+00> : vector<1x32xf32>
    %304 = tpu.matmul %302, %7, %cst_88 {dimension_numbers = #tpu.dot_dimension_numbers<[1], [0], [0], [1], [0, 0, 1, 1], [], []>} : vector<1x32xf32>, vector<32x32xf32>, vector<1x32xf32> -> vector<1x32xf32>
    %305 = arith.addf %303, %304 : vector<1x32xf32>
    %306 = arith.addf %305, %8 : vector<1x32xf32>
    %307 = math.tanh %306 : vector<1x32xf32>
    %cst_89 = arith.constant dense<0.000000e+00> : vector<1x32xf32>
    %308 = tpu.matmul %307, %9, %cst_89 {dimension_numbers = #tpu.dot_dimension_numbers<[1], [0], [0], [1], [0, 0, 1, 1], [], []>} : vector<1x32xf32>, vector<32x32xf32>, vector<1x32xf32> -> vector<1x32xf32>
    %309 = arith.addf %308, %10 : vector<1x32xf32>
    %cst_90 = arith.constant dense<0xFF800000> : vector<1xf32>
    %310 = vector.multi_reduction <maximumf>, %309, %cst_90 [1] : vector<1x32xf32> to vector<1xf32>
    %311 = vector.shape_cast %310 : vector<1xf32> to vector<1x1xf32>
    %312 = vector.broadcast %311 : vector<1x1xf32> to vector<1x32xf32>
    %313 = arith.subf %309, %312 : vector<1x32xf32>
    %314 = math.exp %313 : vector<1x32xf32>
    %cst_91 = arith.constant dense<0.000000e+00> : vector<1xf32>
    %315 = vector.multi_reduction <add>, %314, %cst_91 [1] : vector<1x32xf32> to vector<1xf32>
    %316 = vector.shape_cast %315 : vector<1xf32> to vector<1x1xf32>
    %317 = tpu.reciprocal %316 {approx = true} : vector<1x1xf32> -> vector<1x1xf32>
    %318 = vector.broadcast %317 : vector<1x1xf32> to vector<1x32xf32>
    %319 = arith.mulf %314, %318 : vector<1x32xf32>
    %cst_92 = arith.constant dense<0xFF800000> : vector<1xf32>
    %320 = vector.multi_reduction <maximumf>, %319, %cst_92 [1] : vector<1x32xf32> to vector<1xf32>
    %321 = vector.shape_cast %320 : vector<1xf32> to vector<1x1xf32>
    %322 = vector.broadcast %321 : vector<1x1xf32> to vector<1x32xf32>
    %323 = arith.cmpf oeq, %319, %322 : vector<1x32xf32>
    %cst_93 = arith.constant 3.200000e+01 : f32
    %324 = vector.broadcast %cst_93 : f32 to vector<1x32xf32>
    %325 = arith.select %323, %14, %324 : vector<1x32xi1>, vector<1x32xf32>
    %cst_94 = arith.constant dense<0x7F800000> : vector<1xf32>
    %326 = vector.multi_reduction <minimumf>, %325, %cst_94 [1] : vector<1x32xf32> to vector<1xf32>
    %327 = vector.shape_cast %326 : vector<1xf32> to vector<1x1xf32>
    %c3_i32 = arith.constant 3 : i32
    %328 = vector.broadcast %c3_i32 : i32 to vector<1x6xi32>
    %329 = arith.cmpi eq, %15, %328 : vector<1x6xi32>
    %330 = arith.fptosi %327 : vector<1x1xf32> to vector<1x1xi32>
    %331 = vector.shape_cast %330 : vector<1x1xi32> to vector<1x1xi32>
    %332 = vector.broadcast %331 : vector<1x1xi32> to vector<1x6xi32>
    %333 = arith.select %329, %332, %252 : vector<1x6xi1>, vector<1x6xi32>
    %334 = vector.shape_cast %321 : vector<1x1xf32> to vector<1x1xf32>
    %335 = vector.broadcast %334 : vector<1x1xf32> to vector<1x6xf32>
    %336 = arith.select %329, %335, %255 : vector<1x6xi1>, vector<1x6xf32>
    %337 = vector.broadcast %327 : vector<1x1xf32> to vector<1x32xf32>
    %338 = arith.cmpf oeq, %14, %337 : vector<1x32xf32>
    %339 = arith.extui %338 : vector<1x32xi1> to vector<1x32xi32>
    %340 = arith.sitofp %339 : vector<1x32xi32> to vector<1x32xf32>
    %cst_95 = arith.constant dense<0.000000e+00> : vector<1x32xf32>
    %341 = tpu.matmul %340, %0, %cst_95 {dimension_numbers = #tpu.dot_dimension_numbers<[1], [0], [0], [1], [0, 0, 1, 1], [], []>} : vector<1x32xf32>, vector<32x32xf32>, vector<1x32xf32> -> vector<1x32xf32>
    %cst_96 = arith.constant dense<0.000000e+00> : vector<1x96xf32>
    %342 = tpu.matmul %341, %2, %cst_96 {dimension_numbers = #tpu.dot_dimension_numbers<[1], [0], [0], [1], [0, 0, 1, 1], [], []>} : vector<1x32xf32>, vector<32x96xf32>, vector<1x96xf32> -> vector<1x96xf32>
    %343 = arith.addf %342, %4 : vector<1x96xf32>
    %cst_97 = arith.constant dense<0.000000e+00> : vector<1x96xf32>
    %344 = tpu.matmul %290, %3, %cst_97 {dimension_numbers = #tpu.dot_dimension_numbers<[1], [0], [0], [1], [0, 0, 1, 1], [], []>} : vector<1x32xf32>, vector<32x96xf32>, vector<1x96xf32> -> vector<1x96xf32>
    %345 = arith.addf %344, %5 : vector<1x96xf32>
    %346 = vector.extract_strided_slice %343 {offsets = [0, 0], sizes = [1, 32], strides = [1, 1]} : vector<1x96xf32> to vector<1x32xf32>
    %347 = vector.extract_strided_slice %345 {offsets = [0, 0], sizes = [1, 32], strides = [1, 1]} : vector<1x96xf32> to vector<1x32xf32>
    %348 = arith.addf %346, %347 : vector<1x32xf32>
    %349 = arith.negf %348 : vector<1x32xf32>
    %350 = math.exp %349 : vector<1x32xf32>
    %cst_98 = arith.constant 1.000000e+00 : f32
    %351 = vector.broadcast %cst_98 : f32 to vector<1x32xf32>
    %352 = arith.addf %351, %350 : vector<1x32xf32>
    %353 = arith.divf %351, %352 : vector<1x32xf32>
    %354 = vector.extract_strided_slice %343 {offsets = [0, 32], sizes = [1, 32], strides = [1, 1]} : vector<1x96xf32> to vector<1x32xf32>
    %355 = vector.extract_strided_slice %345 {offsets = [0, 32], sizes = [1, 32], strides = [1, 1]} : vector<1x96xf32> to vector<1x32xf32>
    %356 = arith.addf %354, %355 : vector<1x32xf32>
    %357 = arith.negf %356 : vector<1x32xf32>
    %358 = math.exp %357 : vector<1x32xf32>
    %cst_99 = arith.constant 1.000000e+00 : f32
    %359 = vector.broadcast %cst_99 : f32 to vector<1x32xf32>
    %360 = arith.addf %359, %358 : vector<1x32xf32>
    %361 = arith.divf %359, %360 : vector<1x32xf32>
    %362 = vector.extract_strided_slice %343 {offsets = [0, 64], sizes = [1, 32], strides = [1, 1]} : vector<1x96xf32> to vector<1x32xf32>
    %363 = vector.extract_strided_slice %345 {offsets = [0, 64], sizes = [1, 32], strides = [1, 1]} : vector<1x96xf32> to vector<1x32xf32>
    %364 = arith.mulf %353, %363 : vector<1x32xf32>
    %365 = arith.addf %362, %364 : vector<1x32xf32>
    %366 = math.tanh %365 : vector<1x32xf32>
    %cst_100 = arith.constant 1.000000e+00 : f32
    %367 = vector.broadcast %cst_100 : f32 to vector<1x32xf32>
    %368 = arith.subf %367, %361 : vector<1x32xf32>
    %369 = arith.mulf %368, %366 : vector<1x32xf32>
    %370 = arith.mulf %361, %290 : vector<1x32xf32>
    %371 = arith.addf %369, %370 : vector<1x32xf32>
    %cst_101 = arith.constant dense<0.000000e+00> : vector<1x8xf32>
    %372 = tpu.matmul %371, %1, %cst_101 {dimension_numbers = #tpu.dot_dimension_numbers<[1], [1], [0], [0], [0, 0, 1, 0], [], []>} : vector<1x32xf32>, vector<8x32xf32>, vector<1x8xf32> -> vector<1x8xf32>
    %cst_102 = arith.constant dense<0xFF800000> : vector<1xf32>
    %373 = vector.multi_reduction <maximumf>, %372, %cst_102 [1] : vector<1x8xf32> to vector<1xf32>
    %374 = vector.shape_cast %373 : vector<1xf32> to vector<1x1xf32>
    %375 = vector.broadcast %374 : vector<1x1xf32> to vector<1x8xf32>
    %376 = arith.subf %372, %375 : vector<1x8xf32>
    %377 = math.exp %376 : vector<1x8xf32>
    %cst_103 = arith.constant dense<0.000000e+00> : vector<1xf32>
    %378 = vector.multi_reduction <add>, %377, %cst_103 [1] : vector<1x8xf32> to vector<1xf32>
    %379 = vector.shape_cast %378 : vector<1xf32> to vector<1x1xf32>
    %380 = tpu.reciprocal %379 {approx = true} : vector<1x1xf32> -> vector<1x1xf32>
    %381 = vector.broadcast %380 : vector<1x1xf32> to vector<1x8xf32>
    %382 = arith.mulf %377, %381 : vector<1x8xf32>
    %cst_104 = arith.constant dense<0.000000e+00> : vector<1x32xf32>
    %383 = tpu.matmul %382, %1, %cst_104 {dimension_numbers = #tpu.dot_dimension_numbers<[1], [0], [0], [1], [0, 0, 1, 1], [], []>} : vector<1x8xf32>, vector<8x32xf32>, vector<1x32xf32> -> vector<1x32xf32>
    %cst_105 = arith.constant dense<0.000000e+00> : vector<1x32xf32>
    %384 = tpu.matmul %371, %6, %cst_105 {dimension_numbers = #tpu.dot_dimension_numbers<[1], [0], [0], [1], [0, 0, 1, 1], [], []>} : vector<1x32xf32>, vector<32x32xf32>, vector<1x32xf32> -> vector<1x32xf32>
    %cst_106 = arith.constant dense<0.000000e+00> : vector<1x32xf32>
    %385 = tpu.matmul %383, %7, %cst_106 {dimension_numbers = #tpu.dot_dimension_numbers<[1], [0], [0], [1], [0, 0, 1, 1], [], []>} : vector<1x32xf32>, vector<32x32xf32>, vector<1x32xf32> -> vector<1x32xf32>
    %386 = arith.addf %384, %385 : vector<1x32xf32>
    %387 = arith.addf %386, %8 : vector<1x32xf32>
    %388 = math.tanh %387 : vector<1x32xf32>
    %cst_107 = arith.constant dense<0.000000e+00> : vector<1x32xf32>
    %389 = tpu.matmul %388, %9, %cst_107 {dimension_numbers = #tpu.dot_dimension_numbers<[1], [0], [0], [1], [0, 0, 1, 1], [], []>} : vector<1x32xf32>, vector<32x32xf32>, vector<1x32xf32> -> vector<1x32xf32>
    %390 = arith.addf %389, %10 : vector<1x32xf32>
    %cst_108 = arith.constant dense<0xFF800000> : vector<1xf32>
    %391 = vector.multi_reduction <maximumf>, %390, %cst_108 [1] : vector<1x32xf32> to vector<1xf32>
    %392 = vector.shape_cast %391 : vector<1xf32> to vector<1x1xf32>
    %393 = vector.broadcast %392 : vector<1x1xf32> to vector<1x32xf32>
    %394 = arith.subf %390, %393 : vector<1x32xf32>
    %395 = math.exp %394 : vector<1x32xf32>
    %cst_109 = arith.constant dense<0.000000e+00> : vector<1xf32>
    %396 = vector.multi_reduction <add>, %395, %cst_109 [1] : vector<1x32xf32> to vector<1xf32>
    %397 = vector.shape_cast %396 : vector<1xf32> to vector<1x1xf32>
    %398 = tpu.reciprocal %397 {approx = true} : vector<1x1xf32> -> vector<1x1xf32>
    %399 = vector.broadcast %398 : vector<1x1xf32> to vector<1x32xf32>
    %400 = arith.mulf %395, %399 : vector<1x32xf32>
    %cst_110 = arith.constant dense<0xFF800000> : vector<1xf32>
    %401 = vector.multi_reduction <maximumf>, %400, %cst_110 [1] : vector<1x32xf32> to vector<1xf32>
    %402 = vector.shape_cast %401 : vector<1xf32> to vector<1x1xf32>
    %403 = vector.broadcast %402 : vector<1x1xf32> to vector<1x32xf32>
    %404 = arith.cmpf oeq, %400, %403 : vector<1x32xf32>
    %cst_111 = arith.constant 3.200000e+01 : f32
    %405 = vector.broadcast %cst_111 : f32 to vector<1x32xf32>
    %406 = arith.select %404, %14, %405 : vector<1x32xi1>, vector<1x32xf32>
    %cst_112 = arith.constant dense<0x7F800000> : vector<1xf32>
    %407 = vector.multi_reduction <minimumf>, %406, %cst_112 [1] : vector<1x32xf32> to vector<1xf32>
    %408 = vector.shape_cast %407 : vector<1xf32> to vector<1x1xf32>
    %c4_i32 = arith.constant 4 : i32
    %409 = vector.broadcast %c4_i32 : i32 to vector<1x6xi32>
    %410 = arith.cmpi eq, %15, %409 : vector<1x6xi32>
    %411 = arith.fptosi %408 : vector<1x1xf32> to vector<1x1xi32>
    %412 = vector.shape_cast %411 : vector<1x1xi32> to vector<1x1xi32>
    %413 = vector.broadcast %412 : vector<1x1xi32> to vector<1x6xi32>
    %414 = arith.select %410, %413, %333 : vector<1x6xi1>, vector<1x6xi32>
    %415 = vector.shape_cast %402 : vector<1x1xf32> to vector<1x1xf32>
    %416 = vector.broadcast %415 : vector<1x1xf32> to vector<1x6xf32>
    %417 = arith.select %410, %416, %336 : vector<1x6xi1>, vector<1x6xf32>
    %418 = vector.broadcast %408 : vector<1x1xf32> to vector<1x32xf32>
    %419 = arith.cmpf oeq, %14, %418 : vector<1x32xf32>
    %420 = arith.extui %419 : vector<1x32xi1> to vector<1x32xi32>
    %421 = arith.sitofp %420 : vector<1x32xi32> to vector<1x32xf32>
    %cst_113 = arith.constant dense<0.000000e+00> : vector<1x32xf32>
    %422 = tpu.matmul %421, %0, %cst_113 {dimension_numbers = #tpu.dot_dimension_numbers<[1], [0], [0], [1], [0, 0, 1, 1], [], []>} : vector<1x32xf32>, vector<32x32xf32>, vector<1x32xf32> -> vector<1x32xf32>
    %cst_114 = arith.constant dense<0.000000e+00> : vector<1x96xf32>
    %423 = tpu.matmul %422, %2, %cst_114 {dimension_numbers = #tpu.dot_dimension_numbers<[1], [0], [0], [1], [0, 0, 1, 1], [], []>} : vector<1x32xf32>, vector<32x96xf32>, vector<1x96xf32> -> vector<1x96xf32>
    %424 = arith.addf %423, %4 : vector<1x96xf32>
    %cst_115 = arith.constant dense<0.000000e+00> : vector<1x96xf32>
    %425 = tpu.matmul %371, %3, %cst_115 {dimension_numbers = #tpu.dot_dimension_numbers<[1], [0], [0], [1], [0, 0, 1, 1], [], []>} : vector<1x32xf32>, vector<32x96xf32>, vector<1x96xf32> -> vector<1x96xf32>
    %426 = arith.addf %425, %5 : vector<1x96xf32>
    %427 = vector.extract_strided_slice %424 {offsets = [0, 0], sizes = [1, 32], strides = [1, 1]} : vector<1x96xf32> to vector<1x32xf32>
    %428 = vector.extract_strided_slice %426 {offsets = [0, 0], sizes = [1, 32], strides = [1, 1]} : vector<1x96xf32> to vector<1x32xf32>
    %429 = arith.addf %427, %428 : vector<1x32xf32>
    %430 = arith.negf %429 : vector<1x32xf32>
    %431 = math.exp %430 : vector<1x32xf32>
    %cst_116 = arith.constant 1.000000e+00 : f32
    %432 = vector.broadcast %cst_116 : f32 to vector<1x32xf32>
    %433 = arith.addf %432, %431 : vector<1x32xf32>
    %434 = arith.divf %432, %433 : vector<1x32xf32>
    %435 = vector.extract_strided_slice %424 {offsets = [0, 32], sizes = [1, 32], strides = [1, 1]} : vector<1x96xf32> to vector<1x32xf32>
    %436 = vector.extract_strided_slice %426 {offsets = [0, 32], sizes = [1, 32], strides = [1, 1]} : vector<1x96xf32> to vector<1x32xf32>
    %437 = arith.addf %435, %436 : vector<1x32xf32>
    %438 = arith.negf %437 : vector<1x32xf32>
    %439 = math.exp %438 : vector<1x32xf32>
    %cst_117 = arith.constant 1.000000e+00 : f32
    %440 = vector.broadcast %cst_117 : f32 to vector<1x32xf32>
    %441 = arith.addf %440, %439 : vector<1x32xf32>
    %442 = arith.divf %440, %441 : vector<1x32xf32>
    %443 = vector.extract_strided_slice %424 {offsets = [0, 64], sizes = [1, 32], strides = [1, 1]} : vector<1x96xf32> to vector<1x32xf32>
    %444 = vector.extract_strided_slice %426 {offsets = [0, 64], sizes = [1, 32], strides = [1, 1]} : vector<1x96xf32> to vector<1x32xf32>
    %445 = arith.mulf %434, %444 : vector<1x32xf32>
    %446 = arith.addf %443, %445 : vector<1x32xf32>
    %447 = math.tanh %446 : vector<1x32xf32>
    %cst_118 = arith.constant 1.000000e+00 : f32
    %448 = vector.broadcast %cst_118 : f32 to vector<1x32xf32>
    %449 = arith.subf %448, %442 : vector<1x32xf32>
    %450 = arith.mulf %449, %447 : vector<1x32xf32>
    %451 = arith.mulf %442, %371 : vector<1x32xf32>
    %452 = arith.addf %450, %451 : vector<1x32xf32>
    %cst_119 = arith.constant dense<0.000000e+00> : vector<1x8xf32>
    %453 = tpu.matmul %452, %1, %cst_119 {dimension_numbers = #tpu.dot_dimension_numbers<[1], [1], [0], [0], [0, 0, 1, 0], [], []>} : vector<1x32xf32>, vector<8x32xf32>, vector<1x8xf32> -> vector<1x8xf32>
    %cst_120 = arith.constant dense<0xFF800000> : vector<1xf32>
    %454 = vector.multi_reduction <maximumf>, %453, %cst_120 [1] : vector<1x8xf32> to vector<1xf32>
    %455 = vector.shape_cast %454 : vector<1xf32> to vector<1x1xf32>
    %456 = vector.broadcast %455 : vector<1x1xf32> to vector<1x8xf32>
    %457 = arith.subf %453, %456 : vector<1x8xf32>
    %458 = math.exp %457 : vector<1x8xf32>
    %cst_121 = arith.constant dense<0.000000e+00> : vector<1xf32>
    %459 = vector.multi_reduction <add>, %458, %cst_121 [1] : vector<1x8xf32> to vector<1xf32>
    %460 = vector.shape_cast %459 : vector<1xf32> to vector<1x1xf32>
    %461 = tpu.reciprocal %460 {approx = true} : vector<1x1xf32> -> vector<1x1xf32>
    %462 = vector.broadcast %461 : vector<1x1xf32> to vector<1x8xf32>
    %463 = arith.mulf %458, %462 : vector<1x8xf32>
    %cst_122 = arith.constant dense<0.000000e+00> : vector<1x32xf32>
    %464 = tpu.matmul %463, %1, %cst_122 {dimension_numbers = #tpu.dot_dimension_numbers<[1], [0], [0], [1], [0, 0, 1, 1], [], []>} : vector<1x8xf32>, vector<8x32xf32>, vector<1x32xf32> -> vector<1x32xf32>
    %cst_123 = arith.constant dense<0.000000e+00> : vector<1x32xf32>
    %465 = tpu.matmul %452, %6, %cst_123 {dimension_numbers = #tpu.dot_dimension_numbers<[1], [0], [0], [1], [0, 0, 1, 1], [], []>} : vector<1x32xf32>, vector<32x32xf32>, vector<1x32xf32> -> vector<1x32xf32>
    %cst_124 = arith.constant dense<0.000000e+00> : vector<1x32xf32>
    %466 = tpu.matmul %464, %7, %cst_124 {dimension_numbers = #tpu.dot_dimension_numbers<[1], [0], [0], [1], [0, 0, 1, 1], [], []>} : vector<1x32xf32>, vector<32x32xf32>, vector<1x32xf32> -> vector<1x32xf32>
    %467 = arith.addf %465, %466 : vector<1x32xf32>
    %468 = arith.addf %467, %8 : vector<1x32xf32>
    %469 = math.tanh %468 : vector<1x32xf32>
    %cst_125 = arith.constant dense<0.000000e+00> : vector<1x32xf32>
    %470 = tpu.matmul %469, %9, %cst_125 {dimension_numbers = #tpu.dot_dimension_numbers<[1], [0], [0], [1], [0, 0, 1, 1], [], []>} : vector<1x32xf32>, vector<32x32xf32>, vector<1x32xf32> -> vector<1x32xf32>
    %471 = arith.addf %470, %10 : vector<1x32xf32>
    %cst_126 = arith.constant dense<0xFF800000> : vector<1xf32>
    %472 = vector.multi_reduction <maximumf>, %471, %cst_126 [1] : vector<1x32xf32> to vector<1xf32>
    %473 = vector.shape_cast %472 : vector<1xf32> to vector<1x1xf32>
    %474 = vector.broadcast %473 : vector<1x1xf32> to vector<1x32xf32>
    %475 = arith.subf %471, %474 : vector<1x32xf32>
    %476 = math.exp %475 : vector<1x32xf32>
    %cst_127 = arith.constant dense<0.000000e+00> : vector<1xf32>
    %477 = vector.multi_reduction <add>, %476, %cst_127 [1] : vector<1x32xf32> to vector<1xf32>
    %478 = vector.shape_cast %477 : vector<1xf32> to vector<1x1xf32>
    %479 = tpu.reciprocal %478 {approx = true} : vector<1x1xf32> -> vector<1x1xf32>
    %480 = vector.broadcast %479 : vector<1x1xf32> to vector<1x32xf32>
    %481 = arith.mulf %476, %480 : vector<1x32xf32>
    %cst_128 = arith.constant dense<0xFF800000> : vector<1xf32>
    %482 = vector.multi_reduction <maximumf>, %481, %cst_128 [1] : vector<1x32xf32> to vector<1xf32>
    %483 = vector.shape_cast %482 : vector<1xf32> to vector<1x1xf32>
    %484 = vector.broadcast %483 : vector<1x1xf32> to vector<1x32xf32>
    %485 = arith.cmpf oeq, %481, %484 : vector<1x32xf32>
    %cst_129 = arith.constant 3.200000e+01 : f32
    %486 = vector.broadcast %cst_129 : f32 to vector<1x32xf32>
    %487 = arith.select %485, %14, %486 : vector<1x32xi1>, vector<1x32xf32>
    %cst_130 = arith.constant dense<0x7F800000> : vector<1xf32>
    %488 = vector.multi_reduction <minimumf>, %487, %cst_130 [1] : vector<1x32xf32> to vector<1xf32>
    %489 = vector.shape_cast %488 : vector<1xf32> to vector<1x1xf32>
    %c5_i32 = arith.constant 5 : i32
    %490 = vector.broadcast %c5_i32 : i32 to vector<1x6xi32>
    %491 = arith.cmpi eq, %15, %490 : vector<1x6xi32>
    %492 = arith.fptosi %489 : vector<1x1xf32> to vector<1x1xi32>
    %493 = vector.shape_cast %492 : vector<1x1xi32> to vector<1x1xi32>
    %494 = vector.broadcast %493 : vector<1x1xi32> to vector<1x6xi32>
    %495 = arith.select %491, %494, %414 : vector<1x6xi1>, vector<1x6xi32>
    %496 = vector.shape_cast %483 : vector<1x1xf32> to vector<1x1xf32>
    %497 = vector.broadcast %496 : vector<1x1xf32> to vector<1x6xf32>
    %498 = arith.select %491, %497, %417 : vector<1x6xi1>, vector<1x6xf32>
    %c0_131 = arith.constant 0 : index
    %c0_132 = arith.constant 0 : index
    %499 = vector.load %arg12[%c0_131, %c0_132] : memref<1x6xi32, #tpu.memory_space<vmem>>, vector<1x6xi32>
    tpu.vector_store %arg12[%c0_131, %c0_132], %495 {strides = array<i32>} : memref<1x6xi32, #tpu.memory_space<vmem>>, vector<1x6xi32>,
    %c0_133 = arith.constant 0 : index
    %c0_134 = arith.constant 0 : index
    %500 = vector.load %arg13[%c0_133, %c0_134] : memref<1x6xf32, #tpu.memory_space<vmem>>, vector<1x6xf32>
    tpu.vector_store %arg13[%c0_133, %c0_134], %498 {strides = array<i32>} : memref<1x6xf32, #tpu.memory_space<vmem>>, vector<1x6xf32>,
    return
  }
}

</mosaic_0001>

<bundles_post_ra>
// kernel: greedy_search_decoder.2
= control target key start
LH: loop header
LB: loop body
LE: loop exit
PB: predicated region body
PF: predicated region fallthrough
CT: control target
= control target key end

     0   :  { %s1739_s21 = smov 0   ;;  %s1914_s0 = inlined_call_operand.vmem [shape: f32[2,8,32], index: 0, kind: input, shape index: {}]   ;;  %s1915_s1 = inlined_call_operand.vmem [shape: f32[2,32,96], index: 1, kind: input, shape index: {}]   ;;  %s1916_s2 = inlined_call_operand.vmem [shape: f32[2,32,96], index: 2, kind: input, shape index: {}]   ;;  %s1917_s3 = inlined_call_operand.vmem [shape: f32[2,1,96], index: 3, kind: input, shape index: {}]   ;;  %s1918_s4 = inlined_call_operand.vmem [shape: f32[2,1,96], index: 4, kind: input, shape index: {}]   ;;  %s1919_s5 = inlined_call_operand.vmem [shape: f32[2,8,32], index: 5, kind: output, shape index: {0}]   ;;  %s1920_s6 = inlined_call_operand.vmem [shape: f32[2,1,32], index: 6, kind: output, shape index: {1}]  }
   0x1 LB: > { %s1400_s22 = sadd.s32 4294967295, %s1697_s21   ;;  %p1404_p0 = scmp.ge.s32.totalorder %s1697_s21, 1  ;;  %s1697_s21 = sphi %s1739_s21, %s17_s21  }
   0x2   : > { %p250_p1 = scmp.lt.s32.totalorder %s1697_s21, 3 }
   0x4   : > { %p251_p2 = pnand %p1404_p0, %p250_p1 }
   0x5   : > { %p297_p3 = scmp.lt.s32.totalorder (!%p251_p2), %s1400_s22, 1  ;;  %v1699_v0 = vmov (!%p251_p2), 0.0|0.0   ;;  %vm1700_vm0 = vmmov (!%p251_p2), 0   ;;  %v1701_v1 = vmov (!%p251_p2), 0.0   ;;  %vm336_vm1 = vcmask (!%p251_p2), 261120   ;;  %s1702_s13 = smov (!%p251_p2), 64  }
   0x6   : > { %254 = sbr.rel (%p251_p2) target bundleno = 5599 (0x15df), region = 40  ;;  %1576 = vmatprep.subr.bf16.mxu0 (!%p251_p2), %v1699_v0  ;;  %1582 = vmatprep.subr.bf16.mxu1 (!%p251_p2), %v1699_v0  ;;  %s1703_s17 = smov (!%p251_p2), 96   ;;  %vm1255_vm2 = vcmask (!%p251_p2), 1040384   ;;  %vm1257_vm3 = vcmask (!%p251_p2), 1041408   ;;  %vm1259_vm4 = vcmask (!%p251_p2), 1042432   ;;  %vm1261_vm5 = vcmask (!%p251_p2), 1043456  }
   0x7   : > { %1485 = vmatprep.mubr.msk.f32.mxu0 (!%p251_p2), %vm1700_vm0, %v1701_v1  ;;  %1496 = vmatprep.mubr.msk.f32.mxu1 (!%p251_p2), %vm1700_vm0, %v1701_v1  ;;  %vm1263_vm6 = vcmask (!%p251_p2), 1044480   ;;  %vm1265_vm7 = vcmask (!%p251_p2), 1045504   ;;  %vm1267_vm8 = vcmask (!%p251_p2), 1046528   ;;  %vm1278_vm9 = vcmask (!%p251_p2), 261127  }
   0xd   : > { %s1922_s22 = smov (!%p297_p3, %s1400_s22), 1 }
   0xe   : > { %s1430_s23 = sshll.u32 %s1922_s22, 5  ;;  %s1405_s30 = sshll.u32 %s1922_s22, 3 }
   0xf   : > { %s305_s26 = scalar_lea.vmem %s1915_s1, %s1430_s23  ;;  %s310_s29 = scalar_lea.vmem %s1916_s2, %s1430_s23 }
  0x10   : > { %v325_v2 = vld [vmem:[%s305_s26] sm:$0xff]  ;;  %v326_v3 = vld [vmem:[%s305_s26 + $0x8] sm:$0xff]  ;;  %v412_v7 = vld [vmem:[%s310_s29 + $0x10] sm:$0xff]  ;;  %s300_s9 = scalar_lea.vmem %s1914_s0, %s1405_s30  ;;  %s316_s12 = scalar_lea.vmem %s1918_s4, %s1922_s22 }
  0x11   : > { %v410_v4 = vld [vmem:[%s310_s29] sm:$0xff]  ;;  %v1577_v5 = vpack.c.bf16 %v326_v3, %v325_v2  ;;  %v411_v6 = vld [vmem:[%s310_s29 + $0x8] sm:$0xff]  ;;  %v413_v8 = vld [vmem:[%s310_s29 + $0x18] sm:$0xff]  ;;  %s313_s16 = scalar_lea.vmem %s1917_s3, %s1922_s22  ;;  %s323_s20 = scalar_lea.vmem %s1920_s6, %s1922_s22 }
  0x12   : > { %v1763_v9 = vpack.c.bf16 %v411_v6, %v410_v4  ;;  %v327_v10 = vld [vmem:[%s305_s26 + $0x10] sm:$0xff]  ;;  %v328_v11 = vld [vmem:[%s305_s26 + $0x18] sm:$0xff]  ;;  %v1765_v13 = vpack.c.bf16 %v413_v8, %v412_v7  ;;  %v324_v14 = vld [vmem:[%s300_s9] sm:$0xff]  ;;  %s320_s25 = scalar_lea.vmem %s1919_s5, %s1405_s30 }
  0x13   : > { %1578 = vmatpush3.bf16.msra.mxu0 %v1577_v5  ;;  %v1580_v12 = vpack.c.bf16 %v328_v11, %v327_v10  ;;  %v1796_v15 = vld [vmem:[%s316_s12] sm:$0x1] }
  0x14   : > { %1584 = vmatpush3.bf16.msra.mxu1 %v1763_v9  ;;  %1579 = vmatprep.subr.bf16.mxu0 %v1699_v0  ;;  %v1411_v21 = vld [vmem:[%s313_s16] ss:$0 sm:$0xff] }
  0x15   : > { %1585 = vmatprep.subr.bf16.mxu1 %v1699_v0 }
  0x17   : > { %1581 = vmatpush3.bf16.msra.mxu0 %v1580_v12 }
  0x18   : > { %1587 = vmatpush3.bf16.msra.mxu1 %v1765_v13  ;;  %1588 = vmatprep.subr.bf16.mxu0 %v1699_v0 }
  0x19   : > { %1594 = vmatprep.subr.bf16.mxu1 %v1699_v0 }
  0x1a   : > { %1486 = vmatmul.mubr.msk.f32.vlgmr.msra.gmra.mrb[0].mxu0 %vm336_vm1, %v324_v14 }
  0x1b   : > { %1497 = vmatmul.mubr.f32.vlgmr.msra.gmra.mrb[0].mxu1 %v1701_v1  ;;  %1590 = vmatpush3.bf16.msra.mxu0 %v1763_v9 }
  0x1c   : > { %1591 = vmatprep.subr.bf16.mxu0 %v1699_v0  ;;  %1507 = vmatprep.mubr.msk.f32.mxu0 %vm1700_vm0, %v1701_v1 }
  0x1d   : > { %1596 = vmatpush3.bf16.msra.mxu1 %v1763_v9  ;;  %1518 = vmatprep.mubr.msk.f32.mxu1 %vm1700_vm0, %v1701_v1 }
  0x1e   : > { %1597 = vmatprep.subr.bf16.mxu1 %v1699_v0 }
  0x1f   : > { %1593 = vmatpush3.bf16.msra.mxu0 %v1765_v13 }
  0x20   : > { %1600 = vmatprep.subr.bf16.mxu0 %v1699_v0 }
  0x21   : > { %1599 = vmatpush3.bf16.msra.mxu1 %v1765_v13 }
  0x22   : > { %1606 = vmatprep.subr.bf16.mxu1 %v1699_v0 }
  0xed   : > { %v406_v16 = vpop.f32.mrb[0].mxu0 }
  0xee   : > { %v484_v17 = vpop.f32.mrb[0].mxu1  ;;  %v1487_v18 = vpop.f32.mrb[1].mxu0  ;;  %v1804_v22 = vadd.f32 %v1411_v21, %v406_v16 }
  0xef   : > { %v485_v19 = vadd.f32 %v484_v17, %v1796_v15  ;;  %v1498_v20 = vpop.f32.mrb[1].mxu1 }
  0xf1   : > { %496 = vrot.lane.b32.xlu0 %v485_v19, %s1702_s13  ;;  %v488_v23 = vadd.f32 %v485_v19, %v1804_v22 }
  0xf3   : > { %v1413_v24 = vmul.f32 -1.442695, %v488_v23 }
  0xf5   : > { %1643 = vpow2.f32 %v1413_v24 }
  0xff   : > { %v1644_v25 = vpop.eup %1643 }
 0x100   : > { %v492_v26 = vadd.f32 1.0, %v1644_v25 }
 0x102   : > { %1645 = vrcp.f32 %v492_v26 }
 0x10c   : > { %v1646_v27 = vpop.eup %1645 }
 0x10d   : > { %v506_v33 = vsub.f32 1.0, %v1646_v27  ;;  %v512_v35 = vmul.f32 0.0, %v1646_v27 }
 0x163   : > { %v497_v28 = vpop.permute.xlu0 %496 }
 0x164   : > { %v499_v29 = vmul.f32 %v1646_v27, %v497_v28 }
 0x166   : > { %501 = vrot.lane.b32.xlu0 %v499_v29, %s1702_s13 }
 0x1d8   : > { %v502_v30 = vpop.permute.xlu0 %501 }
 0x1d9   : > { %v504_v31 = vadd.f32 %v502_v30, %v1804_v22 }
 0x1db   : > { %1647 = vtanh.f32 %v504_v31 }
 0x1e5   : > { %v1648_v32 = vpop.eup %1647 }
 0x1e6   : > { %508 = vrot.lane.b32.xlu1 %v1648_v32, %s1703_s17 }
 0x258   : > { %v509_v34 = vpop.permute.xlu1 %508 }
 0x259   : > { %v511_v36 = vmul.f32 %v509_v34, %v506_v33 }
 0x25b   : > { %v1810_v37 = vadd.f32 %v512_v35, %v511_v36 }
 0x25d   : > { %515 = vrot.lane.b32.xlu1 %v1810_v37, %s1703_s17  ;;  %v615_v54 = vrot.slane %v1810_v37, 7 }
 0x2cf   : > { %v516_v38 = vpop.permute.xlu1 %515 }
 0x2d0   : > { %1508 = vmatmul.mubr.msk.f32.vlgmr.msra.gmra.mrb[2].mxu0 %vm336_vm1, %v516_v38 }
 0x2d1   : > { %1602 = vmatpush3.bf16.msra.mxu0 %v1763_v9  ;;  %1529 = vmatprep.mubr.msk.f32.mxu0 %vm1700_vm0, %v1701_v1 }
 0x2d2   : > { %1603 = vmatprep.subr.bf16.mxu0 %v1699_v0 }
 0x2d5   : > { %1605 = vmatpush3.bf16.msra.mxu0 %v1765_v13 }
 0x2d6   : > { %1612 = vmatprep.subr.bf16.mxu0 %v1699_v0 }
 0x3a3   : > { %v585_v39 = vpop.f32.mrb[2].mxu0 }
 0x3a4   : > { %v586_v40 = vadd.f32 %v585_v39, %v1796_v15  ;;  %v1509_v41 = vpop.f32.mrb[3].mxu0 }
 0x3a6   : > { %v590_v42 = vrot.slane %v586_v40, 7 }
 0x3a8   : > { %599 = vrot.lane.b32.xlu0 %v590_v42, %s1702_s13  ;;  %v592_v43 = vadd.f32 %v590_v42, %v1804_v22 }
 0x3aa   : > { %v1415_v44 = vmul.f32 -1.442695, %v592_v43 }
 0x3ac   : > { %1649 = vpow2.f32 %v1415_v44 }
 0x3b6   : > { %v1650_v45 = vpop.eup %1649 }
 0x3b7   : > { %v596_v46 = vadd.f32 1.0, %v1650_v45 }
 0x3b9   : > { %1651 = vrcp.f32 %v596_v46 }
 0x3c3   : > { %v1652_v47 = vpop.eup %1651 }
 0x3c4   : > { %v609_v53 = vsub.f32 1.0, %v1652_v47  ;;  %v617_v56 = vmul.f32 %v1652_v47, %v615_v54 }
 0x41a   : > { %v600_v48 = vpop.permute.xlu0 %599 }
 0x41b   : > { %v602_v49 = vmul.f32 %v1652_v47, %v600_v48 }
 0x41d   : > { %604 = vrot.lane.b32.xlu1 %v602_v49, %s1702_s13 }
 0x48f   : > { %v605_v50 = vpop.permute.xlu1 %604 }
 0x490   : > { %v607_v51 = vadd.f32 %v605_v50, %v1804_v22 }
 0x492   : > { %1653 = vtanh.f32 %v607_v51 }
 0x49c   : > { %v1654_v52 = vpop.eup %1653 }
 0x49d   : > { %611 = vrot.lane.b32.xlu0 %v1654_v52, %s1703_s17 }
 0x50f   : > { %v612_v55 = vpop.permute.xlu0 %611 }
 0x510   : > { %v614_v57 = vmul.f32 %v612_v55, %v609_v53 }
 0x512   : > { %v618_v58 = vadd.f32 %v617_v56, %v614_v57 }
 0x514   : > { %v620_v59 = vrot.slane %v618_v58, 1  ;;  %v721_v17 = vrot.slane %v618_v58, 7  ;;  %v1256_v23 = vsel %vm1255_vm2, %v1810_v37, %v618_v58 }
 0x516   : > { %621 = vrot.lane.b32.xlu1 %v620_v59, %s1703_s17 }
 0x588   : > { %v622_v60 = vpop.permute.xlu1 %621 }
 0x589   : > { %1519 = vmatmul.mubr.msk.f32.vlgmr.msra.gmra.mrb[2].mxu1 %vm336_vm1, %v622_v60 }
 0x58a   : > { %1608 = vmatpush3.bf16.msra.mxu1 %v1763_v9  ;;  %1540 = vmatprep.mubr.msk.f32.mxu1 %vm1700_vm0, %v1701_v1 }
 0x58b   : > { %1609 = vmatprep.subr.bf16.mxu1 %v1699_v0 }
 0x58e   : > { %1611 = vmatpush3.bf16.msra.mxu1 %v1765_v13 }
 0x58f   : > { %1618 = vmatprep.subr.bf16.mxu1 %v1699_v0 }
 0x65c   : > { %v691_v61 = vpop.f32.mrb[2].mxu1 }
 0x65d   : > { %v692_v62 = vadd.f32 %v691_v61, %v1796_v15  ;;  %v1520_v63 = vpop.f32.mrb[3].mxu1 }
 0x65f   : > { %v696_v2 = vrot.slane %v692_v62, 6 }
 0x661   : > { %705 = vrot.lane.b32.xlu0 %v696_v2, %s1702_s13  ;;  %v698_v3 = vadd.f32 %v696_v2, %v1804_v22 }
 0x663   : > { %v1417_v4 = vmul.f32 -1.442695, %v698_v3 }
 0x665   : > { %1655 = vpow2.f32 %v1417_v4 }
 0x66f   : > { %v1656_v5 = vpop.eup %1655 }
 0x670   : > { %v702_v6 = vadd.f32 1.0, %v1656_v5 }
 0x672   : > { %1657 = vrcp.f32 %v702_v6 }
 0x67c   : > { %v1658_v7 = vpop.eup %1657 }
 0x67d   : > { %v715_v16 = vsub.f32 1.0, %v1658_v7  ;;  %v723_v19 = vmul.f32 %v1658_v7, %v721_v17 }
 0x6d3   : > { %v706_v8 = vpop.permute.xlu0 %705 }
 0x6d4   : > { %v708_v10 = vmul.f32 %v1658_v7, %v706_v8 }
 0x6d6   : > { %710 = vrot.lane.b32.xlu1 %v708_v10, %s1702_s13 }
 0x748   : > { %v711_v11 = vpop.permute.xlu1 %710 }
 0x749   : > { %v713_v12 = vadd.f32 %v711_v11, %v1804_v22 }
 0x74b   : > { %1659 = vtanh.f32 %v713_v12 }
 0x755   : > { %v1660_v14 = vpop.eup %1659 }
 0x756   : > { %717 = vrot.lane.b32.xlu0 %v1660_v14, %s1703_s17 }
 0x7c8   : > { %v718_v18 = vpop.permute.xlu0 %717 }
 0x7c9   : > { %v720_v20 = vmul.f32 %v718_v18, %v715_v16 }
 0x7cb   : > { %v724_v21 = vadd.f32 %v723_v19, %v720_v20 }
 0x7cd   : > { %v1258_v24 = vsel %vm1257_vm3, %v1256_v23, %v724_v21  ;;  %v726_v25 = vrot.slane %v724_v21, 2  ;;  %v827_v42 = vrot.slane %v724_v21, 7 }
 0x7cf   : > { %727 = vrot.lane.b32.xlu1 %v726_v25, %s1703_s17 }
 0x841   : > { %v728_v26 = vpop.permute.xlu1 %727 }
 0x842   : > { %1530 = vmatmul.mubr.msk.f32.vlgmr.msra.gmra.mrb[4].mxu0 %vm336_vm1, %v728_v26 }
 0x843   : > { %1614 = vmatpush3.bf16.msra.mxu0 %v1763_v9  ;;  %1551 = vmatprep.mubr.msk.f32.mxu0 %vm1700_vm0, %v1701_v1 }
 0x844   : > { %1615 = vmatprep.subr.bf16.mxu0 %v1699_v0 }
 0x847   : > { %1617 = vmatpush3.bf16.msra.mxu0 %v1765_v13 }
 0x848   : > { %1624 = vmatprep.subr.bf16.mxu0 %v1699_v0 }
 0x915   : > { %v797_v27 = vpop.f32.mrb[4].mxu0 }
 0x916   : > { %v798_v28 = vadd.f32 %v797_v27, %v1796_v15  ;;  %v1531_v29 = vpop.f32.mrb[5].mxu0 }
 0x918   : > { %v802_v30 = vrot.slane %v798_v28, 5 }
 0x91a   : > { %811 = vrot.lane.b32.xlu0 %v802_v30, %s1702_s13  ;;  %v804_v31 = vadd.f32 %v802_v30, %v1804_v22 }
 0x91c   : > { %v1419_v32 = vmul.f32 -1.442695, %v804_v31 }
 0x91e   : > { %1661 = vpow2.f32 %v1419_v32 }
 0x928   : > { %v1662_v33 = vpop.eup %1661 }
 0x929   : > { %v808_v34 = vadd.f32 1.0, %v1662_v33 }
 0x92b   : > { %1663 = vrcp.f32 %v808_v34 }
 0x935   : > { %v1664_v35 = vpop.eup %1663 }
 0x936   : > { %v821_v41 = vsub.f32 1.0, %v1664_v35  ;;  %v829_v44 = vmul.f32 %v1664_v35, %v827_v42 }
 0x98c   : > { %v812_v36 = vpop.permute.xlu0 %811 }
 0x98d   : > { %v814_v37 = vmul.f32 %v1664_v35, %v812_v36 }
 0x98f   : > { %816 = vrot.lane.b32.xlu1 %v814_v37, %s1702_s13 }
 0xa01   : > { %v817_v38 = vpop.permute.xlu1 %816 }
 0xa02   : > { %v819_v39 = vadd.f32 %v817_v38, %v1804_v22 }
 0xa04   : > { %1665 = vtanh.f32 %v819_v39 }
 0xa0e   : > { %v1666_v40 = vpop.eup %1665 }
 0xa0f   : > { %823 = vrot.lane.b32.xlu0 %v1666_v40, %s1703_s17 }
 0xa81   : > { %v824_v43 = vpop.permute.xlu0 %823 }
 0xa82   : > { %v826_v45 = vmul.f32 %v824_v43, %v821_v41 }
 0xa84   : > { %v830_v46 = vadd.f32 %v829_v44, %v826_v45 }
 0xa86   : > { %v1260_v47 = vsel %vm1259_vm4, %v1258_v24, %v830_v46  ;;  %v832_v48 = vrot.slane %v830_v46, 3  ;;  %v933_v3 = vrot.slane %v830_v46, 7 }
 0xa88   : > { %833 = vrot.lane.b32.xlu1 %v832_v48, %s1703_s17 }
 0xafa   : > { %v834_v49 = vpop.permute.xlu1 %833 }
 0xafb   : > { %1541 = vmatmul.mubr.msk.f32.vlgmr.msra.gmra.mrb[4].mxu1 %vm336_vm1, %v834_v49 }
 0xafc   : > { %1620 = vmatpush3.bf16.msra.mxu1 %v1763_v9  ;;  %1562 = vmatprep.mubr.msk.f32.mxu1 %vm1700_vm0, %v1701_v1 }
 0xafd   : > { %1621 = vmatprep.subr.bf16.mxu1 %v1699_v0 }
 0xb00   : > { %1623 = vmatpush3.bf16.msra.mxu1 %v1765_v13 }
 0xbce   : > { %v903_v50 = vpop.f32.mrb[4].mxu1 }
 0xbcf   : > { %v904_v51 = vadd.f32 %v903_v50, %v1796_v15  ;;  %v1542_v52 = vpop.f32.mrb[5].mxu1 }
 0xbd1   : > { %v908_v53 = vrot.slane %v904_v51, 4 }
 0xbd3   : > { %917 = vrot.lane.b32.xlu0 %v908_v53, %s1702_s13  ;;  %v910_v54 = vadd.f32 %v908_v53, %v1804_v22 }
 0xbd5   : > { %v1421_v55 = vmul.f32 -1.442695, %v910_v54 }
 0xbd7   : > { %1667 = vpow2.f32 %v1421_v55 }
 0xbe1   : > { %v1668_v56 = vpop.eup %1667 }
 0xbe2   : > { %v914_v57 = vadd.f32 1.0, %v1668_v56 }
 0xbe4   : > { %1669 = vrcp.f32 %v914_v57 }
 0xbee   : > { %v1670_v58 = vpop.eup %1669 }
 0xbef   : > { %v927_v2 = vsub.f32 1.0, %v1670_v58  ;;  %v935_v5 = vmul.f32 %v1670_v58, %v933_v3 }
 0xc45   : > { %v918_v59 = vpop.permute.xlu0 %917 }
 0xc46   : > { %v920_v60 = vmul.f32 %v1670_v58, %v918_v59 }
 0xc48   : > { %922 = vrot.lane.b32.xlu1 %v920_v60, %s1702_s13 }
 0xcba   : > { %v923_v61 = vpop.permute.xlu1 %922 }
 0xcbb   : > { %v925_v62 = vadd.f32 %v923_v61, %v1804_v22 }
 0xcbd   : > { %1671 = vtanh.f32 %v925_v62 }
 0xcc7   : > { %v1672_v63 = vpop.eup %1671 }
 0xcc8   : > { %929 = vrot.lane.b32.xlu0 %v1672_v63, %s1703_s17 }
 0xd3a   : > { %v930_v4 = vpop.permute.xlu0 %929 }
 0xd3b   : > { %v932_v6 = vmul.f32 %v930_v4, %v927_v2 }
 0xd3d   : > { %v936_v7 = vadd.f32 %v935_v5, %v932_v6 }
 0xd3f   : > { %v1262_v8 = vsel %vm1261_vm5, %v1260_v47, %v936_v7  ;;  %v938_v10 = vrot.slane %v936_v7, 4  ;;  %v1039_v26 = vrot.slane %v936_v7, 7 }
 0xd41   : > { %939 = vrot.lane.b32.xlu1 %v938_v10, %s1703_s17 }
 0xdb3   : > { %v940_v11 = vpop.permute.xlu1 %939 }
 0xdb4   : > { %1552 = vmatmul.mubr.msk.f32.vlgmr.msra.gmra.mrb[6].mxu0 %vm336_vm1, %v940_v11 }
 0xdb5   : > { %1626 = vmatpush3.bf16.msra.mxu0 %v1763_v9  ;;  %1573 = vmatprep.mubr.msk.f32.mxu0 %vm1700_vm0, %v1701_v1 }
 0xdb6   : > { %1627 = vmatprep.subr.bf16.mxu0 %v1699_v0 }
 0xdb9   : > { %1629 = vmatpush3.bf16.msra.mxu0 %v1765_v13 }
 0xe87   : > { %v1009_v12 = vpop.f32.mrb[6].mxu0 }
 0xe88   : > { %v1010_v14 = vadd.f32 %v1009_v12, %v1796_v15  ;;  %v1553_v16 = vpop.f32.mrb[7].mxu0 }
 0xe8a   : > { %v1014_v17 = vrot.slane %v1010_v14, 3 }
 0xe8c   : > { %1023 = vrot.lane.b32.xlu0 %v1014_v17, %s1702_s13  ;;  %v1016_v18 = vadd.f32 %v1014_v17, %v1804_v22 }
 0xe8e   : > { %v1423_v19 = vmul.f32 -1.442695, %v1016_v18 }
 0xe90   : > { %1673 = vpow2.f32 %v1423_v19 }
 0xe9a   : > { %v1674_v20 = vpop.eup %1673 }
 0xe9b   : > { %v1020_v9 = vadd.f32 1.0, %v1674_v20 }
 0xe9d   : > { %1675 = vrcp.f32 %v1020_v9 }
 0xea7   : > { %v1676_v21 = vpop.eup %1675 }
 0xea8   : > { %v1033_v25 = vsub.f32 1.0, %v1676_v21  ;;  %v1041_v28 = vmul.f32 %v1676_v21, %v1039_v26 }
 0xefe   : > { %v1024_v1 = vpop.permute.xlu0 %1023 }
 0xeff   : > { %v1026_v23 = vmul.f32 %v1676_v21, %v1024_v1 }
 0xf01   : > { %1028 = vrot.lane.b32.xlu1 %v1026_v23, %s1702_s13 }
 0xf73   : > { %v1029_v0 = vpop.permute.xlu1 %1028 }
 0xf74   : > { %v1031_v13 = vadd.f32 %v1029_v0, %v1804_v22 }
 0xf76   : > { %1677 = vtanh.f32 %v1031_v13 }
 0xf80   : > { %v1678_v24 = vpop.eup %1677 }
 0xf81   : > { %1035 = vrot.lane.b32.xlu0 %v1678_v24, %s1703_s17 }
 0xff3   : > { %v1036_v27 = vpop.permute.xlu0 %1035 }
 0xff4   : > { %v1038_v29 = vmul.f32 %v1036_v27, %v1033_v25 }
 0xff6   : > { %v1042_v30 = vadd.f32 %v1041_v28, %v1038_v29 }
 0xff8   : > { %v1044_v31 = vrot.slane %v1042_v30, 5  ;;  %v1264_v32 = vsel %vm1263_vm6, %v1262_v8, %v1042_v30  ;;  %v1145_v49 = vrot.slane %v1042_v30, 7 }
 0xffa   : > { %1045 = vrot.lane.b32.xlu1 %v1044_v31, %s1703_s17 }
0x106c   : > { %v1046_v33 = vpop.permute.xlu1 %1045 }
0x106d   : > { %1563 = vmatmul.mubr.msk.f32.vlgmr.msra.gmra.mrb[6].mxu1 %vm336_vm1, %v1046_v33 }
0x1140   : > { %v1115_v34 = vpop.f32.mrb[6].mxu1 }
0x1141   : > { %v1116_v35 = vadd.f32 %v1115_v34, %v1796_v15  ;;  %v1564_v36 = vpop.f32.mrb[7].mxu1 }
0x1143   : > { %v1120_v37 = vrot.slane %v1116_v35, 2 }
0x1145   : > { %1129 = vrot.lane.b32.xlu0 %v1120_v37, %s1702_s13  ;;  %v1122_v38 = vadd.f32 %v1120_v37, %v1804_v22 }
0x1147   : > { %v1425_v39 = vmul.f32 -1.442695, %v1122_v38 }
0x1149   : > { %1679 = vpow2.f32 %v1425_v39 }
0x1153   : > { %v1680_v40 = vpop.eup %1679 }
0x1154   : > { %v1126_v41 = vadd.f32 1.0, %v1680_v40 }
0x1156   : > { %1681 = vrcp.f32 %v1126_v41 }
0x1160   : > { %v1682_v42 = vpop.eup %1681 }
0x1161   : > { %v1139_v48 = vsub.f32 1.0, %v1682_v42  ;;  %v1147_v51 = vmul.f32 %v1682_v42, %v1145_v49 }
0x11b7   : > { %v1130_v43 = vpop.permute.xlu0 %1129 }
0x11b8   : > { %v1132_v44 = vmul.f32 %v1682_v42, %v1130_v43 }
0x11ba   : > { %1134 = vrot.lane.b32.xlu1 %v1132_v44, %s1702_s13 }
0x122c   : > { %v1135_v45 = vpop.permute.xlu1 %1134 }
0x122d   : > { %v1137_v46 = vadd.f32 %v1135_v45, %v1804_v22 }
0x122f   : > { %1683 = vtanh.f32 %v1137_v46 }
0x1239   : > { %v1684_v47 = vpop.eup %1683 }
0x123a   : > { %1141 = vrot.lane.b32.xlu0 %v1684_v47, %s1703_s17 }
0x12ac   : > { %v1142_v50 = vpop.permute.xlu0 %1141 }
0x12ad   : > { %v1144_v52 = vmul.f32 %v1142_v50, %v1139_v48 }
0x12af   : > { %v1148_v53 = vadd.f32 %v1147_v51, %v1144_v52 }
0x12b1   : > { %v1150_v54 = vrot.slane %v1148_v53, 6  ;;  %v1266_v55 = vsel %vm1265_vm7, %v1264_v32, %v1148_v53  ;;  %v1251_v10 = vrot.slane %v1148_v53, 7 }
0x12b3   : > { %1151 = vrot.lane.b32.xlu1 %v1150_v54, %s1703_s17 }
0x1325   : > { %v1152_v56 = vpop.permute.xlu1 %1151 }
0x1326   : > { %1574 = vmatmul.mubr.msk.f32.vlgmr.msra.gmra.mrb[8].mxu0 %vm336_vm1, %v1152_v56 }
0x13f9   : > { %v1221_v57 = vpop.f32.mrb[8].mxu0 }
0x13fa   : > { %v1222_v58 = vadd.f32 %v1221_v57, %v1796_v15  ;;  %v1575_v59 = vpop.f32.mrb[9].mxu0 }
0x13fc   : > { %v1226_v60 = vrot.slane %v1222_v58, 1 }
0x13fe   : > { %1235 = vrot.lane.b32.xlu0 %v1226_v60, %s1702_s13  ;;  %v1228_v61 = vadd.f32 %v1226_v60, %v1804_v22 }
0x1400   : > { %v1427_v62 = vmul.f32 -1.442695, %v1228_v61 }
0x1402   : > { %1685 = vpow2.f32 %v1427_v62 }
0x140c   : > { %v1686_v63 = vpop.eup %1685 }
0x140d   : > { %v1232_v2 = vadd.f32 1.0, %v1686_v63 }
0x140f   : > { %1687 = vrcp.f32 %v1232_v2 }
0x1419   : > { %v1688_v3 = vpop.eup %1687 }
0x141a   : > { %v1245_v8 = vsub.f32 1.0, %v1688_v3  ;;  %v1253_v12 = vmul.f32 %v1688_v3, %v1251_v10 }
0x1470   : > { %v1236_v4 = vpop.permute.xlu0 %1235 }
0x1471   : > { %v1238_v5 = vmul.f32 %v1688_v3, %v1236_v4 }
0x1473   : > { %1240 = vrot.lane.b32.xlu1 %v1238_v5, %s1702_s13 }
0x14e5   : > { %v1241_v6 = vpop.permute.xlu1 %1240 }
0x14e6   : > { %v1243_v15 = vadd.f32 %v1241_v6, %v1804_v22 }
0x14e8   : > { %1689 = vtanh.f32 %v1243_v15 }
0x14f2   : > { %v1690_v7 = vpop.eup %1689 }
0x14f3   : > { %1247 = vrot.lane.b32.xlu0 %v1690_v7, %s1703_s17 }
0x1565   : > { %v1248_v11 = vpop.permute.xlu0 %1247 }
0x1566   : > { %v1250_v14 = vmul.f32 %v1248_v11, %v1245_v8 }
0x1568   : > { %v1254_v16 = vadd.f32 %v1253_v12, %v1250_v14 }
0x156a   : > { %1275 = vrot.lane.b32.xlu0 %v1254_v16, %s1703_s17  ;;  %v1268_v17 = vsel %vm1267_vm8, %v1266_v55, %v1254_v16 }
0x156b   : > { %1270 = vrot.lane.b32.xlu1 %v1268_v17, %s1703_s17 }
0x15dc   : > { %v1276_v22 = vpop.permute.xlu0 %1275 }
0x15dd   : > { %1279 = vst.msk [vmem:[%s323_s20 - $0x7] sm:$0x80] %vm1278_vm9, %v1276_v22  ;;  %v1271_v18 = vpop.permute.xlu1 %1270 }
0x15de   : > { %1273 = vst.msk [vmem:[%s320_s25] sm:$0xff] %vm336_vm1, %v1271_v18 }
0x15df PF: > { %s17_s21 = sadd.s32 1, %s1697_s21  }
0x15e0   : > { %p14_p4 = scmp.ge.s32.totalorder %s17_s21, 4  }
0x15e2   :  { %16 = sbr.rel (!%p14_p4) target bundleno = 1 (0x1), region = 94 }

// kernel: greedy_search_decoder.3
= control target key start
LH: loop header
LB: loop body
LE: loop exit
PB: predicated region body
PF: predicated region fallthrough
CT: control target
= control target key end

     0   :  { %19 = vsyncpa [#allocation3], 0  ;;  %v5008_v3 = vmov 0.0|0.0   ;;  %vm5009_vm0 = vmmov 0   ;;  %v5010_v11 = vmov 0.0   ;;  %s5798_s0 = inlined_call_operand.vmem [shape: f32[32,32], index: 0, kind: input, shape index: {}]   ;;  %s5799_s1 = inlined_call_operand.vmem [shape: f32[8,32], index: 1, kind: input, shape index: {}]   ;;  %s5800_s2 = inlined_call_operand.vmem [shape: f32[1,32], index: 2, kind: input, shape index: {}]   ;;  %s5801_s3 = inlined_call_operand.vmem [shape: f32[32,96], index: 3, kind: input, shape index: {}]   ;;  %s5802_s4 = inlined_call_operand.vmem [shape: f32[32,96], index: 4, kind: input, shape index: {}]   ;;  %s5803_s5 = inlined_call_operand.vmem [shape: f32[1,96], index: 5, kind: input, shape index: {}]   ;;  %s5804_s6 = inlined_call_operand.vmem [shape: f32[1,96], index: 6, kind: input, shape index: {}]   ;;  %s5805_s7 = inlined_call_operand.vmem [shape: f32[32,32], index: 7, kind: input, shape index: {}]   ;;  %s5806_s8 = inlined_call_operand.vmem [shape: f32[32,32], index: 8, kind: input, shape index: {}]   ;;  %s5807_s9 = inlined_call_operand.vmem [shape: f32[1,32], index: 9, kind: input, shape index: {}]   ;;  %s5808_s10 = inlined_call_operand.vmem [shape: f32[32,32], index: 10, kind: input, shape index: {}]   ;;  %s5809_s11 = inlined_call_operand.vmem [shape: f32[1,32], index: 11, kind: input, shape index: {}]   ;;  %s5810_s12 = inlined_call_operand.hbm [shape: s32[1,6], index: 12, kind: output, shape index: {0}]   ;;  %s5811_s13 = inlined_call_operand.hbm [shape: f32[1,6], index: 13, kind: output, shape index: {1}]  }
   0x1   :  { %v50_v0 = vld [vmem:[%s5801_s3] sm:$0xff]  ;;  %v51_v1 = vld [vmem:[%s5801_s3 + $0x8] sm:$0xff]  ;;  %4629 = vmatprep.subr.bf16.mxu0 %v5008_v3  ;;  %4635 = vmatprep.subr.bf16.mxu1 %v5008_v3  ;;  %v52_v6 = vld [vmem:[%s5801_s3 + $0x10] sm:$0xff] }
   0x2   :  { %v54_v2 = vld [vmem:[%s5802_s4] sm:$0xff]  ;;  %v5097_v4 = vpack.c.bf16 %v51_v1, %v50_v0  ;;  %v55_v5 = vld [vmem:[%s5802_s4 + $0x8] sm:$0xff]  ;;  %v53_v7 = vld [vmem:[%s5801_s3 + $0x18] sm:$0xff]  ;;  %4192 = vmatprep.mubr.msk.f32.mxu0 %vm5009_vm0, %v5010_v11  ;;  %4203 = vmatprep.mubr.msk.f32.mxu1 %vm5009_vm0, %v5010_v11 }
   0x3   :  { %v5108_v8 = vpack.c.bf16 %v55_v5, %v54_v2  ;;  %v56_v9 = vld [vmem:[%s5802_s4 + $0x10] sm:$0xff]  ;;  %v57_v10 = vld [vmem:[%s5802_s4 + $0x18] sm:$0xff]  ;;  %v5121_v12 = vpack.c.bf16 %v53_v7, %v52_v6  ;;  %v5126_v13 = vld [vmem:[%s5798_s0] sm:$0xff] }
   0x4   :  { %4631 = vmatpush3.bf16.msra.mxu0 %v5097_v4  ;;  %v5130_v14 = vpack.c.bf16 %v57_v10, %v56_v9 }
   0x5   :  { %4637 = vmatpush3.bf16.msra.mxu1 %v5108_v8  ;;  %4632 = vmatprep.subr.bf16.mxu0 %v5008_v3 }
   0x6   :  { %20 = vsyncpa [#allocation5], 0  ;;  %4638 = vmatprep.subr.bf16.mxu1 %v5008_v3  ;;  %v79_v15 = vrot.slane %v5126_v13, 1  ;;  %vm80_vm1 = vcmask 261120   ;;  %v74_v16 = vld [vmem:[%s5800_s2] sm:$0x1]  ;;  %v75_v34 = vlaneseq }
   0x7   :  { %v5150_v17 = vld [vmem:[%s5804_s6] sm:$0x1]  ;;  %s5011_s2 = smov 64   ;;  %s5012_s15 = smov 96   ;;  %vm337_vm2 = vcmask 57344   ;;  %v65_v56 = vld [vmem:[%s5806_s8 + $0x8] sm:$0xff] }
   0x8   :  { %4634 = vmatpush3.bf16.msra.mxu0 %v5121_v12  ;;  %v5157_v23 = vld [vmem:[%s5803_s5] sm:$0x1]  ;;  %v251_v35 = vshrl.u32 %v75_v34, 7  ;;  %s5013_s16 = smov 32   ;;  %v66_v57 = vld [vmem:[%s5806_s8 + $0x10] sm:$0xff]  ;;  %v67_v59 = vld [vmem:[%s5806_s8 + $0x18] sm:$0xff] }
   0x9   :  { %4640 = vmatpush3.bf16.msra.mxu1 %v5130_v14  ;;  %4641 = vmatprep.subr.bf16.mxu0 %v5008_v3  ;;  %v5165_v36 = vld [vmem:[%s5799_s1] sm:$0xff]  ;;  %v5200_v60 = vpack.c.bf16 %v67_v59, %v66_v57  ;;  %v61_v63 = vld [vmem:[%s5805_s7 + $0x8] sm:$0xff]  ;;  %vm349_vm3 = vcmask 64512   ;;  %v62_v5 = vld [vmem:[%s5805_s7 + $0x10] sm:$0xff]  ;;  %vm641_vm4 = vcmask 253952  }
   0xa   :  { %4206 = vmatprep.subr.mxu1 %v5010_v11  ;;  %v252_v37 = vsub.s32 0, %v251_v35  ;;  %v64_v55 = vld [vmem:[%s5806_s8] sm:$0xff]  ;;  %v63_v6 = vld [vmem:[%s5805_s7 + $0x18] sm:$0xff]  ;;  %v46_v9 = vld [vmem:[%s5798_s0 + $0x8] sm:$0xff] }
   0xb   :  { %4193 = vmatmul.mubr.msk.f32.vlgmr.msra.gmra.mrb[0].mxu0 %vm80_vm1, %v79_v15  ;;  %v5194_v58 = vpack.c.bf16 %v65_v56, %v64_v55  ;;  %v60_v62 = vld [vmem:[%s5805_s7] sm:$0xff]  ;;  %v5221_v7 = vpack.c.bf16 %v63_v6, %v62_v5  ;;  %v5230_v10 = vpack.c.bf16 %v46_v9, %v5126_v13 }
   0xc   :  { %4204 = vmatmul.mubr.msk.f32.vlgmr.msra.gmra.mrb[0].mxu1 %vm80_vm1, %v74_v16  ;;  %4224 = vmatprep.mubr.msk.f32.mxu0 %vm5009_vm0, %v5010_v11  ;;  %v253_v39 = vrot.slane %v74_v16, %v252_v37  ;;  %v5211_v1 = vpack.c.bf16 %v61_v63, %v60_v62 }
   0xd   :  { %4208 = vmatprep.mubr.msk.f32.mxu1 %vm5009_vm0, %v5010_v11  ;;  %4643 = vmatpush3.bf16.msra.mxu0 %v5194_v58 }
   0xe   :  { %4644 = vmatprep.subr.bf16.mxu0 %v5008_v3 }
  0x11   :  { %4646 = vmatpush3.bf16.msra.mxu0 %v5200_v60 }
  0x12   :  { %4207 = vmatpush3.xpose.msk.msra.mxu1 %vm80_vm1, %v5165_v36  ;;  %4653 = vmatprep.subr.bf16.mxu0 %v5008_v3 }
  0x13   :  { %4211 = vmatprep.subr.mxu1 %v5010_v11 }
  0xde   :  { %v149_v18 = vpop.f32.mrb[0].mxu0 }
  0xdf   :  { %v222_v19 = vpop.f32.mrb[0].mxu1  ;;  %v4194_v20 = vpop.f32.mrb[1].mxu0  ;;  %v150_v24 = vadd.f32 %v149_v18, %v5157_v23 }
  0xe0   :  { %v223_v21 = vadd.f32 %v222_v19, %v5150_v17  ;;  %v4205_v22 = vpop.f32.mrb[1].mxu1  ;;  %v69_v19 = vld [vmem:[%s5808_s10] sm:$0xff]  ;;  %v70_v20 = vld [vmem:[%s5808_s10 + $0x8] sm:$0xff] }
  0xe1   :  { %v5252_v22 = vpack.c.bf16 %v70_v20, %v69_v19 }
  0xe2   :  { %234 = vrot.lane.b32.xlu0 %v223_v21, %s5011_s2  ;;  %v226_v25 = vadd.f32 %v223_v21, %v150_v24  ;;  %v71_v21 = vld [vmem:[%s5808_s10 + $0x10] sm:$0xff] }
  0xe4   :  { %v3923_v26 = vmul.f32 -1.442695, %v226_v25 }
  0xe6   :  { %4859 = vpow2.f32 %v3923_v26  ;;  %v5266_v26 = vld [vmem:[%s5807_s9] sm:$0x1] }
  0xf0   :  { %v4860_v27 = vpop.eup %4859 }
  0xf1   :  { %v230_v28 = vadd.f32 1.0, %v4860_v27 }
  0xf3   :  { %4861 = vrcp.f32 %v230_v28 }
  0xfd   :  { %v4862_v29 = vpop.eup %4861 }
  0xfe   :  { %v244_v41 = vsub.f32 1.0, %v4862_v29 }
 0x154   :  { %v235_v30 = vpop.permute.xlu0 %234 }
 0x155   :  { %v237_v31 = vmul.f32 %v4862_v29, %v235_v30 }
 0x157   :  { %239 = vrot.lane.b32.xlu0 %v237_v31, %s5011_s2 }
 0x1c9   :  { %v240_v32 = vpop.permute.xlu0 %239 }
 0x1ca   :  { %v242_v33 = vadd.f32 %v240_v32, %v150_v24  ;;  %v72_v24 = vld [vmem:[%s5808_s10 + $0x18] sm:$0xff]  ;;  %v5279_v32 = vld [vmem:[%s5809_s11] sm:$0x1] }
 0x1cb   :  { %v5258_v25 = vpack.c.bf16 %v72_v24, %v71_v21 }
 0x1cc   :  { %4863 = vtanh.f32 %v242_v33 }
 0x1d6   :  { %v4864_v38 = vpop.eup %4863 }
 0x1d7   :  { %246 = vrot.lane.b32.xlu1 %v4864_v38, %s5012_s15 }
 0x1db   :  { %254 = vrot.lane.b32.xlu1 %v253_v39, %s5013_s16 }
 0x249   :  { %v247_v40 = vpop.permute.xlu1 %246 }
 0x24a   :  { %v249_v43 = vmul.f32 %v247_v40, %v244_v41 }
 0x24d   :  { %v255_v42 = vpop.permute.xlu1 %254 }
 0x24e   :  { %v257_v44 = vmul.f32 %v4862_v29, %v255_v42 }
 0x250   :  { %v5171_v45 = vadd.f32 %v257_v44, %v249_v43 }
 0x252   :  { %260 = vrot.lane.b32.xlu0 %v5171_v45, %s5012_s15 }
 0x2c4   :  { %v5175_v46 = vpop.permute.xlu0 %260 }
 0x2c5   :  { %4209 = vmatmul.mubr.msk.f32.vlgmr.msra.gmra.mrb[2].mxu1 %vm80_vm1, %v5175_v46 }
 0x2c6   :  { %4212 = vmatpush3.msra.mxu1 %v5165_v36  ;;  %4213 = vmatprep.mubr.msk.f32.mxu1 %vm5009_vm0, %v5010_v11 }
 0x2c7   :  { %4647 = vmatprep.subr.bf16.mxu1 %v5008_v3 }
 0x398   :  { %v333_v47 = vpop.f32.mrb[2].mxu1 }
 0x399   :  { %v4210_v48 = vpop.f32.mrb[3].mxu1  ;;  %v338_v49 = vsel %vm337_vm2, %v333_v47, -inf }
 0x39a   :  { %339 = vmax.xlane.f32.xlu1 %v338_v49 }
 0x427   :  { %v340_v50 = vpop.xlane.xlu1 %339 }
 0x428   :  { %v341_v51 = vsub.f32 %v333_v47, %v340_v50  ;;  %v47_v50 = vld [vmem:[%s5798_s0 + $0x10] sm:$0xff] }
 0x42a   :  { %v342_v52 = vmul.f32 1.442695, %v341_v51  ;;  %v48_v51 = vld [vmem:[%s5798_s0 + $0x18] sm:$0xff] }
 0x42c   :  { %4865 = vpow2.f32 %v342_v52  ;;  %v5291_v52 = vpack.c.bf16 %v48_v51, %v47_v50 }
 0x436   :  { %v4866_v53 = vpop.eup %4865 }
 0x437   :  { %v344_v54 = vsel %vm337_vm2, %v4866_v53, 0.0 }
 0x438   :  { %345 = vadd.xlane.f32.xlu0 %v344_v54 }
 0x4c5   :  { %v346_v61 = vpop.xlane.xlu0 %345 }
 0x4c6   :  { %4867 = vrcp.f32 %v346_v61 }
 0x4d0   :  { %v4868_v0 = vpop.eup %4867 }
 0x4d1   :  { %v348_v2 = vmul.f32 %v4868_v0, %v4866_v53  ;;  %v5296_v53 = vand.u32 127, %v75_v34 }
 0x4d3   :  { %4214 = vmatmul.mubr.msk.f32.vlgmr.msra.gmra.mrb[4].mxu1 %vm349_vm3, %v348_v2  ;;  %v5299_v54 = vcvt.s32.f32 %v5296_v53  ;;  %vm661_vm15 = vcmp.eq.s32.totalorder %v5296_v53, 0 }
 0x4d4   :  { %4649 = vmatpush3.bf16.msra.mxu1 %v5211_v1  ;;  %4235 = vmatprep.mubr.msk.f32.mxu1 %vm5009_vm0, %v5010_v11 }
 0x4d5   :  { %4650 = vmatprep.subr.bf16.mxu1 %v5008_v3 }
 0x4d8   :  { %4652 = vmatpush3.bf16.msra.mxu1 %v5221_v7 }
 0x4d9   :  { %4659 = vmatprep.subr.bf16.mxu1 %v5008_v3 }
 0x4db   :  { %4236 = vmatmul.mubr.msk.f32.vlgmr.msra.gmra.mrb[6].mxu1 %vm80_vm1, %v5175_v46 }
 0x4dc   :  { %4661 = vmatpush3.bf16.msra.mxu1 %v5230_v10  ;;  %4257 = vmatprep.mubr.msk.f32.mxu1 %vm5009_vm0, %v5010_v11 }
 0x4dd   :  { %4662 = vmatprep.subr.bf16.mxu1 %v5008_v3 }
 0x4e0   :  { %4664 = vmatpush3.bf16.msra.mxu1 %v5291_v52 }
 0x4e1   :  { %4671 = vmatprep.subr.bf16.mxu1 %v5008_v3 }
 0x5a6   :  { %v419_v15 = vpop.f32.mrb[4].mxu1 }
 0x5a7   :  { %v4215_v16 = vpop.f32.mrb[5].mxu1  ;;  %4225 = vmatmul.mubr.msk.f32.vlgmr.msra.gmra.mrb[2].mxu0 %vm80_vm1, %v419_v15 }
 0x5a8   :  { %4246 = vmatprep.mubr.msk.f32.mxu0 %vm5009_vm0, %v5010_v11  ;;  %4655 = vmatpush3.bf16.msra.mxu0 %v5252_v22 }
 0x5a9   :  { %4656 = vmatprep.subr.bf16.mxu0 %v5008_v3 }
 0x5ac   :  { %4658 = vmatpush3.bf16.msra.mxu0 %v5258_v25 }
 0x5ad   :  { %4665 = vmatprep.subr.bf16.mxu0 %v5008_v3 }
 0x5ae   :  { %v562_v13 = vpop.f32.mrb[6].mxu1 }
 0x5af   :  { %v4237_v18 = vpop.f32.mrb[7].mxu1 }
 0x67a   :  { %v492_v27 = vpop.f32.mrb[2].mxu0 }
 0x67b   :  { %v563_v28 = vadd.f32 %v562_v13, %v492_v27  ;;  %v4226_v29 = vpop.f32.mrb[3].mxu0 }
 0x67d   :  { %v566_v30 = vadd.f32 %v563_v28, %v5266_v26 }
 0x67f   :  { %4869 = vtanh.f32 %v566_v30 }
 0x689   :  { %v4870_v31 = vpop.eup %4869 }
 0x68a   :  { %4247 = vmatmul.mubr.msk.f32.vlgmr.msra.gmra.mrb[4].mxu0 %vm80_vm1, %v4870_v31 }
 0x68b   :  { %4667 = vmatpush3.bf16.msra.mxu0 %v5097_v4  ;;  %4268 = vmatprep.mubr.msk.f32.mxu0 %vm5009_vm0, %v5010_v11 }
 0x68c   :  { %4668 = vmatprep.subr.bf16.mxu0 %v5008_v3 }
 0x68f   :  { %4670 = vmatpush3.bf16.msra.mxu0 %v5121_v12 }
 0x690   :  { %4282 = vmatprep.subr.mxu0 %v5010_v11 }
 0x75d   :  { %v637_v33 = vpop.f32.mrb[4].mxu0 }
 0x75e   :  { %v638_v35 = vadd.f32 %v637_v33, %v5279_v32  ;;  %v4248_v37 = vpop.f32.mrb[5].mxu0 }
 0x760   :  { %v642_v38 = vsel %vm641_vm4, %v638_v35, -inf }
 0x761   :  { %643 = vmax.xlane.f32.xlu0 %v642_v38 }
 0x7ee   :  { %v644_v39 = vpop.xlane.xlu0 %643 }
 0x7ef   :  { %v645_v40 = vsub.f32 %v638_v35, %v644_v39 }
 0x7f1   :  { %v646_v41 = vmul.f32 1.442695, %v645_v40 }
 0x7f3   :  { %4871 = vpow2.f32 %v646_v41 }
 0x7fd   :  { %v4872_v42 = vpop.eup %4871 }
 0x7fe   :  { %v648_v43 = vsel %vm641_vm4, %v4872_v42, 0.0 }
 0x7ff   :  { %649 = vadd.xlane.f32.xlu1 %v648_v43 }
 0x88c   :  { %v650_v44 = vpop.xlane.xlu1 %649 }
 0x88d   :  { %4873 = vrcp.f32 %v650_v44 }
 0x897   :  { %v4874_v47 = vpop.eup %4873 }
 0x898   :  { %v652_v48 = vmul.f32 %v4874_v47, %v4872_v42 }
 0x89a   :  { %v653_v49 = vsel %vm641_vm4, %v652_v48, -inf }
 0x89b   :  { %654 = vmax.xlane.f32.xlu0 %v653_v49 }
 0x928   :  { %v5301_v55 = vpop.xlane.xlu0 %654 }
 0x929   :  { %vm656_vm5 = vcmp.eq.f32.partialorder %v652_v48, %v5301_v55 }
 0x92a   :  { %v657_v56 = vsel %vm656_vm5, %v5299_v54, 32.0  ;;  %vm3886_vm5 = vcmp.eq.s32.totalorder %v5296_v53, 5 }
 0x92b   :  { %v658_v57 = vsel %vm641_vm4, %v657_v56, inf }
 0x92c   :  { %659 = vmin.xlane.f32.xlu1 %v658_v57 }
 0x9b9   :  { %v5306_v59 = vpop.xlane.xlu1 %659 }
 0x9ba   :  { %vm665_vm6 = vcmp.eq.f32.partialorder %v5299_v54, %v5306_v59 }
 0x9bb   :  { %v3930_v34 = vsel %vm665_vm6, 1.0, %v5010_v11  ;;  %vm3890_vm6 = vcmask 40960  }
 0x9bc   :  { %4258 = vmatmul.mubr.msk.f32.vlgmr.msra.gmra.mrb[8].mxu1 %vm80_vm1, %v3930_v34 }
 0x9bd   :  { %4673 = vmatpush3.bf16.msra.mxu1 %v5108_v8  ;;  %4279 = vmatprep.mubr.msk.f32.mxu1 %vm5009_vm0, %v5010_v11 }
 0x9be   :  { %4674 = vmatprep.subr.bf16.mxu1 %v5008_v3 }
 0x9c1   :  { %4676 = vmatpush3.bf16.msra.mxu1 %v5130_v14 }
 0x9c2   :  { %4287 = vmatprep.subr.mxu1 %v5010_v11 }
 0x9c4   :  { %4280 = vmatmul.mubr.msk.f32.vlgmr.msra.gmra.mrb[10].mxu1 %vm80_vm1, %v5175_v46 }
 0x9c5   :  { %4288 = vmatpush3.msra.mxu1 %v5165_v36  ;;  %4289 = vmatprep.mubr.msk.f32.mxu1 %vm5009_vm0, %v5010_v11 }
 0x9c6   :  { %4683 = vmatprep.subr.bf16.mxu1 %v5008_v3 }
 0xa8f   :  { %v737_v61 = vpop.f32.mrb[8].mxu1 }
 0xa90   :  { %v4259_v62 = vpop.f32.mrb[9].mxu1  ;;  %4269 = vmatmul.mubr.msk.f32.vlgmr.msra.gmra.mrb[6].mxu0 %vm80_vm1, %v737_v61 }
 0xa91   :  { %4283 = vmatpush3.xpose.msk.msra.mxu0 %vm80_vm1, %v5165_v36  ;;  %4284 = vmatprep.mubr.msk.f32.mxu0 %vm5009_vm0, %v5010_v11 }
 0xa92   :  { %4677 = vmatprep.subr.bf16.mxu0 %v5008_v3 }
 0xa97   :  { %v880_v46 = vpop.f32.mrb[10].mxu1 }
 0xa98   :  { %v881_v63 = vadd.f32 %v880_v46, %v5150_v17  ;;  %v4281_v0 = vpop.f32.mrb[11].mxu1 }
 0xa9a   :  { %892 = vrot.lane.b32.xlu0 %v881_v63, %s5011_s2 }
 0xb0c   :  { %v893_v19 = vpop.permute.xlu0 %892 }
 0xb63   :  { %v810_v2 = vpop.f32.mrb[6].mxu0 }
 0xb64   :  { %v811_v5 = vadd.f32 %v810_v2, %v5157_v23  ;;  %v4270_v6 = vpop.f32.mrb[7].mxu0 }
 0xb66   :  { %v884_v9 = vadd.f32 %v881_v63, %v811_v5 }
 0xb68   :  { %v3934_v15 = vmul.f32 -1.442695, %v884_v9 }
 0xb6a   :  { %4875 = vpow2.f32 %v3934_v15 }
 0xb74   :  { %v4876_v16 = vpop.eup %4875 }
 0xb75   :  { %v888_v13 = vadd.f32 1.0, %v4876_v16 }
 0xb77   :  { %4877 = vrcp.f32 %v888_v13 }
 0xb81   :  { %v4878_v18 = vpop.eup %4877 }
 0xb82   :  { %v895_v20 = vmul.f32 %v4878_v18, %v893_v19  ;;  %v902_v28 = vsub.f32 1.0, %v4878_v18  ;;  %v908_v30 = vmul.f32 %v4878_v18, %v5171_v45 }
 0xb84   :  { %897 = vrot.lane.b32.xlu1 %v895_v20, %s5011_s2 }
 0xbf6   :  { %v898_v21 = vpop.permute.xlu1 %897 }
 0xbf7   :  { %v900_v24 = vadd.f32 %v898_v21, %v811_v5 }
 0xbf9   :  { %4879 = vtanh.f32 %v900_v24 }
 0xc03   :  { %v4880_v27 = vpop.eup %4879 }
 0xc04   :  { %904 = vrot.lane.b32.xlu1 %v4880_v27, %s5012_s15 }
 0xc76   :  { %v905_v29 = vpop.permute.xlu1 %904 }
 0xc77   :  { %v907_v31 = vmul.f32 %v905_v29, %v902_v28 }
 0xc79   :  { %v5336_v33 = vadd.f32 %v908_v30, %v907_v31 }
 0xc7b   :  { %911 = vrot.lane.b32.xlu0 %v5336_v33, %s5012_s15 }
 0xced   :  { %v5340_v35 = vpop.permute.xlu0 %911 }
 0xcee   :  { %4285 = vmatmul.mubr.msk.f32.vlgmr.msra.gmra.mrb[8].mxu0 %vm80_vm1, %v5340_v35 }
 0xcef   :  { %4679 = vmatpush3.bf16.msra.mxu0 %v5194_v58  ;;  %4300 = vmatprep.mubr.msk.f32.mxu0 %vm5009_vm0, %v5010_v11 }
 0xcf0   :  { %4680 = vmatprep.subr.bf16.mxu0 %v5008_v3 }
 0xcf3   :  { %4682 = vmatpush3.bf16.msra.mxu0 %v5200_v60 }
 0xcf4   :  { %4689 = vmatprep.subr.bf16.mxu0 %v5008_v3 }
 0xdc1   :  { %v981_v45 = vpop.f32.mrb[8].mxu0 }
 0xdc2   :  { %v4286_v37 = vpop.f32.mrb[9].mxu0  ;;  %v985_v38 = vsel %vm337_vm2, %v981_v45, -inf }
 0xdc3   :  { %986 = vmax.xlane.f32.xlu1 %v985_v38 }
 0xe50   :  { %v987_v39 = vpop.xlane.xlu1 %986 }
 0xe51   :  { %v988_v40 = vsub.f32 %v981_v45, %v987_v39 }
 0xe53   :  { %v989_v41 = vmul.f32 1.442695, %v988_v40 }
 0xe55   :  { %4881 = vpow2.f32 %v989_v41 }
 0xe5f   :  { %v4882_v42 = vpop.eup %4881 }
 0xe60   :  { %v991_v43 = vsel %vm337_vm2, %v4882_v42, 0.0 }
 0xe61   :  { %992 = vadd.xlane.f32.xlu0 %v991_v43 }
 0xeee   :  { %v993_v44 = vpop.xlane.xlu0 %992 }
 0xeef   :  { %4883 = vrcp.f32 %v993_v44 }
 0xef9   :  { %v4884_v47 = vpop.eup %4883 }
 0xefa   :  { %v995_v48 = vmul.f32 %v4884_v47, %v4882_v42 }
 0xefc   :  { %4290 = vmatmul.mubr.msk.f32.vlgmr.msra.gmra.mrb[12].mxu1 %vm349_vm3, %v995_v48 }
 0xefd   :  { %4685 = vmatpush3.bf16.msra.mxu1 %v5211_v1  ;;  %4311 = vmatprep.mubr.msk.f32.mxu1 %vm5009_vm0, %v5010_v11 }
 0xefe   :  { %4686 = vmatprep.subr.bf16.mxu1 %v5008_v3 }
 0xf01   :  { %4688 = vmatpush3.bf16.msra.mxu1 %v5221_v7 }
 0xf02   :  { %4695 = vmatprep.subr.bf16.mxu1 %v5008_v3 }
 0xf04   :  { %4312 = vmatmul.mubr.msk.f32.vlgmr.msra.gmra.mrb[14].mxu1 %vm80_vm1, %v5340_v35 }
 0xf05   :  { %4697 = vmatpush3.bf16.msra.mxu1 %v5230_v10  ;;  %4333 = vmatprep.mubr.msk.f32.mxu1 %vm5009_vm0, %v5010_v11 }
 0xf06   :  { %4698 = vmatprep.subr.bf16.mxu1 %v5008_v3 }
 0xf09   :  { %4700 = vmatpush3.bf16.msra.mxu1 %v5291_v52 }
 0xf0a   :  { %4707 = vmatprep.subr.bf16.mxu1 %v5008_v3 }
 0xfcf   :  { %v1065_v49 = vpop.f32.mrb[12].mxu1 }
 0xfd0   :  { %v4291_v50 = vpop.f32.mrb[13].mxu1  ;;  %4301 = vmatmul.mubr.msk.f32.vlgmr.msra.gmra.mrb[10].mxu0 %vm80_vm1, %v1065_v49 }
 0xfd1   :  { %4691 = vmatpush3.bf16.msra.mxu0 %v5252_v22  ;;  %4322 = vmatprep.mubr.msk.f32.mxu0 %vm5009_vm0, %v5010_v11 }
 0xfd2   :  { %4692 = vmatprep.subr.bf16.mxu0 %v5008_v3 }
 0xfd5   :  { %4694 = vmatpush3.bf16.msra.mxu0 %v5258_v25 }
 0xfd6   :  { %4701 = vmatprep.subr.bf16.mxu0 %v5008_v3 }
 0xfd7   :  { %v1208_v51 = vpop.f32.mrb[14].mxu1 }
 0xfd8   :  { %v4313_v56 = vpop.f32.mrb[15].mxu1 }
0x10a3   :  { %v1138_v57 = vpop.f32.mrb[10].mxu0 }
0x10a4   :  { %v1209_v34 = vadd.f32 %v1208_v51, %v1138_v57  ;;  %v4302_v61 = vpop.f32.mrb[11].mxu0 }
0x10a6   :  { %v1212_v62 = vadd.f32 %v1209_v34, %v5266_v26 }
0x10a8   :  { %4885 = vtanh.f32 %v1212_v62 }
0x10b2   :  { %v4886_v46 = vpop.eup %4885 }
0x10b3   :  { %4323 = vmatmul.mubr.msk.f32.vlgmr.msra.gmra.mrb[12].mxu0 %vm80_vm1, %v4886_v46 }
0x10b4   :  { %4703 = vmatpush3.bf16.msra.mxu0 %v5097_v4  ;;  %4344 = vmatprep.mubr.msk.f32.mxu0 %vm5009_vm0, %v5010_v11 }
0x10b5   :  { %4704 = vmatprep.subr.bf16.mxu0 %v5008_v3 }
0x10b8   :  { %4706 = vmatpush3.bf16.msra.mxu0 %v5121_v12 }
0x10b9   :  { %4358 = vmatprep.subr.mxu0 %v5010_v11 }
0x1186   :  { %v1283_v63 = vpop.f32.mrb[12].mxu0 }
0x1187   :  { %v1284_v0 = vadd.f32 %v1283_v63, %v5279_v32  ;;  %v4324_v2 = vpop.f32.mrb[13].mxu0 }
0x1189   :  { %v1287_v5 = vsel %vm641_vm4, %v1284_v0, -inf }
0x118a   :  { %1288 = vmax.xlane.f32.xlu0 %v1287_v5 }
0x1217   :  { %v1289_v6 = vpop.xlane.xlu0 %1288 }
0x1218   :  { %v1290_v9 = vsub.f32 %v1284_v0, %v1289_v6 }
0x121a   :  { %v1291_v15 = vmul.f32 1.442695, %v1290_v9 }
0x121c   :  { %4887 = vpow2.f32 %v1291_v15 }
0x1226   :  { %v4888_v16 = vpop.eup %4887 }
0x1227   :  { %v1293_v13 = vsel %vm641_vm4, %v4888_v16, 0.0 }
0x1228   :  { %1294 = vadd.xlane.f32.xlu1 %v1293_v13 }
0x12b5   :  { %v1295_v18 = vpop.xlane.xlu1 %1294 }
0x12b6   :  { %4889 = vrcp.f32 %v1295_v18 }
0x12c0   :  { %v4890_v19 = vpop.eup %4889 }
0x12c1   :  { %v1297_v20 = vmul.f32 %v4890_v19, %v4888_v16 }
0x12c3   :  { %v1298_v21 = vsel %vm641_vm4, %v1297_v20, -inf }
0x12c4   :  { %1299 = vmax.xlane.f32.xlu0 %v1298_v21 }
0x1351   :  { %v5386_v24 = vpop.xlane.xlu0 %1299 }
0x1352   :  { %vm1301_vm7 = vcmp.eq.f32.partialorder %v1297_v20, %v5386_v24 }
0x1353   :  { %v1302_v27 = vsel %vm1301_vm7, %v5299_v54, 32.0 }
0x1354   :  { %v1303_v28 = vsel %vm641_vm4, %v1302_v27, inf }
0x1355   :  { %1304 = vmin.xlane.f32.xlu1 %v1303_v28 }
0x13e2   :  { %v5391_v29 = vpop.xlane.xlu1 %1304 }
0x13e3   :  { %vm1310_vm8 = vcmp.eq.f32.partialorder %v5299_v54, %v5391_v29 }
0x13e4   :  { %v3941_v30 = vsel %vm1310_vm8, 1.0, %v5010_v11 }
0x13e5   :  { %4334 = vmatmul.mubr.msk.f32.vlgmr.msra.gmra.mrb[16].mxu1 %vm80_vm1, %v3941_v30 }
0x13e6   :  { %4709 = vmatpush3.bf16.msra.mxu1 %v5108_v8  ;;  %4355 = vmatprep.mubr.msk.f32.mxu1 %vm5009_vm0, %v5010_v11 }
0x13e7   :  { %4710 = vmatprep.subr.bf16.mxu1 %v5008_v3 }
0x13ea   :  { %4712 = vmatpush3.bf16.msra.mxu1 %v5130_v14 }
0x13eb   :  { %4363 = vmatprep.subr.mxu1 %v5010_v11 }
0x13ed   :  { %4356 = vmatmul.mubr.msk.f32.vlgmr.msra.gmra.mrb[18].mxu1 %vm80_vm1, %v5340_v35 }
0x13ee   :  { %4364 = vmatpush3.msra.mxu1 %v5165_v36  ;;  %4365 = vmatprep.mubr.msk.f32.mxu1 %vm5009_vm0, %v5010_v11 }
0x13ef   :  { %4719 = vmatprep.subr.bf16.mxu1 %v5008_v3 }
0x14b8   :  { %v1382_v31 = vpop.f32.mrb[16].mxu1 }
0x14b9   :  { %v4335_v45 = vpop.f32.mrb[17].mxu1  ;;  %4345 = vmatmul.mubr.msk.f32.vlgmr.msra.gmra.mrb[14].mxu0 %vm80_vm1, %v1382_v31 }
0x14ba   :  { %4359 = vmatpush3.xpose.msk.msra.mxu0 %vm80_vm1, %v5165_v36  ;;  %4360 = vmatprep.mubr.msk.f32.mxu0 %vm5009_vm0, %v5010_v11 }
0x14bb   :  { %4713 = vmatprep.subr.bf16.mxu0 %v5008_v3 }
0x14c0   :  { %v1525_v35 = vpop.f32.mrb[18].mxu1 }
0x14c1   :  { %v1526_v37 = vadd.f32 %v1525_v35, %v5150_v17  ;;  %v4357_v38 = vpop.f32.mrb[19].mxu1 }
0x14c3   :  { %1537 = vrot.lane.b32.xlu0 %v1526_v37, %s5011_s2 }
0x1535   :  { %v1538_v49 = vpop.permute.xlu0 %1537 }
0x158c   :  { %v1455_v39 = vpop.f32.mrb[14].mxu0 }
0x158d   :  { %v1456_v40 = vadd.f32 %v1455_v39, %v5157_v23  ;;  %v4346_v41 = vpop.f32.mrb[15].mxu0 }
0x158f   :  { %v1529_v42 = vadd.f32 %v1526_v37, %v1456_v40 }
0x1591   :  { %v3945_v43 = vmul.f32 -1.442695, %v1529_v42 }
0x1593   :  { %4891 = vpow2.f32 %v3945_v43 }
0x159d   :  { %v4892_v44 = vpop.eup %4891 }
0x159e   :  { %v1533_v47 = vadd.f32 1.0, %v4892_v44 }
0x15a0   :  { %4893 = vrcp.f32 %v1533_v47 }
0x15aa   :  { %v4894_v48 = vpop.eup %4893 }
0x15ab   :  { %v1540_v50 = vmul.f32 %v4894_v48, %v1538_v49  ;;  %v1547_v34 = vsub.f32 1.0, %v4894_v48  ;;  %v1553_v62 = vmul.f32 %v4894_v48, %v5336_v33 }
0x15ad   :  { %1542 = vrot.lane.b32.xlu1 %v1540_v50, %s5011_s2 }
0x161f   :  { %v1543_v51 = vpop.permute.xlu1 %1542 }
0x1620   :  { %v1545_v56 = vadd.f32 %v1543_v51, %v1456_v40 }
0x1622   :  { %4895 = vtanh.f32 %v1545_v56 }
0x162c   :  { %v4896_v57 = vpop.eup %4895 }
0x162d   :  { %1549 = vrot.lane.b32.xlu1 %v4896_v57, %s5012_s15 }
0x169f   :  { %v1550_v61 = vpop.permute.xlu1 %1549 }
0x16a0   :  { %v1552_v46 = vmul.f32 %v1550_v61, %v1547_v34 }
0x16a2   :  { %v5421_v63 = vadd.f32 %v1553_v62, %v1552_v46 }
0x16a4   :  { %1556 = vrot.lane.b32.xlu0 %v5421_v63, %s5012_s15 }
0x1716   :  { %v5425_v0 = vpop.permute.xlu0 %1556 }
0x1717   :  { %4361 = vmatmul.mubr.msk.f32.vlgmr.msra.gmra.mrb[16].mxu0 %vm80_vm1, %v5425_v0 }
0x1718   :  { %4715 = vmatpush3.bf16.msra.mxu0 %v5194_v58  ;;  %4376 = vmatprep.mubr.msk.f32.mxu0 %vm5009_vm0, %v5010_v11 }
0x1719   :  { %4716 = vmatprep.subr.bf16.mxu0 %v5008_v3 }
0x171c   :  { %4718 = vmatpush3.bf16.msra.mxu0 %v5200_v60 }
0x171d   :  { %4725 = vmatprep.subr.bf16.mxu0 %v5008_v3 }
0x17ea   :  { %v1626_v33 = vpop.f32.mrb[16].mxu0 }
0x17eb   :  { %v4362_v2 = vpop.f32.mrb[17].mxu0  ;;  %v1630_v5 = vsel %vm337_vm2, %v1626_v33, -inf }
0x17ec   :  { %1631 = vmax.xlane.f32.xlu1 %v1630_v5 }
0x1879   :  { %v1632_v6 = vpop.xlane.xlu1 %1631 }
0x187a   :  { %v1633_v9 = vsub.f32 %v1626_v33, %v1632_v6 }
0x187c   :  { %v1634_v15 = vmul.f32 1.442695, %v1633_v9 }
0x187e   :  { %4897 = vpow2.f32 %v1634_v15 }
0x1888   :  { %v4898_v16 = vpop.eup %4897 }
0x1889   :  { %v1636_v13 = vsel %vm337_vm2, %v4898_v16, 0.0 }
0x188a   :  { %1637 = vadd.xlane.f32.xlu0 %v1636_v13 }
0x1917   :  { %v1638_v18 = vpop.xlane.xlu0 %1637 }
0x1918   :  { %4899 = vrcp.f32 %v1638_v18 }
0x1922   :  { %v4900_v19 = vpop.eup %4899 }
0x1923   :  { %v1640_v20 = vmul.f32 %v4900_v19, %v4898_v16 }
0x1925   :  { %4366 = vmatmul.mubr.msk.f32.vlgmr.msra.gmra.mrb[20].mxu1 %vm349_vm3, %v1640_v20 }
0x1926   :  { %4721 = vmatpush3.bf16.msra.mxu1 %v5211_v1  ;;  %4387 = vmatprep.mubr.msk.f32.mxu1 %vm5009_vm0, %v5010_v11 }
0x1927   :  { %4722 = vmatprep.subr.bf16.mxu1 %v5008_v3 }
0x192a   :  { %4724 = vmatpush3.bf16.msra.mxu1 %v5221_v7 }
0x192b   :  { %4731 = vmatprep.subr.bf16.mxu1 %v5008_v3 }
0x192d   :  { %4388 = vmatmul.mubr.msk.f32.vlgmr.msra.gmra.mrb[22].mxu1 %vm80_vm1, %v5425_v0 }
0x192e   :  { %4733 = vmatpush3.bf16.msra.mxu1 %v5230_v10  ;;  %4409 = vmatprep.mubr.msk.f32.mxu1 %vm5009_vm0, %v5010_v11 }
0x192f   :  { %4734 = vmatprep.subr.bf16.mxu1 %v5008_v3 }
0x1932   :  { %4736 = vmatpush3.bf16.msra.mxu1 %v5291_v52 }
0x1933   :  { %4743 = vmatprep.subr.bf16.mxu1 %v5008_v3 }
0x19f8   :  { %v1710_v21 = vpop.f32.mrb[20].mxu1 }
0x19f9   :  { %v4367_v27 = vpop.f32.mrb[21].mxu1  ;;  %4377 = vmatmul.mubr.msk.f32.vlgmr.msra.gmra.mrb[18].mxu0 %vm80_vm1, %v1710_v21 }
0x19fa   :  { %4727 = vmatpush3.bf16.msra.mxu0 %v5252_v22  ;;  %4398 = vmatprep.mubr.msk.f32.mxu0 %vm5009_vm0, %v5010_v11 }
0x19fb   :  { %4728 = vmatprep.subr.bf16.mxu0 %v5008_v3 }
0x19fe   :  { %4730 = vmatpush3.bf16.msra.mxu0 %v5258_v25 }
0x19ff   :  { %4737 = vmatprep.subr.bf16.mxu0 %v5008_v3 }
0x1a00   :  { %v1853_v28 = vpop.f32.mrb[22].mxu1 }
0x1a01   :  { %v4389_v30 = vpop.f32.mrb[23].mxu1 }
0x1acc   :  { %v1783_v31 = vpop.f32.mrb[18].mxu0 }
0x1acd   :  { %v1854_v45 = vadd.f32 %v1853_v28, %v1783_v31  ;;  %v4378_v35 = vpop.f32.mrb[19].mxu0 }
0x1acf   :  { %v1857_v37 = vadd.f32 %v1854_v45, %v5266_v26 }
0x1ad1   :  { %4901 = vtanh.f32 %v1857_v37 }
0x1adb   :  { %v4902_v38 = vpop.eup %4901 }
0x1adc   :  { %4399 = vmatmul.mubr.msk.f32.vlgmr.msra.gmra.mrb[20].mxu0 %vm80_vm1, %v4902_v38 }
0x1add   :  { %4739 = vmatpush3.bf16.msra.mxu0 %v5097_v4  ;;  %4420 = vmatprep.mubr.msk.f32.mxu0 %vm5009_vm0, %v5010_v11 }
0x1ade   :  { %4740 = vmatprep.subr.bf16.mxu0 %v5008_v3 }
0x1ae1   :  { %4742 = vmatpush3.bf16.msra.mxu0 %v5121_v12 }
0x1ae2   :  { %4434 = vmatprep.subr.mxu0 %v5010_v11 }
0x1baf   :  { %v1928_v39 = vpop.f32.mrb[20].mxu0 }
0x1bb0   :  { %v1929_v40 = vadd.f32 %v1928_v39, %v5279_v32  ;;  %v4400_v41 = vpop.f32.mrb[21].mxu0 }
0x1bb2   :  { %v1932_v42 = vsel %vm641_vm4, %v1929_v40, -inf }
0x1bb3   :  { %1933 = vmax.xlane.f32.xlu0 %v1932_v42 }
0x1c40   :  { %v1934_v43 = vpop.xlane.xlu0 %1933 }
0x1c41   :  { %v1935_v44 = vsub.f32 %v1929_v40, %v1934_v43 }
0x1c43   :  { %v1936_v47 = vmul.f32 1.442695, %v1935_v44 }
0x1c45   :  { %4903 = vpow2.f32 %v1936_v47 }
0x1c4f   :  { %v4904_v48 = vpop.eup %4903 }
0x1c50   :  { %v1938_v49 = vsel %vm641_vm4, %v4904_v48, 0.0 }
0x1c51   :  { %1939 = vadd.xlane.f32.xlu1 %v1938_v49 }
0x1cde   :  { %v1940_v50 = vpop.xlane.xlu1 %1939 }
0x1cdf   :  { %4905 = vrcp.f32 %v1940_v50 }
0x1ce9   :  { %v4906_v51 = vpop.eup %4905 }
0x1cea   :  { %v1942_v56 = vmul.f32 %v4906_v51, %v4904_v48 }
0x1cec   :  { %v1943_v57 = vsel %vm641_vm4, %v1942_v56, -inf }
0x1ced   :  { %1944 = vmax.xlane.f32.xlu0 %v1943_v57 }
0x1d7a   :  { %v5471_v34 = vpop.xlane.xlu0 %1944 }
0x1d7b   :  { %vm1946_vm9 = vcmp.eq.f32.partialorder %v1942_v56, %v5471_v34 }
0x1d7c   :  { %v1947_v61 = vsel %vm1946_vm9, %v5299_v54, 32.0 }
0x1d7d   :  { %v1948_v62 = vsel %vm641_vm4, %v1947_v61, inf }
0x1d7e   :  { %1949 = vmin.xlane.f32.xlu1 %v1948_v62 }
0x1e0b   :  { %v5476_v46 = vpop.xlane.xlu1 %1949 }
0x1e0c   :  { %vm1955_vm10 = vcmp.eq.f32.partialorder %v5299_v54, %v5476_v46 }
0x1e0d   :  { %v3952_v33 = vsel %vm1955_vm10, 1.0, %v5010_v11 }
0x1e0e   :  { %4410 = vmatmul.mubr.msk.f32.vlgmr.msra.gmra.mrb[24].mxu1 %vm80_vm1, %v3952_v33 }
0x1e0f   :  { %4745 = vmatpush3.bf16.msra.mxu1 %v5108_v8  ;;  %4431 = vmatprep.mubr.msk.f32.mxu1 %vm5009_vm0, %v5010_v11 }
0x1e10   :  { %4746 = vmatprep.subr.bf16.mxu1 %v5008_v3 }
0x1e13   :  { %4748 = vmatpush3.bf16.msra.mxu1 %v5130_v14 }
0x1e14   :  { %4439 = vmatprep.subr.mxu1 %v5010_v11 }
0x1e16   :  { %4432 = vmatmul.mubr.msk.f32.vlgmr.msra.gmra.mrb[26].mxu1 %vm80_vm1, %v5425_v0 }
0x1e17   :  { %4440 = vmatpush3.msra.mxu1 %v5165_v36  ;;  %4441 = vmatprep.mubr.msk.f32.mxu1 %vm5009_vm0, %v5010_v11 }
0x1e18   :  { %4755 = vmatprep.subr.bf16.mxu1 %v5008_v3 }
0x1ee1   :  { %v2027_v2 = vpop.f32.mrb[24].mxu1 }
0x1ee2   :  { %v4411_v5 = vpop.f32.mrb[25].mxu1  ;;  %4421 = vmatmul.mubr.msk.f32.vlgmr.msra.gmra.mrb[22].mxu0 %vm80_vm1, %v2027_v2 }
0x1ee3   :  { %4435 = vmatpush3.xpose.msk.msra.mxu0 %vm80_vm1, %v5165_v36  ;;  %4436 = vmatprep.mubr.msk.f32.mxu0 %vm5009_vm0, %v5010_v11 }
0x1ee4   :  { %4749 = vmatprep.subr.bf16.mxu0 %v5008_v3 }
0x1ee9   :  { %v2170_v0 = vpop.f32.mrb[26].mxu1 }
0x1eea   :  { %v2171_v6 = vadd.f32 %v2170_v0, %v5150_v17  ;;  %v4433_v9 = vpop.f32.mrb[27].mxu1 }
0x1eec   :  { %2182 = vrot.lane.b32.xlu0 %v2171_v6, %s5011_s2 }
0x1f5e   :  { %v2183_v27 = vpop.permute.xlu0 %2182 }
0x1fb5   :  { %v2100_v15 = vpop.f32.mrb[22].mxu0 }
0x1fb6   :  { %v2101_v16 = vadd.f32 %v2100_v15, %v5157_v23  ;;  %v4422_v13 = vpop.f32.mrb[23].mxu0 }
0x1fb8   :  { %v2174_v18 = vadd.f32 %v2171_v6, %v2101_v16 }
0x1fba   :  { %v3956_v19 = vmul.f32 -1.442695, %v2174_v18 }
0x1fbc   :  { %4907 = vpow2.f32 %v3956_v19 }
0x1fc6   :  { %v4908_v20 = vpop.eup %4907 }
0x1fc7   :  { %v2178_v36 = vadd.f32 1.0, %v4908_v20 }
0x1fc9   :  { %4909 = vrcp.f32 %v2178_v36 }
0x1fd3   :  { %v4910_v21 = vpop.eup %4909 }
0x1fd4   :  { %v2185_v28 = vmul.f32 %v4910_v21, %v2183_v27  ;;  %v2192_v45 = vsub.f32 1.0, %v4910_v21  ;;  %v2198_v35 = vmul.f32 %v4910_v21, %v5421_v63 }
0x1fd6   :  { %2187 = vrot.lane.b32.xlu1 %v2185_v28, %s5011_s2 }
0x2048   :  { %v2188_v30 = vpop.permute.xlu1 %2187 }
0x2049   :  { %v2190_v17 = vadd.f32 %v2188_v30, %v2101_v16 }
0x204b   :  { %4911 = vtanh.f32 %v2190_v17 }
0x2055   :  { %v4912_v31 = vpop.eup %4911 }
0x2056   :  { %2194 = vrot.lane.b32.xlu1 %v4912_v31, %s5012_s15 }
0x20c8   :  { %v2195_v23 = vpop.permute.xlu1 %2194 }
0x20c9   :  { %v2197_v37 = vmul.f32 %v2195_v23, %v2192_v45 }
0x20cb   :  { %v5506_v38 = vadd.f32 %v2198_v35, %v2197_v37  ;;  %v5578_v35 = vld [vmem:[%s5799_s1] sm:$0xff] }
0x20cd   :  { %2201 = vrot.lane.b32.xlu0 %v5506_v38, %s5012_s15 }
0x213f   :  { %v5510_v39 = vpop.permute.xlu0 %2201 }
0x2140   :  { %4437 = vmatmul.mubr.msk.f32.vlgmr.msra.gmra.mrb[24].mxu0 %vm80_vm1, %v5510_v39 }
0x2141   :  { %4751 = vmatpush3.bf16.msra.mxu0 %v5194_v58  ;;  %4452 = vmatprep.mubr.msk.f32.mxu0 %vm5009_vm0, %v5010_v11 }
0x2142   :  { %4752 = vmatprep.subr.bf16.mxu0 %v5008_v3 }
0x2145   :  { %4754 = vmatpush3.bf16.msra.mxu0 %v5200_v60 }
0x2146   :  { %4761 = vmatprep.subr.bf16.mxu0 %v5008_v3 }
0x2213   :  { %v2271_v63 = vpop.f32.mrb[24].mxu0 }
0x2214   :  { %v4438_v40 = vpop.f32.mrb[25].mxu0  ;;  %v2275_v41 = vsel %vm337_vm2, %v2271_v63, -inf }
0x2215   :  { %2276 = vmax.xlane.f32.xlu1 %v2275_v41  ;;  %v5593_v40 = vld [vmem:[%s5804_s6] sm:$0x1] }
0x22a2   :  { %v2277_v42 = vpop.xlane.xlu1 %2276 }
0x22a3   :  { %v2278_v43 = vsub.f32 %v2271_v63, %v2277_v42 }
0x22a5   :  { %v2279_v44 = vmul.f32 1.442695, %v2278_v43 }
0x22a7   :  { %4913 = vpow2.f32 %v2279_v44  ;;  %v5600_v44 = vld [vmem:[%s5803_s5] sm:$0x1] }
0x22b1   :  { %v4914_v47 = vpop.eup %4913 }
0x22b2   :  { %v2281_v48 = vsel %vm337_vm2, %v4914_v47, 0.0 }
0x22b3   :  { %2282 = vadd.xlane.f32.xlu0 %v2281_v48 }
0x2340   :  { %v2283_v49 = vpop.xlane.xlu0 %2282 }
0x2341   :  { %4915 = vrcp.f32 %v2283_v49 }
0x234b   :  { %v4916_v50 = vpop.eup %4915 }
0x234c   :  { %v2285_v51 = vmul.f32 %v4916_v50, %v4914_v47 }
0x234e   :  { %4442 = vmatmul.mubr.msk.f32.vlgmr.msra.gmra.mrb[28].mxu1 %vm349_vm3, %v2285_v51 }
0x234f   :  { %4757 = vmatpush3.bf16.msra.mxu1 %v5211_v1  ;;  %4463 = vmatprep.mubr.msk.f32.mxu1 %vm5009_vm0, %v5010_v11 }
0x2350   :  { %4758 = vmatprep.subr.bf16.mxu1 %v5008_v3 }
0x2353   :  { %4760 = vmatpush3.bf16.msra.mxu1 %v5221_v7 }
0x2354   :  { %4767 = vmatprep.subr.bf16.mxu1 %v5008_v3 }
0x2356   :  { %4464 = vmatmul.mubr.msk.f32.vlgmr.msra.gmra.mrb[30].mxu1 %vm80_vm1, %v5510_v39 }
0x2357   :  { %4769 = vmatpush3.bf16.msra.mxu1 %v5230_v10  ;;  %4485 = vmatprep.mubr.msk.f32.mxu1 %vm5009_vm0, %v5010_v11 }
0x2358   :  { %4770 = vmatprep.subr.bf16.mxu1 %v5008_v3 }
0x235b   :  { %4772 = vmatpush3.bf16.msra.mxu1 %v5291_v52 }
0x235c   :  { %4779 = vmatprep.subr.bf16.mxu1 %v5008_v3 }
0x2421   :  { %v2355_v56 = vpop.f32.mrb[28].mxu1 }
0x2422   :  { %v4443_v57 = vpop.f32.mrb[29].mxu1  ;;  %4453 = vmatmul.mubr.msk.f32.vlgmr.msra.gmra.mrb[26].mxu0 %vm80_vm1, %v2355_v56 }
0x2423   :  { %4763 = vmatpush3.bf16.msra.mxu0 %v5252_v22  ;;  %4474 = vmatprep.mubr.msk.f32.mxu0 %vm5009_vm0, %v5010_v11 }
0x2424   :  { %4764 = vmatprep.subr.bf16.mxu0 %v5008_v3 }
0x2427   :  { %4766 = vmatpush3.bf16.msra.mxu0 %v5258_v25 }
0x2428   :  { %4773 = vmatprep.subr.bf16.mxu0 %v5008_v3 }
0x2429   :  { %v2498_v61 = vpop.f32.mrb[30].mxu1 }
0x242a   :  { %v4465_v62 = vpop.f32.mrb[31].mxu1 }
0x24f5   :  { %v2428_v33 = vpop.f32.mrb[26].mxu0 }
0x24f6   :  { %v2499_v2 = vadd.f32 %v2498_v61, %v2428_v33  ;;  %v4454_v5 = vpop.f32.mrb[27].mxu0 }
0x24f8   :  { %v2502_v0 = vadd.f32 %v2499_v2, %v5266_v26 }
0x24fa   :  { %4917 = vtanh.f32 %v2502_v0 }
0x2504   :  { %v4918_v6 = vpop.eup %4917 }
0x2505   :  { %4475 = vmatmul.mubr.msk.f32.vlgmr.msra.gmra.mrb[28].mxu0 %vm80_vm1, %v4918_v6 }
0x2506   :  { %4775 = vmatpush3.bf16.msra.mxu0 %v5097_v4  ;;  %4496 = vmatprep.mubr.msk.f32.mxu0 %vm5009_vm0, %v5010_v11 }
0x2507   :  { %4776 = vmatprep.subr.bf16.mxu0 %v5008_v3 }
0x250a   :  { %4778 = vmatpush3.bf16.msra.mxu0 %v5121_v12 }
0x250b   :  { %4510 = vmatprep.subr.mxu0 %v5010_v11 }
0x25d8   :  { %v2573_v9 = vpop.f32.mrb[28].mxu0 }
0x25d9   :  { %v2574_v15 = vadd.f32 %v2573_v9, %v5279_v32  ;;  %v4476_v16 = vpop.f32.mrb[29].mxu0 }
0x25db   :  { %v2577_v26 = vsel %vm641_vm4, %v2574_v15, -inf }
0x25dc   :  { %2578 = vmax.xlane.f32.xlu0 %v2577_v26 }
0x2669   :  { %v2579_v13 = vpop.xlane.xlu0 %2578 }
0x266a   :  { %v2580_v18 = vsub.f32 %v2574_v15, %v2579_v13 }
0x266c   :  { %v2581_v19 = vmul.f32 1.442695, %v2580_v18 }
0x266e   :  { %4919 = vpow2.f32 %v2581_v19 }
0x2678   :  { %v4920_v20 = vpop.eup %4919 }
0x2679   :  { %v2583_v36 = vsel %vm641_vm4, %v4920_v20, 0.0 }
0x267a   :  { %2584 = vadd.xlane.f32.xlu1 %v2583_v36 }
0x2707   :  { %v2585_v21 = vpop.xlane.xlu1 %2584 }
0x2708   :  { %4921 = vrcp.f32 %v2585_v21 }
0x2712   :  { %v4922_v27 = vpop.eup %4921 }
0x2713   :  { %v2587_v28 = vmul.f32 %v4922_v27, %v4920_v20 }
0x2715   :  { %v2588_v30 = vsel %vm641_vm4, %v2587_v28, -inf }
0x2716   :  { %2589 = vmax.xlane.f32.xlu0 %v2588_v30 }
0x27a3   :  { %v5556_v32 = vpop.xlane.xlu0 %2589 }
0x27a4   :  { %vm2591_vm11 = vcmp.eq.f32.partialorder %v2587_v28, %v5556_v32 }
0x27a5   :  { %v2592_v17 = vsel %vm2591_vm11, %v5299_v54, 32.0 }
0x27a6   :  { %v2593_v31 = vsel %vm641_vm4, %v2592_v17, inf }
0x27a7   :  { %2594 = vmin.xlane.f32.xlu1 %v2593_v31 }
0x2834   :  { %v5561_v45 = vpop.xlane.xlu1 %2594 }
0x2835   :  { %vm2600_vm12 = vcmp.eq.f32.partialorder %v5299_v54, %v5561_v45 }
0x2836   :  { %v3963_v23 = vsel %vm2600_vm12, 1.0, %v5010_v11 }
0x2837   :  { %4486 = vmatmul.mubr.msk.f32.vlgmr.msra.gmra.mrb[32].mxu1 %vm80_vm1, %v3963_v23 }
0x2838   :  { %4781 = vmatpush3.bf16.msra.mxu1 %v5108_v8  ;;  %4507 = vmatprep.mubr.msk.f32.mxu1 %vm5009_vm0, %v5010_v11 }
0x2839   :  { %4782 = vmatprep.subr.bf16.mxu1 %v5008_v3 }
0x283c   :  { %4784 = vmatpush3.bf16.msra.mxu1 %v5130_v14 }
0x283d   :  { %4515 = vmatprep.subr.mxu1 %v5010_v11 }
0x283f   :  { %4508 = vmatmul.mubr.msk.f32.vlgmr.msra.gmra.mrb[34].mxu1 %vm80_vm1, %v5510_v39 }
0x2840   :  { %4516 = vmatpush3.msra.mxu1 %v5578_v35  ;;  %4517 = vmatprep.mubr.msk.f32.mxu1 %vm5009_vm0, %v5010_v11 }
0x2841   :  { %4791 = vmatprep.subr.bf16.mxu1 %v5008_v3 }
0x290a   :  { %v2672_v37 = vpop.f32.mrb[32].mxu1 }
0x290b   :  { %v4487_v63 = vpop.f32.mrb[33].mxu1  ;;  %4497 = vmatmul.mubr.msk.f32.vlgmr.msra.gmra.mrb[30].mxu0 %vm80_vm1, %v2672_v37 }
0x290c   :  { %4511 = vmatpush3.xpose.msk.msra.mxu0 %vm80_vm1, %v5578_v35  ;;  %4512 = vmatprep.mubr.msk.f32.mxu0 %vm5009_vm0, %v5010_v11 }
0x290d   :  { %4785 = vmatprep.subr.bf16.mxu0 %v5008_v3 }
0x2912   :  { %v2815_v39 = vpop.f32.mrb[34].mxu1 }
0x2913   :  { %v2816_v41 = vadd.f32 %v5593_v40, %v2815_v39  ;;  %v4509_v42 = vpop.f32.mrb[35].mxu1 }
0x2915   :  { %2827 = vrot.lane.b32.xlu0 %v2816_v41, %s5011_s2 }
0x2987   :  { %v2828_v61 = vpop.permute.xlu0 %2827 }
0x29de   :  { %v2745_v43 = vpop.f32.mrb[30].mxu0 }
0x29df   :  { %v2746_v47 = vadd.f32 %v5600_v44, %v2745_v43  ;;  %v4498_v48 = vpop.f32.mrb[31].mxu0 }
0x29e0   :  { %v5660_v48 = vld [vmem:[%s5809_s11] sm:$0x1]  ;;  %s5014_s11 = smov [#allocation4]  }
0x29e1   :  { %v2819_v49 = vadd.f32 %v2816_v41, %v2746_v47  ;;  %v5647_v41 = vld [vmem:[%s5807_s9] sm:$0x1] }
0x29e3   :  { %v3967_v50 = vmul.f32 -1.442695, %v2819_v49 }
0x29e5   :  { %4923 = vpow2.f32 %v3967_v50 }
0x29ef   :  { %v4924_v51 = vpop.eup %4923 }
0x29f0   :  { %v2823_v56 = vadd.f32 1.0, %v4924_v51 }
0x29f2   :  { %4925 = vrcp.f32 %v2823_v56 }
0x29fc   :  { %v4926_v57 = vpop.eup %4925 }
0x29fd   :  { %v2830_v62 = vmul.f32 %v4926_v57, %v2828_v61  ;;  %v2837_v0 = vsub.f32 1.0, %v4926_v57  ;;  %v2843_v9 = vmul.f32 %v4926_v57, %v5506_v38 }
0x29ff   :  { %2832 = vrot.lane.b32.xlu1 %v2830_v62, %s5011_s2 }
0x2a71   :  { %v2833_v33 = vpop.permute.xlu1 %2832 }
0x2a72   :  { %v2835_v2 = vadd.f32 %v2833_v33, %v2746_v47 }
0x2a74   :  { %4927 = vtanh.f32 %v2835_v2 }
0x2a7e   :  { %v4928_v5 = vpop.eup %4927 }
0x2a7f   :  { %2839 = vrot.lane.b32.xlu1 %v4928_v5, %s5012_s15 }
0x2af1   :  { %v2840_v6 = vpop.permute.xlu1 %2839 }
0x2af2   :  { %v2842_v15 = vmul.f32 %v2840_v6, %v2837_v0 }
0x2af4   :  { %v5606_v16 = vadd.f32 %v2843_v9, %v2842_v15 }
0x2af6   :  { %2846 = vrot.lane.b32.xlu0 %v5606_v16, %s5012_s15 }
0x2b68   :  { %v5610_v26 = vpop.permute.xlu0 %2846 }
0x2b69   :  { %4513 = vmatmul.mubr.msk.f32.vlgmr.msra.gmra.mrb[32].mxu0 %vm80_vm1, %v5610_v26 }
0x2b6a   :  { %4787 = vmatpush3.bf16.msra.mxu0 %v5194_v58  ;;  %4528 = vmatprep.mubr.msk.f32.mxu0 %vm5009_vm0, %v5010_v11 }
0x2b6b   :  { %4788 = vmatprep.subr.bf16.mxu0 %v5008_v3 }
0x2b6e   :  { %4790 = vmatpush3.bf16.msra.mxu0 %v5200_v60 }
0x2b6f   :  { %4797 = vmatprep.subr.bf16.mxu0 %v5008_v3 }
0x2c3c   :  { %v2916_v38 = vpop.f32.mrb[32].mxu0 }
0x2c3d   :  { %v4514_v13 = vpop.f32.mrb[33].mxu0  ;;  %v2920_v18 = vsel %vm337_vm2, %v2916_v38, -inf }
0x2c3e   :  { %2921 = vmax.xlane.f32.xlu1 %v2920_v18 }
0x2ccb   :  { %v2922_v19 = vpop.xlane.xlu1 %2921 }
0x2ccc   :  { %v2923_v20 = vsub.f32 %v2916_v38, %v2922_v19 }
0x2cce   :  { %v2924_v36 = vmul.f32 1.442695, %v2923_v20 }
0x2cd0   :  { %4929 = vpow2.f32 %v2924_v36 }
0x2cda   :  { %v4930_v21 = vpop.eup %4929 }
0x2cdb   :  { %v2926_v27 = vsel %vm337_vm2, %v4930_v21, 0.0 }
0x2cdc   :  { %2927 = vadd.xlane.f32.xlu0 %v2926_v27 }
0x2d69   :  { %v2928_v28 = vpop.xlane.xlu0 %2927 }
0x2d6a   :  { %4931 = vrcp.f32 %v2928_v28 }
0x2d74   :  { %v4932_v30 = vpop.eup %4931 }
0x2d75   :  { %v2930_v17 = vmul.f32 %v4932_v30, %v4930_v21 }
0x2d77   :  { %4518 = vmatmul.mubr.msk.f32.vlgmr.msra.gmra.mrb[36].mxu1 %vm349_vm3, %v2930_v17 }
0x2d78   :  { %4793 = vmatpush3.bf16.msra.mxu1 %v5211_v1  ;;  %4539 = vmatprep.mubr.msk.f32.mxu1 %vm5009_vm0, %v5010_v11 }
0x2d79   :  { %4794 = vmatprep.subr.bf16.mxu1 %v5008_v3 }
0x2d7c   :  { %4796 = vmatpush3.bf16.msra.mxu1 %v5221_v7 }
0x2d7d   :  { %4803 = vmatprep.subr.bf16.mxu1 %v5008_v3 }
0x2d7f   :  { %4540 = vmatmul.mubr.msk.f32.vlgmr.msra.gmra.mrb[38].mxu1 %vm80_vm1, %v5610_v26 }
0x2d80   :  { %4805 = vmatpush3.bf16.msra.mxu1 %v5230_v10  ;;  %4561 = vmatprep.mubr.msk.f32.mxu1 %vm5009_vm0, %v5010_v11 }
0x2d81   :  { %4806 = vmatprep.subr.bf16.mxu1 %v5008_v3 }
0x2d84   :  { %4808 = vmatpush3.bf16.msra.mxu1 %v5291_v52 }
0x2d85   :  { %4815 = vmatprep.subr.bf16.mxu1 %v5008_v3 }
0x2e4a   :  { %v3000_v31 = vpop.f32.mrb[36].mxu1 }
0x2e4b   :  { %v4519_v23 = vpop.f32.mrb[37].mxu1  ;;  %4529 = vmatmul.mubr.msk.f32.vlgmr.msra.gmra.mrb[34].mxu0 %vm80_vm1, %v3000_v31 }
0x2e4c   :  { %4799 = vmatpush3.bf16.msra.mxu0 %v5252_v22  ;;  %4550 = vmatprep.mubr.msk.f32.mxu0 %vm5009_vm0, %v5010_v11 }
0x2e4d   :  { %4800 = vmatprep.subr.bf16.mxu0 %v5008_v3 }
0x2e50   :  { %4802 = vmatpush3.bf16.msra.mxu0 %v5258_v25 }
0x2e51   :  { %4809 = vmatprep.subr.bf16.mxu0 %v5008_v3 }
0x2e52   :  { %v3143_v10 = vpop.f32.mrb[38].mxu1 }
0x2e53   :  { %v4541_v37 = vpop.f32.mrb[39].mxu1 }
0x2f1e   :  { %v3073_v52 = vpop.f32.mrb[34].mxu0 }
0x2f1f   :  { %v3144_v63 = vadd.f32 %v3143_v10, %v3073_v52  ;;  %v4530_v39 = vpop.f32.mrb[35].mxu0 }
0x2f21   :  { %v3147_v42 = vadd.f32 %v5647_v41, %v3144_v63 }
0x2f23   :  { %4933 = vtanh.f32 %v3147_v42 }
0x2f2d   :  { %v4934_v43 = vpop.eup %4933 }
0x2f2e   :  { %4551 = vmatmul.mubr.msk.f32.vlgmr.msra.gmra.mrb[36].mxu0 %vm80_vm1, %v4934_v43 }
0x2f2f   :  { %4811 = vmatpush3.bf16.msra.mxu0 %v5097_v4  ;;  %4572 = vmatprep.mubr.msk.f32.mxu0 %vm5009_vm0, %v5010_v11 }
0x2f30   :  { %4812 = vmatprep.subr.bf16.mxu0 %v5008_v3 }
0x2f33   :  { %4814 = vmatpush3.bf16.msra.mxu0 %v5121_v12 }
0x2f34   :  { %4586 = vmatprep.subr.mxu0 %v5010_v11 }
0x3001   :  { %v3218_v47 = vpop.f32.mrb[36].mxu0 }
0x3002   :  { %v3219_v49 = vadd.f32 %v5660_v48, %v3218_v47  ;;  %v4552_v50 = vpop.f32.mrb[37].mxu0 }
0x3004   :  { %v3222_v4 = vsel %vm641_vm4, %v3219_v49, -inf }
0x3005   :  { %3223 = vmax.xlane.f32.xlu0 %v3222_v4 }
0x3092   :  { %v3224_v51 = vpop.xlane.xlu0 %3223 }
0x3093   :  { %v3225_v56 = vsub.f32 %v3219_v49, %v3224_v51 }
0x3095   :  { %v3226_v57 = vmul.f32 1.442695, %v3225_v56 }
0x3097   :  { %4935 = vpow2.f32 %v3226_v57 }
0x30a1   :  { %v4936_v61 = vpop.eup %4935 }
0x30a2   :  { %v3228_v12 = vsel %vm641_vm4, %v4936_v61, 0.0 }
0x30a3   :  { %3229 = vadd.xlane.f32.xlu1 %v3228_v12 }
0x3130   :  { %v3230_v62 = vpop.xlane.xlu1 %3229 }
0x3131   :  { %4937 = vrcp.f32 %v3230_v62 }
0x313b   :  { %v4938_v33 = vpop.eup %4937 }
0x313c   :  { %v3232_v2 = vmul.f32 %v4938_v33, %v4936_v61 }
0x313e   :  { %v3233_v5 = vsel %vm641_vm4, %v3232_v2, -inf }
0x313f   :  { %3234 = vmax.xlane.f32.xlu0 %v3233_v5 }
0x31cc   :  { %v5666_v0 = vpop.xlane.xlu0 %3234 }
0x31cd   :  { %vm3236_vm13 = vcmp.eq.f32.partialorder %v3232_v2, %v5666_v0 }
0x31ce   :  { %v3237_v6 = vsel %vm3236_vm13, %v5299_v54, 32.0 }
0x31cf   :  { %v3238_v9 = vsel %vm641_vm4, %v3237_v6, inf }
0x31d0   :  { %3239 = vmin.xlane.f32.xlu1 %v3238_v9 }
0x325d   :  { %v5671_v15 = vpop.xlane.xlu1 %3239 }
0x325e   :  { %vm3245_vm14 = vcmp.eq.f32.partialorder %v5299_v54, %v5671_v15 }
0x325f   :  { %v3974_v38 = vsel %vm3245_vm14, 1.0, %v5010_v11 }
0x3260   :  { %4562 = vmatmul.mubr.msk.f32.vlgmr.msra.gmra.mrb[40].mxu1 %vm80_vm1, %v3974_v38 }
0x3261   :  { %4817 = vmatpush3.bf16.msra.mxu1 %v5108_v8  ;;  %4583 = vmatprep.mubr.msk.f32.mxu1 %vm5009_vm0, %v5010_v11 }
0x3262   :  { %4818 = vmatprep.subr.bf16.mxu1 %v5008_v3 }
0x3265   :  { %4820 = vmatpush3.bf16.msra.mxu1 %v5130_v14 }
0x3266   :  { %4591 = vmatprep.subr.mxu1 %v5010_v11 }
0x3268   :  { %4584 = vmatmul.mubr.msk.f32.vlgmr.msra.gmra.mrb[42].mxu1 %vm80_vm1, %v5610_v26 }
0x3269   :  { %4592 = vmatpush3.msra.mxu1 %v5578_v35  ;;  %4593 = vmatprep.mubr.msk.f32.mxu1 %vm5009_vm0, %v5010_v11 }
0x326a   :  { %4827 = vmatprep.subr.bf16.mxu1 %v5008_v3 }
0x3333   :  { %v3317_v8 = vpop.f32.mrb[40].mxu1 }
0x3334   :  { %v4563_v13 = vpop.f32.mrb[41].mxu1  ;;  %4573 = vmatmul.mubr.msk.f32.vlgmr.msra.gmra.mrb[38].mxu0 %vm80_vm1, %v3317_v8 }
0x3335   :  { %4587 = vmatpush3.xpose.msk.msra.mxu0 %vm80_vm1, %v5578_v35  ;;  %4588 = vmatprep.mubr.msk.f32.mxu0 %vm5009_vm0, %v5010_v11 }
0x3336   :  { %4821 = vmatprep.subr.bf16.mxu0 %v5008_v3 }
0x333b   :  { %v3460_v14 = vpop.f32.mrb[42].mxu1 }
0x333c   :  { %v3461_v26 = vadd.f32 %v5593_v40, %v3460_v14  ;;  %v4585_v18 = vpop.f32.mrb[43].mxu1 }
0x333e   :  { %3472 = vrot.lane.b32.xlu0 %v3461_v26, %s5011_s2 }
0x33b0   :  { %v3473_v17 = vpop.permute.xlu0 %3472 }
0x3407   :  { %v3390_v19 = vpop.f32.mrb[38].mxu0 }
0x3408   :  { %v3391_v20 = vadd.f32 %v5600_v44, %v3390_v19  ;;  %v4574_v36 = vpop.f32.mrb[39].mxu0 }
0x340a   :  { %v3464_v21 = vadd.f32 %v3461_v26, %v3391_v20 }
0x340c   :  { %v3978_v27 = vmul.f32 -1.442695, %v3464_v21 }
0x340e   :  { %4939 = vpow2.f32 %v3978_v27 }
0x3418   :  { %v4940_v28 = vpop.eup %4939 }
0x3419   :  { %v3468_v35 = vadd.f32 1.0, %v4940_v28 }
0x341b   :  { %4941 = vrcp.f32 %v3468_v35 }
0x3425   :  { %v4942_v30 = vpop.eup %4941 }
0x3426   :  { %v3475_v31 = vmul.f32 %v4942_v30, %v3473_v17  ;;  %v3482_v37 = vsub.f32 1.0, %v4942_v30  ;;  %v3488_v52 = vmul.f32 %v4942_v30, %v5606_v16 }
0x3428   :  { %3477 = vrot.lane.b32.xlu1 %v3475_v31, %s5011_s2  ;;  %s3909_s2 = sshll.u32 %s5014_s11, 4  ;;  %s3910_s2 = int_to_ptr.vmem [resolvable:$true] %s3909_s2 }
0x3429   :  { %s4964_s7 = scalar_lea.vmem %s3910_s2, 32  ;;  %p4965_p1 = scmp.lt.s32.totalorder %s3910_s2, %s3910_s2 }
0x349a   :  { %v3478_v23 = vpop.permute.xlu1 %3477 }
0x349b   :  { %v3480_v40 = vadd.f32 %v3478_v23, %v3391_v20 }
0x349d   :  { %4943 = vtanh.f32 %v3480_v40 }
0x34a7   :  { %v4944_v10 = vpop.eup %4943 }
0x34a8   :  { %3484 = vrot.lane.b32.xlu1 %v4944_v10, %s5012_s15 }
0x351a   :  { %v3485_v44 = vpop.permute.xlu1 %3484 }
0x351b   :  { %v3487_v63 = vmul.f32 %v3485_v44, %v3482_v37 }
0x351d   :  { %v3489_v39 = vadd.f32 %v3488_v52, %v3487_v63 }
0x351f   :  { %3491 = vrot.lane.b32.xlu0 %v3489_v39, %s5012_s15  ;;  %s4960_s15 = scalar_lea.vmem %s3910_s2, 16 }
0x3520   :  { %p4961_p0 = scmp.ne.s32.totalorder %s3910_s2, %s4960_s15  ;;  %p4966_p2 = scmp.lt.s32.totalorder %s4964_s7, %s4960_s15 }
0x3522   :  { %p4967_p3 = por %p4966_p2, %p4965_p1 }
0x3524   :  { %p4968_p4 = pnand %p4967_p3, %p4961_p0 }
0x3591   :  { %v3492_v42 = vpop.permute.xlu0 %3491 }
0x3592   :  { %4589 = vmatmul.mubr.msk.f32.vlgmr.msra.gmra.mrb[40].mxu0 %vm80_vm1, %v3492_v42 }
0x3593   :  { %4823 = vmatpush3.bf16.msra.mxu0 %v5194_v58  ;;  %4604 = vmatprep.mubr.msk.f32.mxu0 %vm5009_vm0, %v5010_v11 }
0x3594   :  { %4824 = vmatprep.subr.bf16.mxu0 %v5008_v3 }
0x3597   :  { %4826 = vmatpush3.bf16.msra.mxu0 %v5200_v60 }
0x3598   :  { %4833 = vmatprep.subr.bf16.mxu0 %v5008_v3 }
0x3665   :  { %v3561_v43 = vpop.f32.mrb[40].mxu0 }
0x3666   :  { %v4590_v16 = vpop.f32.mrb[41].mxu0  ;;  %v3565_v47 = vsel %vm337_vm2, %v3561_v43, -inf }
0x3667   :  { %3566 = vmax.xlane.f32.xlu1 %v3565_v47 }
0x36f4   :  { %v3567_v49 = vpop.xlane.xlu1 %3566 }
0x36f5   :  { %v3568_v50 = vsub.f32 %v3561_v43, %v3567_v49 }
0x36f7   :  { %v3569_v4 = vmul.f32 1.442695, %v3568_v50 }
0x36f9   :  { %4945 = vpow2.f32 %v3569_v4 }
0x3703   :  { %v4946_v51 = vpop.eup %4945 }
0x3704   :  { %v3571_v58 = vsel %vm337_vm2, %v4946_v51, 0.0  ;;  %vm2596_vm2 = vcmp.eq.s32.totalorder %v5296_v53, 3 }
0x3705   :  { %3572 = vadd.xlane.f32.xlu0 %v3571_v58 }
0x3792   :  { %v3573_v56 = vpop.xlane.xlu0 %3572 }
0x3793   :  { %4947 = vrcp.f32 %v3573_v56 }
0x379d   :  { %v4948_v57 = vpop.eup %4947 }
0x379e   :  { %v3575_v61 = vmul.f32 %v4948_v57, %v4946_v51 }
0x37a0   :  { %4594 = vmatmul.mubr.msk.f32.vlgmr.msra.gmra.mrb[44].mxu1 %vm349_vm3, %v3575_v61  ;;  %vm3241_vm3 = vcmp.eq.s32.totalorder %v5296_v53, 4 }
0x37a1   :  { %4829 = vmatpush3.bf16.msra.mxu1 %v5211_v1  ;;  %4615 = vmatprep.mubr.msk.f32.mxu1 %vm5009_vm0, %v5010_v11 }
0x37a2   :  { %4830 = vmatprep.subr.bf16.mxu1 %v5008_v3 }
0x37a5   :  { %4832 = vmatpush3.bf16.msra.mxu1 %v5221_v7 }
0x37a8   :  { %4616 = vmatmul.mubr.msk.f32.vlgmr.msra.gmra.mrb[46].mxu1 %vm80_vm1, %v3492_v42 }
0x3873   :  { %v3645_v60 = vpop.f32.mrb[44].mxu1 }
0x3874   :  { %v4595_v12 = vpop.f32.mrb[45].mxu1  ;;  %4605 = vmatmul.mubr.msk.f32.vlgmr.msra.gmra.mrb[42].mxu0 %vm80_vm1, %v3645_v60 }
0x3875   :  { %4835 = vmatpush3.bf16.msra.mxu0 %v5252_v22  ;;  %4626 = vmatprep.mubr.msk.f32.mxu0 %vm5009_vm0, %v5010_v11  ;;  %vm1306_vm0 = vcmp.eq.s32.totalorder %v5296_v53, 1 }
0x3876   :  { %4836 = vmatprep.subr.bf16.mxu0 %v5008_v3 }
0x3879   :  { %4838 = vmatpush3.bf16.msra.mxu0 %v5258_v25 }
0x387b   :  { %v3788_v1 = vpop.f32.mrb[46].mxu1 }
0x387c   :  { %v4617_v62 = vpop.f32.mrb[47].mxu1 }
0x3947   :  { %v3718_v33 = vpop.f32.mrb[42].mxu0 }
0x3948   :  { %v3789_v2 = vadd.f32 %v3788_v1, %v3718_v33  ;;  %v4606_v7 = vpop.f32.mrb[43].mxu0 }
0x394a   :  { %v3792_v5 = vadd.f32 %v5647_v41, %v3789_v2 }
0x394c   :  { %4949 = vtanh.f32 %v3792_v5 }
0x3956   :  { %v4950_v6 = vpop.eup %4949 }
0x3957   :  { %4627 = vmatmul.mubr.msk.f32.vlgmr.msra.gmra.mrb[44].mxu0 %vm80_vm1, %v4950_v6  ;;  %vm1951_vm1 = vcmp.eq.s32.totalorder %v5296_v53, 2 }
0x3a2a   :  { %v3863_v9 = vpop.f32.mrb[44].mxu0 }
0x3a2b   :  { %v3864_v22 = vadd.f32 %v5660_v48, %v3863_v9  ;;  %v4628_v38 = vpop.f32.mrb[45].mxu0  ;;  %v664_v48 = vsel %vm661_vm15, %v5301_v55, 0.0 }
0x3a2c   :  { %v1309_v20 = vsel %vm1306_vm0, %v5386_v24, %v664_v48 }
0x3a2d   :  { %v3867_v11 = vsel %vm641_vm4, %v3864_v22, -inf  ;;  %v1954_v36 = vsel %vm1951_vm1, %v5471_v34, %v1309_v20 }
0x3a2e   :  { %3868 = vmax.xlane.f32.xlu0 %v3867_v11  ;;  %v2599_v21 = vsel %vm2596_vm2, %v5556_v32, %v1954_v36 }
0x3a2f   :  { %v3244_v55 = vsel %vm3241_vm3, %v5666_v0, %v2599_v21 }
0x3abb   :  { %v3869_v3 = vpop.xlane.xlu0 %3868 }
0x3abc   :  { %v3870_v25 = vsub.f32 %v3864_v22, %v3869_v3 }
0x3abe   :  { %v3871_v8 = vmul.f32 1.442695, %v3870_v25 }
0x3ac0   :  { %4951 = vpow2.f32 %v3871_v8 }
0x3aca   :  { %v4952_v13 = vpop.eup %4951 }
0x3acb   :  { %v3873_v14 = vsel %vm641_vm4, %v4952_v13, 0.0 }
0x3acc   :  { %3874 = vadd.xlane.f32.xlu1 %v3873_v14 }
0x3b59   :  { %v3875_v41 = vpop.xlane.xlu1 %3874 }
0x3b5a   :  { %4953 = vrcp.f32 %v3875_v41 }
0x3b64   :  { %v4954_v26 = vpop.eup %4953 }
0x3b65   :  { %v3877_v18 = vmul.f32 %v4954_v26, %v4952_v13 }
0x3b67   :  { %v3878_v19 = vsel %vm641_vm4, %v3877_v18, -inf }
0x3b68   :  { %3879 = vmax.xlane.f32.xlu0 %v3878_v19 }
0x3bf5   :  { %v3880_v27 = vpop.xlane.xlu0 %3879 }
0x3bf6   :  { %vm3881_vm7 = vcmp.eq.f32.partialorder %v3877_v18, %v3880_v27  ;;  %v3889_v24 = vsel %vm3886_vm5, %v3880_v27, %v3244_v55 }
0x3bf7   :  { %v3882_v28 = vsel %vm3881_vm7, %v5299_v54, 32.0  ;;  %3892 = vst.msk [vmem:[#allocation4] sm:$0x1] %vm3890_vm6, %v3889_v24 }
0x3bf8   :  { %v3883_v34 = vsel %vm641_vm4, %v3882_v28, inf }
0x3bf9   :  { %3884 = vmin.xlane.f32.xlu1 %v3883_v34 }
0x3bfa   :  { %4971 = shalt.err (!%p4968_p4)
}
0x3bfb   :  { %s4972_s18 = scalar_lea.hbm %s5811_s13, 16 }
0x3bfc   :  { %p4973_p5 = scmp.ne.s32.totalorder %s5811_s13, %s4972_s18  ;;  %p4976_p6 = scmp.lt.u32.totalorder %s4972_s18, %s5811_s13 }
0x3bfe   :  { %p4978_p7 = pnand %p4976_p6, %p4973_p5 }
0x3c00   :  { %4981 = shalt.err (!%p4978_p7)
}
0x3c01   :  { %3912 = dma.vmem_to_hbm [thread:$0]  %s3910_s2, 16, %s5811_s13, [#allocation5]   ;;  %v4839_v54 = vtrunc.f32 %v5306_v59  ;;  %v4841_v32 = vtrunc.f32 %v5391_v29  ;;  %v4843_v0 = vtrunc.f32 %v5476_v46  ;;  %v4845_v35 = vtrunc.f32 %v5561_v45 }
0x3c02   :  { %v4847_v17 = vtrunc.f32 %v5671_v15  ;;  %s5015_s13 = smov [#allocation2]  }
0x3c03   :  { %v4840_v30 = vcvt.f32.s32 %v4839_v54  ;;  %v4842_v31 = vcvt.f32.s32 %v4841_v32  ;;  %v4844_v23 = vcvt.f32.s32 %v4843_v0  ;;  %v4846_v40 = vcvt.f32.s32 %v4845_v35  ;;  %s3899_s10 = sshll.u32 %s5015_s13, 4  ;;  %s3900_s10 = int_to_ptr.vmem [resolvable:$true] %s3899_s10 }
0x3c04   :  { %v4848_v37 = vcvt.f32.s32 %v4847_v17  ;;  %s4982_s24 = scalar_lea.vmem %s3900_s10, 16  ;;  %s4986_s4 = scalar_lea.vmem %s3900_s10, 32 }
0x3c05   :  { %v663_v10 = vsel %vm661_vm15, %v4840_v30, 0  ;;  %p4983_p8 = scmp.ne.s32.totalorder %s3900_s10, %s4982_s24  ;;  %p4987_p9 = scmp.lt.s32.totalorder %s3900_s10, %s3900_s10 }
0x3c06   :  { %v1308_v59 = vsel %vm1306_vm0, %v4842_v31, %v663_v10  ;;  %p4988_p10 = scmp.lt.s32.totalorder %s4986_s4, %s4982_s24 }
0x3c07   :  { %v1953_v29 = vsel %vm1951_vm1, %v4844_v23, %v1308_v59 }
0x3c08   :  { %v2598_v45 = vsel %vm2596_vm2, %v4846_v40, %v1953_v29  ;;  %p4989_p11 = por %p4988_p10, %p4987_p9 }
0x3c09   :  { %v3243_v15 = vsel %vm3241_vm3, %v4848_v37, %v2598_v45 }
0x3c0a   :  { %p4990_p12 = pnand %p4989_p11, %p4983_p8 }
0x3c86   :  { %v3885_v44 = vpop.xlane.xlu1 %3884 }
0x3c87   :  { %v4849_v52 = vtrunc.f32 %v3885_v44 }
0x3c89   :  { %v4850_v46 = vcvt.f32.s32 %v4849_v52 }
0x3c8b   :  { %v3888_v63 = vsel %vm3886_vm5, %v4850_v46, %v3243_v15 }
0x3c8c   :  { %3891 = vst.msk [vmem:[#allocation2] sm:$0x1] %vm3890_vm6, %v3888_v63 }
0x3c8d   :  { %4993 = shalt.err (!%p4990_p12)
}
0x3c8e   :  { %s4994_s8 = scalar_lea.hbm %s5810_s12, 16 }
0x3c8f   :  { %p4995_p13 = scmp.ne.s32.totalorder %s5810_s12, %s4994_s8  ;;  %p4998_p0 = scmp.lt.u32.totalorder %s4994_s8, %s5810_s12 }
0x3c91   :  { %p5000_p1 = pnand %p4998_p0, %p4995_p13 }
0x3c93   :  { %5003 = shalt.err (!%p5000_p1)
}
0x3c94   :  { %3902 = dma.vmem_to_hbm [thread:$0]  %s3900_s10, 16, %s5810_s12, [#allocation3]  }
0x3c95   :  { %5004 = dma.done.wait [#allocation3], 16  }
0x3c96   :  { %5005 = vsyncadd [#allocation3], 4294967280 }
0x3c97   :  { %5006 = dma.done.wait [#allocation5], 16  }
0x3c98   :  { %5007 = vsyncadd [#allocation5], 4294967280 }
0x3c99   :  { %3919 = vsyncpa [#allocation3], 1 }
0x3c9a   :  { %3920 = vsyncpa [#allocation5], 1 }

</bundles_post_ra>
